<compile_context>
chip_gen: v6e
topology: v6e:2x2x1
jax: 0.10.0
libtpu: 0.0.40
codegen_flags: <defaults>
</compile_context>

<pallas_src>
import functools
import math

import jax
import jax.numpy as jnp
from jax import lax
from jax.experimental import pallas as pl
from jax.experimental.pallas import tpu as pltpu


# ----------------------------------------------------------------------------
# helpers
# ----------------------------------------------------------------------------
def _tile_cummax(a):
    """Cumulative max along axis 0 (seq) via a Hillis-Steele log-step scan.

    O(T*H*log T) work, no (T, T, H) intermediate.
    """
    t, h = a.shape
    cm = a
    off = 1
    while off < t:
        pad = jnp.full((off, h), -jnp.inf, cm.dtype)
        shifted = jnp.concatenate([pad, cm[: t - off, :]], axis=0)
        cm = jnp.maximum(cm, shifted)
        off *= 2
    return cm


def _w_spec(shape):
    """Full-array (weight) BlockSpec for a 2-D operand on a 2-D grid."""
    return pl.BlockSpec(shape, lambda b, s: (0, 0))


# ----------------------------------------------------------------------------
# fused decoder-layer kernel (down-proj + MaxState + gated FFN + LN + residuals)
# ----------------------------------------------------------------------------
def _decoder_layer_kernel(alpha_ref, pos_ref, x_ref,
                          wdp_ref, wdx_ref, w0_ref, w1_ref, w2_ref,
                          wf1_ref, bf1_ref, wg_ref, bg_ref, wf2_ref, bf2_ref,
                          gamma_ref, beta_ref,
                          o_ref, carry_ref,
                          *, head_size, eps, ffn_chunk):
    s_idx = pl.program_id(1)

    # Reset the running cumulative-max carry at the start of each batch row.
    @pl.when(s_idx == 0)
    def _():
        carry_ref[...] = jnp.full(carry_ref.shape, -jnp.inf, carry_ref.dtype)

    pos = pos_ref[0].astype(jnp.bfloat16)          # (T, H)
    x_prev = x_ref[0]                              # (T, H) f32

    # ---- down projection: concat([pos, x], -1) @ Wd == pos @ Wd[:H] + x @ Wd[H:]
    x_in = (jnp.dot(pos, wdp_ref[...], preferred_element_type=jnp.float32)
            + jnp.dot(x_prev.astype(jnp.bfloat16), wdx_ref[...],
                      preferred_element_type=jnp.float32))        # (T, H) f32

    # ---- MaxState "attention"
    xb = x_in.astype(jnp.bfloat16)
    out = jnp.dot(xb, w0_ref[...], preferred_element_type=jnp.float32)
    out1 = jnp.dot(xb, w1_ref[...], preferred_element_type=jnp.float32)
    out2 = jnp.dot(xb, w2_ref[...], preferred_element_type=jnp.float32)

    # Head split/permute never mixes channels, so a per-channel cummax over the
    # sequence on (T, H) equals the (B, K, S, Hd) formulation of the module.
    a = (out + out1) * (1.0 / math.sqrt(head_size))
    cm = _tile_cummax(a)                           # within-tile scan
    cm = jnp.maximum(cm, carry_ref[...])           # fold in previous seq tiles
    carry_ref[...] = cm[-1:, :]                    # carry running max forward

    attn = (cm + out2) * cm + out1                 # (T, H) f32
    attn_b = attn.astype(jnp.bfloat16)

    # ---- gated FeedForward, chunked along the 2H intermediate dimension.
    h2 = wf1_ref.shape[1]
    ff = jnp.zeros(x_in.shape, jnp.float32)
    for c0 in range(0, h2, ffn_chunk):
        c1 = min(c0 + ffn_chunk, h2)
        x1 = (jnp.dot(attn_b, wf1_ref[:, c0:c1],
                      preferred_element_type=jnp.float32) + bf1_ref[:, c0:c1])
        x2 = jnp.maximum(
            jnp.dot(attn_b, wg_ref[:, c0:c1],
                    preferred_element_type=jnp.float32) + bg_ref[:, c0:c1], 0.0)
        ff = ff + jnp.dot((x1 * x2).astype(jnp.bfloat16), wf2_ref[c0:c1, :],
                          preferred_element_type=jnp.float32)
    ff = ff + bf2_ref[...]

    # ---- residual mix + LayerNorm (f32)
    alpha = alpha_ref[0, 0]
    y = alpha * ff + (1.0 - alpha) * x_in
    mu = jnp.mean(y, axis=-1, keepdims=True)
    var = jnp.mean(jnp.square(y - mu), axis=-1, keepdims=True)
    yn = (y - mu) * lax.rsqrt(var + eps)
    x1_out = yn * gamma_ref[...] + beta_ref[...]

    # ---- outer residual from SamOut.state_forward: x_next = layer(x_in) + x_in
    o_ref[0] = (x1_out + x_in).astype(o_ref.dtype)


def decoder_layer_step(x, pos, layer_params, *, num_heads, seq_tile=128,
                       ffn_chunk=512, eps=1e-5,
                       vmem_limit_bytes=48 * 1024 * 1024):
    """One SamOut decoder block (down-proj + DecoderLayer + outer residual)."""
    (wd_p, wd_x, w0, w1, w2, wf1, bf1, wg, bg, wf2, bf2,
     gamma, beta, alpha) = layer_params
    B, S, H = x.shape
    head_size = H // num_heads
    T = seq_tile if S % seq_tile == 0 else S
    h2 = wf1.shape[1]
    chunk = min(ffn_chunk, h2)

    kernel = functools.partial(_decoder_layer_kernel, head_size=head_size,
                               eps=eps, ffn_chunk=chunk)

    return pl.pallas_call(
        kernel,
        out_shape=jax.ShapeDtypeStruct((B, S, H), x.dtype),
        grid=(B, S // T),
        in_specs=[
            pl.BlockSpec(memory_space=pltpu.MemorySpace.SMEM),    # alpha (1,1)
            pl.BlockSpec((1, T, H), lambda b, s: (0, s, 0)),      # pos
            pl.BlockSpec((1, T, H), lambda b, s: (b, s, 0)),      # x
            _w_spec((H, H)), _w_spec((H, H)),                     # down (pos/x halves)
            _w_spec((H, H)), _w_spec((H, H)), _w_spec((H, H)),    # head0/1/2
            _w_spec((H, h2)), _w_spec((1, h2)),                   # ffn1 W, b
            _w_spec((H, h2)), _w_spec((1, h2)),                   # gate W, b
            _w_spec((h2, H)), _w_spec((1, H)),                    # ffn2 W, b
            _w_spec((1, H)), _w_spec((1, H)),                     # LayerNorm gamma, beta
        ],
        out_specs=pl.BlockSpec((1, T, H), lambda b, s: (b, s, 0)),
        scratch_shapes=[pltpu.VMEM((1, H), jnp.float32)],         # running cummax carry
        compiler_params=pltpu.CompilerParams(
            dimension_semantics=("parallel", "arbitrary"),
            vmem_limit_bytes=vmem_limit_bytes,
        ),
    )(alpha, pos, x, wd_p, wd_x, w0, w1, w2, wf1, bf1, wg, bg, wf2, bf2,
      gamma, beta)


# ----------------------------------------------------------------------------
# vocab head (bias-free linear), row-tiled Pallas matmul
# ----------------------------------------------------------------------------
def _head_kernel(x_ref, w_ref, o_ref):
    o_ref[...] = jnp.dot(x_ref[...].astype(jnp.bfloat16), w_ref[...],
                         preferred_element_type=jnp.float32).astype(o_ref.dtype)


def head_projection(x, head_w, *, row_tile=128):
    B, S, H = x.shape
    V = head_w.shape[1]
    M = B * S
    tm = row_tile if M % row_tile == 0 else M
    xm = x.reshape(M, H)
    out = pl.pallas_call(
        _head_kernel,
        out_shape=jax.ShapeDtypeStruct((M, V), x.dtype),
        grid=(M // tm,),
        in_specs=[pl.BlockSpec((tm, H), lambda i: (i, 0)),
                  pl.BlockSpec((H, V), lambda i: (0, 0))],
        out_specs=pl.BlockSpec((tm, V), lambda i: (i, 0)),
        compiler_params=pltpu.CompilerParams(
            dimension_semantics=("parallel",)),
    )(xm, head_w)
    return out.reshape(B, S, V)


# ----------------------------------------------------------------------------
# full SamOut forward
# ----------------------------------------------------------------------------
def _position_embedding(pos_emb, seq_len):
    idx = jnp.arange(seq_len)
    if seq_len >= 1024:
        pos = (jnp.take(pos_emb, idx // 1024, axis=0)
               + jnp.take(pos_emb, idx % 1024, axis=0))
    else:
        pos = jnp.take(pos_emb, idx, axis=0)
    return pos[None]                                   # (1, S, H)


def samout_forward(tokens, params, *, num_heads, seq_tile=128):
    emb, pos_emb, layer_params, head_w = params
    # TODO(synk): the token/position embedding lookups are data-dependent
    # gathers; they stay in plain JAX (a Pallas version would need
    # pl.Element row-gather BlockSpecs driven by scalar prefetch).
    x = jnp.take(emb, tokens, axis=0)                  # (B, S, H) f32
    pos = _position_embedding(pos_emb, tokens.shape[1])
    for lp in layer_params:
        x = decoder_layer_step(x, pos, lp, num_heads=num_heads,
                               seq_tile=seq_tile)
    return head_projection(x, head_w)


# ----------------------------------------------------------------------------
# pure-JAX reference (same bf16 matmul weights, f32 accumulation/elementwise)
# ----------------------------------------------------------------------------
def samout_ref(tokens, params, *, num_heads, eps=1e-5):
    emb, pos_emb, layer_params, head_w = params
    x = jnp.take(emb, tokens, axis=0)
    pos = _position_embedding(pos_emb, tokens.shape[1])

    def mm(a, w):
        return jnp.dot(a.astype(jnp.bfloat16), w,
                       preferred_element_type=jnp.float32)

    for lp in layer_params:
        (wd_p, wd_x, w0, w1, w2, wf1, bf1, wg, bg, wf2, bf2,
         gamma, beta, alpha) = lp
        H = w0.shape[0]
        head_size = H // num_heads
        x_in = mm(jnp.broadcast_to(pos, x.shape), wd_p) + mm(x, wd_x)
        out, out1, out2 = mm(x_in, w0), mm(x_in, w1), mm(x_in, w2)
        a = (out + out1) * (1.0 / math.sqrt(head_size))
        cm = lax.cummax(a, axis=1)
        attn = (cm + out2) * cm + out1
        x1 = mm(attn, wf1) + bf1
        x2 = jnp.maximum(mm(attn, wg) + bg, 0.0)
        ff = mm(x1 * x2, wf2) + bf2
        al = alpha[0, 0]
        y = al * ff + (1.0 - al) * x_in
        mu = jnp.mean(y, axis=-1, keepdims=True)
        var = jnp.mean(jnp.square(y - mu), axis=-1, keepdims=True)
        x1_out = (y - mu) / jnp.sqrt(var + eps) * gamma + beta
        x = x1_out + x_in
    return mm(x, head_w)


# ----------------------------------------------------------------------------
# parameters
# ----------------------------------------------------------------------------
def make_params(key, voc_size, hidden, num_layers):
    H = hidden
    keys = jax.random.split(key, 3 + num_layers)
    # nn.Embedding init ~ N(0, 1); padding_idx=3 row zeroed.
    emb = jax.random.normal(keys[0], (voc_size, H), jnp.float32).at[3].set(0.0)
    pos_emb = jax.random.normal(keys[1], (1024, H), jnp.float32)

    def u(k, shape, fan_in):
        bound = 1.0 / math.sqrt(fan_in)
        return jax.random.uniform(k, shape, jnp.float32, -bound, bound)

    def bf16(w):
        return w.astype(jnp.bfloat16)

    layers = []
    for i in range(num_layers):
        ks = jax.random.split(keys[2 + i], 10)
        wd = u(ks[0], (2 * H, H), 2 * H)               # down[i] (no bias)
        w0 = u(ks[1], (H, H), H)
        w1 = u(ks[2], (H, H), H)
        w2 = u(ks[3], (H, H), H)
        wf1 = u(ks[4], (H, 2 * H), H)
        bf1 = u(ks[5], (1, 2 * H), H)
        wg = u(ks[6], (H, 2 * H), H)
        bg = u(ks[7], (1, 2 * H), H)
        wf2 = u(ks[8], (2 * H, H), 2 * H)
        bf2 = u(ks[9], (1, H), 2 * H)
        gamma = jnp.ones((1, H), jnp.float32)
        beta = jnp.zeros((1, H), jnp.float32)
        alpha = jnp.full((1, 1), 0.5, jnp.float32)
        layers.append((bf16(wd[:H]), bf16(wd[H:]), bf16(w0), bf16(w1), bf16(w2),
                       bf16(wf1), bf1, bf16(wg), bg, bf16(wf2), bf2,
                       gamma, beta, alpha))
    head_w = bf16(u(keys[2 + num_layers], (H, voc_size), H))
    return emb, pos_emb, tuple(layers), head_w


if __name__ == "__main__":
    # Small but lane/sublane-aligned shapes: H and 2H multiples of 128,
    # two 128-row sequence tiles per batch row to exercise the cummax carry.
    B, S, H, HEADS, LAYERS, VOC = 2, 256, 128, 4, 2, 256
    key = jax.random.PRNGKey(0)
    k_tok, k_par = jax.random.split(key)
    tokens = jax.random.randint(k_tok, (B, S), 0, VOC, dtype=jnp.int32)
    params = make_params(k_par, VOC, H, LAYERS)

    logits = samout_forward(tokens, params, num_heads=HEADS, seq_tile=128)
    logits = jax.block_until_ready(logits)

    ref = samout_ref(tokens, params, num_heads=HEADS)
    assert logits.shape == (B, S, VOC)
    assert jnp.allclose(logits, ref, rtol=1e-2, atol=1e-2), "mismatch vs reference"

    print("KERNEL_OK")
</pallas_src>

<mosaic_0001>
module attributes {stable_mosaic.version = 11 : i64} {
  func.func @_decoder_layer_kernel(%arg0: i32, %arg1: i32, %arg2: memref<1x1xf32, #tpu.memory_space<smem>>, %arg3: memref<1x128x128xf32, #tpu.memory_space<vmem>>, %arg4: memref<1x128x128xf32, #tpu.memory_space<vmem>>, %arg5: memref<128x128xbf16, #tpu.memory_space<vmem>>, %arg6: memref<128x128xbf16, #tpu.memory_space<vmem>>, %arg7: memref<128x128xbf16, #tpu.memory_space<vmem>>, %arg8: memref<128x128xbf16, #tpu.memory_space<vmem>>, %arg9: memref<128x128xbf16, #tpu.memory_space<vmem>>, %arg10: memref<128x256xbf16, #tpu.memory_space<vmem>>, %arg11: memref<1x256xf32, #tpu.memory_space<vmem>>, %arg12: memref<128x256xbf16, #tpu.memory_space<vmem>>, %arg13: memref<1x256xf32, #tpu.memory_space<vmem>>, %arg14: memref<256x128xbf16, #tpu.memory_space<vmem>>, %arg15: memref<1x128xf32, #tpu.memory_space<vmem>>, %arg16: memref<1x128xf32, #tpu.memory_space<vmem>>, %arg17: memref<1x128xf32, #tpu.memory_space<vmem>>, %arg18: memref<1x128x128xf32, #tpu.memory_space<vmem>>, %arg19: memref<1x128xf32, #tpu.memory_space<vmem>>) attributes {dimension_semantics = [#tpu.dimension_semantics<parallel>, #tpu.dimension_semantics<arbitrary>], iteration_bounds = array<i64: 2, 2>, scalar_prefetch = 0 : i64, scratch_operands = 1 : i64, tpu.core_type = #tpu.core_type<tc>, window_params = [{transform_indices = @transform_0, window_bounds = array<i64: 1, 1>}, {transform_indices = @transform_1, window_bounds = array<i64: 1, 128, 128>}, {transform_indices = @transform_2, window_bounds = array<i64: 1, 128, 128>}, {pipeline_mode = #tpu.pipeline_mode<synchronous>, transform_indices = @transform_3, window_bounds = array<i64: 128, 128>}, {pipeline_mode = #tpu.pipeline_mode<synchronous>, transform_indices = @transform_4, window_bounds = array<i64: 128, 128>}, {pipeline_mode = #tpu.pipeline_mode<synchronous>, transform_indices = @transform_5, window_bounds = array<i64: 128, 128>}, {pipeline_mode = #tpu.pipeline_mode<synchronous>, transform_indices = @transform_6, window_bounds = array<i64: 128, 128>}, {pipeline_mode = #tpu.pipeline_mode<synchronous>, transform_indices = @transform_7, window_bounds = array<i64: 128, 128>}, {pipeline_mode = #tpu.pipeline_mode<synchronous>, transform_indices = @transform_8, window_bounds = array<i64: 128, 256>}, {pipeline_mode = #tpu.pipeline_mode<synchronous>, transform_indices = @transform_9, window_bounds = array<i64: 1, 256>}, {pipeline_mode = #tpu.pipeline_mode<synchronous>, transform_indices = @transform_10, window_bounds = array<i64: 128, 256>}, {pipeline_mode = #tpu.pipeline_mode<synchronous>, transform_indices = @transform_11, window_bounds = array<i64: 1, 256>}, {pipeline_mode = #tpu.pipeline_mode<synchronous>, transform_indices = @transform_12, window_bounds = array<i64: 256, 128>}, {pipeline_mode = #tpu.pipeline_mode<synchronous>, transform_indices = @transform_13, window_bounds = array<i64: 1, 128>}, {pipeline_mode = #tpu.pipeline_mode<synchronous>, transform_indices = @transform_14, window_bounds = array<i64: 1, 128>}, {pipeline_mode = #tpu.pipeline_mode<synchronous>, transform_indices = @transform_15, window_bounds = array<i64: 1, 128>}, {transform_indices = @transform_16, window_bounds = array<i64: 1, 128, 128>}]} {
    %c0_i32 = arith.constant 0 : i32
    %0 = arith.cmpi eq, %arg1, %c0_i32 : i32
    %1 = arith.extui %0 : i1 to i32
    %c0_i32_0 = arith.constant 0 : i32
    %2 = arith.cmpi ne, %1, %c0_i32_0 : i32
    scf.if %2 {
      %cst_64 = arith.constant 0xFF800000 : f32
      %117 = vector.broadcast %cst_64 : f32 to vector<1x128xf32>
      %c0_65 = arith.constant 0 : index
      %c0_66 = arith.constant 0 : index
      %118 = vector.load %arg19[%c0_65, %c0_66] : memref<1x128xf32, #tpu.memory_space<vmem>>, vector<1x128xf32>
      tpu.vector_store %arg19[%c0_65, %c0_66], %117 {strides = array<i32>} : memref<1x128xf32, #tpu.memory_space<vmem>>, vector<1x128xf32>,
    } else {
    }
    %c0 = arith.constant 0 : index
    %c0_1 = arith.constant 0 : index
    %c0_2 = arith.constant 0 : index
    %3 = vector.load %arg3[%c0, %c0_1, %c0_2] : memref<1x128x128xf32, #tpu.memory_space<vmem>>, vector<1x128x128xf32>
    %4 = vector.shape_cast %3 : vector<1x128x128xf32> to vector<128x128xf32>
    %5 = arith.truncf %4 : vector<128x128xf32> to vector<128x128xbf16>
    %c0_3 = arith.constant 0 : index
    %c0_4 = arith.constant 0 : index
    %c0_5 = arith.constant 0 : index
    %6 = vector.load %arg4[%c0_3, %c0_4, %c0_5] : memref<1x128x128xf32, #tpu.memory_space<vmem>>, vector<1x128x128xf32>
    %7 = vector.shape_cast %6 : vector<1x128x128xf32> to vector<128x128xf32>
    %c0_6 = arith.constant 0 : index
    %c0_7 = arith.constant 0 : index
    %8 = vector.load %arg5[%c0_6, %c0_7] : memref<128x128xbf16, #tpu.memory_space<vmem>>, vector<128x128xbf16>
    %cst = arith.constant dense<0.000000e+00> : vector<128x128xf32>
    %9 = tpu.matmul %5, %8, %cst {dimension_numbers = #tpu.dot_dimension_numbers<[1], [0], [0], [1], [0, 0, 1, 1], [], []>} : vector<128x128xbf16>, vector<128x128xbf16>, vector<128x128xf32> -> vector<128x128xf32>
    %10 = arith.truncf %7 : vector<128x128xf32> to vector<128x128xbf16>
    %c0_8 = arith.constant 0 : index
    %c0_9 = arith.constant 0 : index
    %11 = vector.load %arg6[%c0_8, %c0_9] : memref<128x128xbf16, #tpu.memory_space<vmem>>, vector<128x128xbf16>
    %cst_10 = arith.constant dense<0.000000e+00> : vector<128x128xf32>
    %12 = tpu.matmul %10, %11, %cst_10 {dimension_numbers = #tpu.dot_dimension_numbers<[1], [0], [0], [1], [0, 0, 1, 1], [], []>} : vector<128x128xbf16>, vector<128x128xbf16>, vector<128x128xf32> -> vector<128x128xf32>
    %13 = arith.addf %9, %12 : vector<128x128xf32>
    %14 = arith.truncf %13 : vector<128x128xf32> to vector<128x128xbf16>
    %c0_11 = arith.constant 0 : index
    %c0_12 = arith.constant 0 : index
    %15 = vector.load %arg7[%c0_11, %c0_12] : memref<128x128xbf16, #tpu.memory_space<vmem>>, vector<128x128xbf16>
    %cst_13 = arith.constant dense<0.000000e+00> : vector<128x128xf32>
    %16 = tpu.matmul %14, %15, %cst_13 {dimension_numbers = #tpu.dot_dimension_numbers<[1], [0], [0], [1], [0, 0, 1, 1], [], []>} : vector<128x128xbf16>, vector<128x128xbf16>, vector<128x128xf32> -> vector<128x128xf32>
    %c0_14 = arith.constant 0 : index
    %c0_15 = arith.constant 0 : index
    %17 = vector.load %arg8[%c0_14, %c0_15] : memref<128x128xbf16, #tpu.memory_space<vmem>>, vector<128x128xbf16>
    %cst_16 = arith.constant dense<0.000000e+00> : vector<128x128xf32>
    %18 = tpu.matmul %14, %17, %cst_16 {dimension_numbers = #tpu.dot_dimension_numbers<[1], [0], [0], [1], [0, 0, 1, 1], [], []>} : vector<128x128xbf16>, vector<128x128xbf16>, vector<128x128xf32> -> vector<128x128xf32>
    %c0_17 = arith.constant 0 : index
    %c0_18 = arith.constant 0 : index
    %19 = vector.load %arg9[%c0_17, %c0_18] : memref<128x128xbf16, #tpu.memory_space<vmem>>, vector<128x128xbf16>
    %cst_19 = arith.constant dense<0.000000e+00> : vector<128x128xf32>
    %20 = tpu.matmul %14, %19, %cst_19 {dimension_numbers = #tpu.dot_dimension_numbers<[1], [0], [0], [1], [0, 0, 1, 1], [], []>} : vector<128x128xbf16>, vector<128x128xbf16>, vector<128x128xf32> -> vector<128x128xf32>
    %21 = arith.addf %16, %18 : vector<128x128xf32>
    %cst_20 = arith.constant 0.176776692 : f32
    %22 = vector.broadcast %cst_20 : f32 to vector<128x128xf32>
    %23 = arith.mulf %21, %22 : vector<128x128xf32>
    %cst_21 = arith.constant 0xFF800000 : f32
    %24 = vector.broadcast %cst_21 : f32 to vector<1x128xf32>
    %25 = vector.extract_strided_slice %23 {offsets = [0, 0], sizes = [127, 128], strides = [1, 1]} : vector<128x128xf32> to vector<127x128xf32>
    %26 = tpu.concatenate %24, %25 in 0 : vector<1x128xf32>, vector<127x128xf32> -> vector<128x128xf32>
    %27 = arith.maximumf %23, %26 : vector<128x128xf32>
    %cst_22 = arith.constant 0xFF800000 : f32
    %28 = vector.broadcast %cst_22 : f32 to vector<2x128xf32>
    %29 = vector.extract_strided_slice %27 {offsets = [0, 0], sizes = [126, 128], strides = [1, 1]} : vector<128x128xf32> to vector<126x128xf32>
    %30 = tpu.concatenate %28, %29 in 0 : vector<2x128xf32>, vector<126x128xf32> -> vector<128x128xf32>
    %31 = arith.maximumf %27, %30 : vector<128x128xf32>
    %cst_23 = arith.constant 0xFF800000 : f32
    %32 = vector.broadcast %cst_23 : f32 to vector<4x128xf32>
    %33 = vector.extract_strided_slice %31 {offsets = [0, 0], sizes = [124, 128], strides = [1, 1]} : vector<128x128xf32> to vector<124x128xf32>
    %34 = tpu.concatenate %32, %33 in 0 : vector<4x128xf32>, vector<124x128xf32> -> vector<128x128xf32>
    %35 = arith.maximumf %31, %34 : vector<128x128xf32>
    %cst_24 = arith.constant 0xFF800000 : f32
    %36 = vector.broadcast %cst_24 : f32 to vector<8x128xf32>
    %37 = vector.extract_strided_slice %35 {offsets = [0, 0], sizes = [120, 128], strides = [1, 1]} : vector<128x128xf32> to vector<120x128xf32>
    %38 = tpu.concatenate %36, %37 in 0 : vector<8x128xf32>, vector<120x128xf32> -> vector<128x128xf32>
    %39 = arith.maximumf %35, %38 : vector<128x128xf32>
    %cst_25 = arith.constant 0xFF800000 : f32
    %40 = vector.broadcast %cst_25 : f32 to vector<16x128xf32>
    %41 = vector.extract_strided_slice %39 {offsets = [0, 0], sizes = [112, 128], strides = [1, 1]} : vector<128x128xf32> to vector<112x128xf32>
    %42 = tpu.concatenate %40, %41 in 0 : vector<16x128xf32>, vector<112x128xf32> -> vector<128x128xf32>
    %43 = arith.maximumf %39, %42 : vector<128x128xf32>
    %cst_26 = arith.constant 0xFF800000 : f32
    %44 = vector.broadcast %cst_26 : f32 to vector<32x128xf32>
    %45 = vector.extract_strided_slice %43 {offsets = [0, 0], sizes = [96, 128], strides = [1, 1]} : vector<128x128xf32> to vector<96x128xf32>
    %46 = tpu.concatenate %44, %45 in 0 : vector<32x128xf32>, vector<96x128xf32> -> vector<128x128xf32>
    %47 = arith.maximumf %43, %46 : vector<128x128xf32>
    %cst_27 = arith.constant 0xFF800000 : f32
    %48 = vector.broadcast %cst_27 : f32 to vector<64x128xf32>
    %49 = vector.extract_strided_slice %47 {offsets = [0, 0], sizes = [64, 128], strides = [1, 1]} : vector<128x128xf32> to vector<64x128xf32>
    %50 = tpu.concatenate %48, %49 in 0 : vector<64x128xf32>, vector<64x128xf32> -> vector<128x128xf32>
    %51 = arith.maximumf %47, %50 : vector<128x128xf32>
    %c0_28 = arith.constant 0 : index
    %c0_29 = arith.constant 0 : index
    %52 = vector.load %arg19[%c0_28, %c0_29] : memref<1x128xf32, #tpu.memory_space<vmem>>, vector<1x128xf32>
    %53 = vector.broadcast %52 : vector<1x128xf32> to vector<128x128xf32>
    %54 = arith.maximumf %51, %53 : vector<128x128xf32>
    %55 = vector.extract_strided_slice %54 {offsets = [127, 0], sizes = [1, 128], strides = [1, 1]} : vector<128x128xf32> to vector<1x128xf32>
    %c0_30 = arith.constant 0 : index
    %c0_31 = arith.constant 0 : index
    %56 = vector.load %arg19[%c0_30, %c0_31] : memref<1x128xf32, #tpu.memory_space<vmem>>, vector<1x128xf32>
    tpu.vector_store %arg19[%c0_30, %c0_31], %55 {strides = array<i32>} : memref<1x128xf32, #tpu.memory_space<vmem>>, vector<1x128xf32>,
    %57 = arith.addf %54, %20 : vector<128x128xf32>
    %58 = arith.mulf %57, %54 : vector<128x128xf32>
    %59 = arith.addf %58, %18 : vector<128x128xf32>
    %60 = arith.truncf %59 : vector<128x128xf32> to vector<128x128xbf16>
    %cst_32 = arith.constant 0.000000e+00 : f32
    %61 = vector.broadcast %cst_32 : f32 to vector<128x128xf32>
    %c0_33 = arith.constant 0 : index
    %c0_34 = arith.constant 0 : index
    %62 = vector.load %arg10[%c0_33, %c0_34] : memref<128x256xbf16, #tpu.memory_space<vmem>>, vector<128x256xbf16>
    %cst_35 = arith.constant dense<0.000000e+00> : vector<128x256xf32>
    %63 = tpu.matmul %60, %62, %cst_35 {dimension_numbers = #tpu.dot_dimension_numbers<[1], [0], [0], [1], [0, 0, 1, 1], [], []>} : vector<128x128xbf16>, vector<128x256xbf16>, vector<128x256xf32> -> vector<128x256xf32>
    %c0_36 = arith.constant 0 : index
    %c0_37 = arith.constant 0 : index
    %64 = vector.load %arg11[%c0_36, %c0_37] : memref<1x256xf32, #tpu.memory_space<vmem>>, vector<1x256xf32>
    %65 = vector.broadcast %64 : vector<1x256xf32> to vector<128x256xf32>
    %66 = arith.addf %63, %65 : vector<128x256xf32>
    %c0_38 = arith.constant 0 : index
    %c0_39 = arith.constant 0 : index
    %67 = vector.load %arg12[%c0_38, %c0_39] : memref<128x256xbf16, #tpu.memory_space<vmem>>, vector<128x256xbf16>
    %cst_40 = arith.constant dense<0.000000e+00> : vector<128x256xf32>
    %68 = tpu.matmul %60, %67, %cst_40 {dimension_numbers = #tpu.dot_dimension_numbers<[1], [0], [0], [1], [0, 0, 1, 1], [], []>} : vector<128x128xbf16>, vector<128x256xbf16>, vector<128x256xf32> -> vector<128x256xf32>
    %c0_41 = arith.constant 0 : index
    %c0_42 = arith.constant 0 : index
    %69 = vector.load %arg13[%c0_41, %c0_42] : memref<1x256xf32, #tpu.memory_space<vmem>>, vector<1x256xf32>
    %70 = vector.broadcast %69 : vector<1x256xf32> to vector<128x256xf32>
    %71 = arith.addf %68, %70 : vector<128x256xf32>
    %cst_43 = arith.constant 0.000000e+00 : f32
    %72 = vector.broadcast %cst_43 : f32 to vector<128x256xf32>
    %73 = arith.maximumf %71, %72 : vector<128x256xf32>
    %74 = arith.mulf %66, %73 : vector<128x256xf32>
    %75 = arith.truncf %74 : vector<128x256xf32> to vector<128x256xbf16>
    %c0_44 = arith.constant 0 : index
    %c0_45 = arith.constant 0 : index
    %76 = vector.load %arg14[%c0_44, %c0_45] : memref<256x128xbf16, #tpu.memory_space<vmem>>, vector<256x128xbf16>
    %cst_46 = arith.constant dense<0.000000e+00> : vector<128x128xf32>
    %77 = tpu.matmul %75, %76, %cst_46 {dimension_numbers = #tpu.dot_dimension_numbers<[1], [0], [0], [1], [0, 0, 1, 1], [], []>} : vector<128x256xbf16>, vector<256x128xbf16>, vector<128x128xf32> -> vector<128x128xf32>
    %78 = arith.addf %61, %77 : vector<128x128xf32>
    %c0_47 = arith.constant 0 : index
    %c0_48 = arith.constant 0 : index
    %79 = vector.load %arg15[%c0_47, %c0_48] : memref<1x128xf32, #tpu.memory_space<vmem>>, vector<1x128xf32>
    %80 = vector.broadcast %79 : vector<1x128xf32> to vector<128x128xf32>
    %81 = arith.addf %78, %80 : vector<128x128xf32>
    %c0_49 = arith.constant 0 : index
    %c0_50 = arith.constant 0 : index
    %82 = memref.load %arg2[%c0_49, %c0_50] : memref<1x1xf32, #tpu.memory_space<smem>>
    %83 = vector.broadcast %82 : f32 to vector<128x128xf32>
    %84 = arith.mulf %83, %81 : vector<128x128xf32>
    %cst_51 = arith.constant 1.000000e+00 : f32
    %85 = arith.subf %cst_51, %82 : f32
    %86 = vector.broadcast %85 : f32 to vector<128x128xf32>
    %87 = arith.mulf %86, %13 : vector<128x128xf32>
    %88 = arith.addf %84, %87 : vector<128x128xf32>
    %cst_52 = arith.constant dense<0.000000e+00> : vector<128xf32>
    %89 = vector.multi_reduction <add>, %88, %cst_52 [1] : vector<128x128xf32> to vector<128xf32>
    %90 = vector.shape_cast %89 : vector<128xf32> to vector<128x1xf32>
    %cst_53 = arith.constant 1.280000e+02 : f32
    %91 = vector.broadcast %cst_53 : f32 to vector<128x1xf32>
    %92 = arith.divf %90, %91 : vector<128x1xf32>
    %93 = vector.broadcast %92 : vector<128x1xf32> to vector<128x128xf32>
    %94 = arith.subf %88, %93 : vector<128x128xf32>
    %95 = arith.mulf %94, %94 : vector<128x128xf32>
    %cst_54 = arith.constant dense<0.000000e+00> : vector<128xf32>
    %96 = vector.multi_reduction <add>, %95, %cst_54 [1] : vector<128x128xf32> to vector<128xf32>
    %97 = vector.shape_cast %96 : vector<128xf32> to vector<128x1xf32>
    %cst_55 = arith.constant 1.280000e+02 : f32
    %98 = vector.broadcast %cst_55 : f32 to vector<128x1xf32>
    %99 = arith.divf %97, %98 : vector<128x1xf32>
    %100 = vector.broadcast %92 : vector<128x1xf32> to vector<128x128xf32>
    %101 = arith.subf %88, %100 : vector<128x128xf32>
    %cst_56 = arith.constant 9.99999974E-6 : f32
    %102 = vector.broadcast %cst_56 : f32 to vector<128x1xf32>
    %103 = arith.addf %99, %102 : vector<128x1xf32>
    %104 = math.rsqrt %103 : vector<128x1xf32>
    %105 = vector.broadcast %104 : vector<128x1xf32> to vector<128x128xf32>
    %106 = arith.mulf %101, %105 : vector<128x128xf32>
    %c0_57 = arith.constant 0 : index
    %c0_58 = arith.constant 0 : index
    %107 = vector.load %arg16[%c0_57, %c0_58] : memref<1x128xf32, #tpu.memory_space<vmem>>, vector<1x128xf32>
    %108 = vector.broadcast %107 : vector<1x128xf32> to vector<128x128xf32>
    %109 = arith.mulf %106, %108 : vector<128x128xf32>
    %c0_59 = arith.constant 0 : index
    %c0_60 = arith.constant 0 : index
    %110 = vector.load %arg17[%c0_59, %c0_60] : memref<1x128xf32, #tpu.memory_space<vmem>>, vector<1x128xf32>
    %111 = vector.broadcast %110 : vector<1x128xf32> to vector<128x128xf32>
    %112 = arith.addf %109, %111 : vector<128x128xf32>
    %113 = arith.addf %112, %13 : vector<128x128xf32>
    %c0_61 = arith.constant 0 : index
    %c0_62 = arith.constant 0 : index
    %c0_63 = arith.constant 0 : index
    %114 = vector.load %arg18[%c0_61, %c0_62, %c0_63] : memref<1x128x128xf32, #tpu.memory_space<vmem>>, vector<1x128x128xf32>
    %115 = vector.shape_cast %114 : vector<1x128x128xf32> to vector<128x128xf32>
    %116 = vector.shape_cast %113 : vector<128x128xf32> to vector<1x128x128xf32>
    tpu.vector_store %arg18[%c0_61, %c0_62, %c0_63], %116 {strides = array<i32>} : memref<1x128x128xf32, #tpu.memory_space<vmem>>, vector<1x128x128xf32>,
    return
  }
  func.func @transform_0(%arg0: i32, %arg1: i32) -> (i32, i32) {
    %c0_i32 = arith.constant 0 : i32
    %c0_i32_0 = arith.constant 0 : i32
    %c0_i32_1 = arith.constant 0 : i32
    return %c0_i32, %c0_i32_0 : i32, i32
  }
  func.func @transform_1(%arg0: i32, %arg1: i32) -> (i32, i32, i32) {
    %c0_i32 = arith.constant 0 : i32
    %c0_i32_0 = arith.constant 0 : i32
    %c0_i32_1 = arith.constant 0 : i32
    return %c0_i32, %arg1, %c0_i32_0 : i32, i32, i32
  }
  func.func @transform_2(%arg0: i32, %arg1: i32) -> (i32, i32, i32) {
    %c0_i32 = arith.constant 0 : i32
    %c0_i32_0 = arith.constant 0 : i32
    return %arg0, %arg1, %c0_i32 : i32, i32, i32
  }
  func.func @transform_3(%arg0: i32, %arg1: i32) -> (i32, i32) {
    %c0_i32 = arith.constant 0 : i32
    %c0_i32_0 = arith.constant 0 : i32
    %c0_i32_1 = arith.constant 0 : i32
    return %c0_i32, %c0_i32_0 : i32, i32
  }
  func.func @transform_4(%arg0: i32, %arg1: i32) -> (i32, i32) {
    %c0_i32 = arith.constant 0 : i32
    %c0_i32_0 = arith.constant 0 : i32
    %c0_i32_1 = arith.constant 0 : i32
    return %c0_i32, %c0_i32_0 : i32, i32
  }
  func.func @transform_5(%arg0: i32, %arg1: i32) -> (i32, i32) {
    %c0_i32 = arith.constant 0 : i32
    %c0_i32_0 = arith.constant 0 : i32
    %c0_i32_1 = arith.constant 0 : i32
    return %c0_i32, %c0_i32_0 : i32, i32
  }
  func.func @transform_6(%arg0: i32, %arg1: i32) -> (i32, i32) {
    %c0_i32 = arith.constant 0 : i32
    %c0_i32_0 = arith.constant 0 : i32
    %c0_i32_1 = arith.constant 0 : i32
    return %c0_i32, %c0_i32_0 : i32, i32
  }
  func.func @transform_7(%arg0: i32, %arg1: i32) -> (i32, i32) {
    %c0_i32 = arith.constant 0 : i32
    %c0_i32_0 = arith.constant 0 : i32
    %c0_i32_1 = arith.constant 0 : i32
    return %c0_i32, %c0_i32_0 : i32, i32
  }
  func.func @transform_8(%arg0: i32, %arg1: i32) -> (i32, i32) {
    %c0_i32 = arith.constant 0 : i32
    %c0_i32_0 = arith.constant 0 : i32
    %c0_i32_1 = arith.constant 0 : i32
    return %c0_i32, %c0_i32_0 : i32, i32
  }
  func.func @transform_9(%arg0: i32, %arg1: i32) -> (i32, i32) {
    %c0_i32 = arith.constant 0 : i32
    %c0_i32_0 = arith.constant 0 : i32
    %c0_i32_1 = arith.constant 0 : i32
    return %c0_i32, %c0_i32_0 : i32, i32
  }
  func.func @transform_10(%arg0: i32, %arg1: i32) -> (i32, i32) {
    %c0_i32 = arith.constant 0 : i32
    %c0_i32_0 = arith.constant 0 : i32
    %c0_i32_1 = arith.constant 0 : i32
    return %c0_i32, %c0_i32_0 : i32, i32
  }
  func.func @transform_11(%arg0: i32, %arg1: i32) -> (i32, i32) {
    %c0_i32 = arith.constant 0 : i32
    %c0_i32_0 = arith.constant 0 : i32
    %c0_i32_1 = arith.constant 0 : i32
    return %c0_i32, %c0_i32_0 : i32, i32
  }
  func.func @transform_12(%arg0: i32, %arg1: i32) -> (i32, i32) {
    %c0_i32 = arith.constant 0 : i32
    %c0_i32_0 = arith.constant 0 : i32
    %c0_i32_1 = arith.constant 0 : i32
    return %c0_i32, %c0_i32_0 : i32, i32
  }
  func.func @transform_13(%arg0: i32, %arg1: i32) -> (i32, i32) {
    %c0_i32 = arith.constant 0 : i32
    %c0_i32_0 = arith.constant 0 : i32
    %c0_i32_1 = arith.constant 0 : i32
    return %c0_i32, %c0_i32_0 : i32, i32
  }
  func.func @transform_14(%arg0: i32, %arg1: i32) -> (i32, i32) {
    %c0_i32 = arith.constant 0 : i32
    %c0_i32_0 = arith.constant 0 : i32
    %c0_i32_1 = arith.constant 0 : i32
    return %c0_i32, %c0_i32_0 : i32, i32
  }
  func.func @transform_15(%arg0: i32, %arg1: i32) -> (i32, i32) {
    %c0_i32 = arith.constant 0 : i32
    %c0_i32_0 = arith.constant 0 : i32
    %c0_i32_1 = arith.constant 0 : i32
    return %c0_i32, %c0_i32_0 : i32, i32
  }
  func.func @transform_16(%arg0: i32, %arg1: i32) -> (i32, i32, i32) {
    %c0_i32 = arith.constant 0 : i32
    %c0_i32_0 = arith.constant 0 : i32
    return %arg0, %arg1, %c0_i32 : i32, i32, i32
  }
}

</mosaic_0001>

<bundles_post_ra>
// kernel: tpu_custom_call.1
= control target key start
LH: loop header
LB: loop body
LE: loop exit
PB: predicated region body
PF: predicated region fallthrough
CT: control target
= control target key end

     0   :  { %s5697_s0 = inlined_call_operand.<no memory space> [shape: f32[1,1], index: 0, kind: input, shape index: {}]   ;;  %s5698_s1 = inlined_call_operand.hbm [shape: f32[1,256,128], index: 1, kind: input, shape index: {}]   ;;  %s5699_s2 = inlined_call_operand.hbm [shape: f32[2,256,128], index: 2, kind: input, shape index: {}]   ;;  %s5700_s3 = inlined_call_operand.hbm [shape: bf16[128,128], index: 3, kind: input, shape index: {}]   ;;  %s5701_s4 = inlined_call_operand.hbm [shape: bf16[128,128], index: 4, kind: input, shape index: {}]   ;;  %s5702_s5 = inlined_call_operand.hbm [shape: bf16[128,128], index: 5, kind: input, shape index: {}]   ;;  %s5703_s6 = inlined_call_operand.hbm [shape: bf16[128,128], index: 6, kind: input, shape index: {}]   ;;  %s5704_s7 = inlined_call_operand.hbm [shape: bf16[128,128], index: 7, kind: input, shape index: {}]   ;;  %s5705_s8 = inlined_call_operand.hbm [shape: bf16[128,256], index: 8, kind: input, shape index: {}]   ;;  %s5706_s9 = inlined_call_operand.vmem [shape: f32[1,256], index: 9, kind: input, shape index: {}]   ;;  %s5707_s10 = inlined_call_operand.hbm [shape: bf16[128,256], index: 10, kind: input, shape index: {}]   ;;  %s5708_s11 = inlined_call_operand.vmem [shape: f32[1,256], index: 11, kind: input, shape index: {}]   ;;  %s5709_s12 = inlined_call_operand.hbm [shape: bf16[256,128], index: 12, kind: input, shape index: {}]   ;;  %s5710_s13 = inlined_call_operand.vmem [shape: f32[1,128], index: 13, kind: input, shape index: {}]   ;;  %s5711_s14 = inlined_call_operand.vmem [shape: f32[1,128], index: 14, kind: input, shape index: {}]   ;;  %s5712_s15 = inlined_call_operand.vmem [shape: f32[1,128], index: 15, kind: input, shape index: {}]   ;;  %s5713_s16 = inlined_call_operand.hbm [shape: f32[2,256,128], index: 16, kind: output, shape index: {}]  }
   0x1   :  { %5766 = sst [smem:[#allocation55_spill]] %s5697_s0 }
   0x2   :  { %5767 = sst [smem:[#allocation56_spill]] %s5698_s1 }
   0x3   :  { %5768 = sst [smem:[#allocation57_spill]] %s5699_s2 }
   0x4   :  { %5769 = sst [smem:[#allocation58_spill]] %s5700_s3 }
   0x5   :  { %5770 = sst [smem:[#allocation59_spill]] %s5701_s4 }
   0x6   :  { %5771 = sst [smem:[#allocation60_spill]] %s5702_s5 }
   0x7   :  { %5772 = sst [smem:[#allocation61_spill]] %s5703_s6 }
   0x8   :  { %5773 = sst [smem:[#allocation62_spill]] %s5704_s7 }
   0x9   :  { %5774 = sst [smem:[#allocation63_spill]] %s5705_s8 }
   0xa   :  { %5775 = sst [smem:[#allocation64_spill]] %s5706_s9 }
   0xb   :  { %5776 = sst [smem:[#allocation65_spill]] %s5707_s10 }
   0xc   :  { %5777 = sst [smem:[#allocation66_spill]] %s5708_s11 }
   0xd   :  { %5778 = sst [smem:[#allocation67_spill]] %s5709_s12 }
   0xe   :  { %5779 = sst [smem:[#allocation68_spill]] %s5710_s13 }
   0xf   :  { %5780 = sst [smem:[#allocation69_spill]] %s5711_s14 }
  0x10   :  { %5781 = sst [smem:[#allocation70_spill]] %s5712_s15 }
  0x11   :  { %5782 = sst [smem:[#allocation71_spill]] %s5713_s16 }
  0x12   :  { %s5783_s23 = sld [smem:[#allocation55_spill]] }
  0x18   :  { %21 = sst [smem:[#allocation3]] %s5783_s23 }
  0x19   :  { %22 = vsyncpa [#allocation5], 0 }
  0x1a   :  { %24 = vsyncpa [#allocation5 + $0x1], 0 }
  0x1b   :  { %25 = vsyncpa [#allocation8], 0 }
  0x1c   :  { %27 = vsyncpa [#allocation8 + $0x1], 0 }
  0x1d   :  { %28 = vsyncpa [#allocation11], 0 }
  0x1e   :  { %29 = vsyncpa [#allocation14], 0 }
  0x1f   :  { %30 = vsyncpa [#allocation17], 0 }
  0x20   :  { %31 = vsyncpa [#allocation20], 0 }
  0x21   :  { %32 = vsyncpa [#allocation6], 0 }
  0x22   :  { %34 = vsyncpa [#allocation6 + $0x1], 0  ;;  %s4539_s24 = smov 0   ;;  %s4541_s25 = smov 0  }
  0x23   :  { %s4543_s26 = smov 0   ;;  %s4545_s27 = smov 0  }
  0x24   :  { %s4547_s28 = smov 0   ;;  %s4549_s29 = smov 0  }
  0x25   :  { %s4551_s30 = smov 0   ;;  %s4553_s0 = smov 0  }
  0x26   :  { %s4555_s17 = smov 0   ;;  %s4557_s18 = smov 0  }
  0x27   :  { %s4559_s19 = smov 0  }
  0x28 LB: > { %5784 = sst [smem:[#allocation30_spill]] %s4390_s24  ;;  %s4595_s20 = sadd.s32 4294967295, %s4430_s19   ;;  %s4430_s19 = sphi %s4559_s19, %s40_s19   ;;  %s4426_s18 = sphi %s4557_s18, %s5893_s18   ;;  %s4422_s17 = sphi %s4555_s17, %s5892_s17   ;;  %s4418_s0 = sphi %s4553_s0, %s5891_s0   ;;  %s4414_s30 = sphi %s4551_s30, %s5890_s30   ;;  %s4410_s29 = sphi %s4549_s29, %s5882_s29   ;;  %s4406_s28 = sphi %s4547_s28, %s5889_s28   ;;  %s4402_s27 = sphi %s4545_s27, %s5888_s27   ;;  %s4398_s26 = sphi %s4543_s26, %s5887_s26   ;;  %s4394_s25 = sphi %s4541_s25, %s5886_s25   ;;  %s4390_s24 = sphi %s4539_s24, %s5885_s24  }
  0x29   : > { %5785 = sst [smem:[#allocation31_spill]] %s4410_s29  ;;  %p3241_p0 = scmp.ge.s32.totalorder %s4430_s19, 1 }
  0x2a   : > { %5786 = sst [smem:[#allocation32_spill]] %s4414_s30  ;;  %p5725_p1 = scmp.eq.s32.totalorder %s4595_s20, 0 }
  0x2b   : > { %5787 = sst [smem:[#allocation33_spill]] %s4418_s0  ;;  %p433_p2 = scmp.lt.s32.totalorder %s4430_s19, 5 }
  0x2c   : > { %s4432_s22 = smov [#allocation9]   ;;  %s4433_s0 = smov [#allocation10]  }
  0x2d   : > { %p4600_p3 = pnand %p3241_p0, %p433_p2  ;;  %s448_s23 = sshll.u32 %s4432_s22, 4  ;;  %s449_s23 = int_to_ptr.vmem [resolvable:$true] %s448_s23 }
  0x2e   : > { %s461_s15 = sshll.u32 %s4433_s0, 4  ;;  %s4434_s14 = smov [#allocation13]   ;;  %s462_s15 = int_to_ptr.vmem [resolvable:$true] %s461_s15 }
  0x2f   : > { %s5788_s21 = scalar_select %p4600_p3, 1, 0 }
  0x30   : > { %p3728_p4 = pneg %p4600_p3  ;;  %s487_s13 = sshll.u32 %s4434_s14, 4  ;;  %s488_s13 = int_to_ptr.vmem [resolvable:$true] %s487_s13 }
  0x31   : > { %5789 = sst [smem:[#allocation34_spill]] %s5788_s21  ;;  %s4033_s22 = scalar_lea.vmem %s449_s23, 1024 }
  0x32   : > { %p4608_p5 = pnand %p3728_p4, %p5725_p1  ;;  %p4034_p7 = scmp.ne.s32.totalorder %s449_s23, %s4033_s22 }
  0x33   : > { %p4041_p10 = scmp.lt.s32.totalorder %s449_s23, %s449_s23  ;;  %p4042_p11 = scmp.lt.s32.totalorder %s4033_s22, %s4033_s22 }
  0x34   : > { %p4614_p6 = pneg %p4608_p5 }
  0x35   : > { %p4043_p12 = por %p4042_p11, %p4041_p10 }
  0x36   : > { %p4036_p8 = pnand %p4034_p7, %p4614_p6 }
  0x38   : > { %p4037_p9 = pneg %p4036_p8 }
  0x3a   : > { %p4044_p13 = pnand %p4043_p12, %p4037_p9 }
  0x3c   : > { %4047 = shalt.err (!%p4044_p13)
}
  0x3d   : > { %s5716_s0 = smov 64   ;;  %s5718_s14 = smov 4  }
  0x3e   : > { %s5792_s3 = sld [smem:[#allocation58_spill]]  ;;  %s4059_s21 = scalar_lea.vmem %s462_s15, 1024 }
  0x3f   : > { %p4060_p0 = scmp.ne.s32.totalorder %s462_s15, %s4059_s21  ;;  %p4067_p7 = scmp.lt.s32.totalorder %s462_s15, %s462_s15 }
  0x40   : > { %p4068_p8 = scmp.lt.s32.totalorder %s4059_s21, %s4059_s21 }
  0x41   : > { %p4062_p2 = pnand %p4060_p0, %p4614_p6 }
  0x42   : > { %p4069_p9 = por %p4068_p8, %p4067_p7 }
  0x43   : > { %p4063_p4 = pneg %p4062_p2 }
  0x44   : > { %3731 = dma.hbm_to_vmem [thread:$0]  (!%p4608_p5), %s5792_s3, 1024, %s449_s23, [#allocation8], %s5716_s0, %s5716_s0, %s5718_s14  }
  0x45   : > { %p4070_p10 = pnand %p4069_p9, %p4063_p4 }
  0x47   : > { %4073 = shalt.err (!%p4070_p10)
}
  0x48   : > { %s5793_s4 = sld [smem:[#allocation59_spill]]  ;;  %s4085_s11 = scalar_lea.vmem %s488_s13, 1024 }
  0x49   : > { %p4086_p11 = scmp.ne.s32.totalorder %s488_s13, %s4085_s11  ;;  %p4093_p0 = scmp.lt.s32.totalorder %s488_s13, %s488_s13 }
  0x4a   : > { %p4094_p2 = scmp.lt.s32.totalorder %s4085_s11, %s4085_s11 }
  0x4b   : > { %p4088_p12 = pnand %p4086_p11, %p4614_p6 }
  0x4c   : > { %p4095_p4 = por %p4094_p2, %p4093_p0 }
  0x4d   : > { %p4089_p13 = pneg %p4088_p12 }
  0x4e   : > { %3734 = dma.hbm_to_vmem [thread:$0]  (!%p4608_p5), %s5793_s4, 1024, %s462_s15, [#allocation11], %s5716_s0, %s5716_s0, %s5718_s14  }
  0x4f   : > { %p4096_p7 = pnand %p4095_p4, %p4089_p13 }
  0x51   : > { %4099 = shalt.err (!%p4096_p7)
}
  0x52   : > { %s5794_s6 = sld [smem:[#allocation61_spill]]  ;;  %s4437_s15 = smov [#allocation16]  }
  0x53   : > { %s513_s21 = sshll.u32 %s4437_s15, 4  ;;  %s514_s21 = int_to_ptr.vmem [resolvable:$true] %s513_s21 }
  0x54   : > { %s4111_s23 = scalar_lea.vmem %s514_s21, 2048  ;;  %p4119_p11 = scmp.lt.s32.totalorder %s514_s21, %s514_s21 }
  0x55   : > { %p4112_p8 = scmp.ne.s32.totalorder %s514_s21, %s4111_s23  ;;  %p4120_p12 = scmp.lt.s32.totalorder %s4111_s23, %s4111_s23 }
  0x57   : > { %p4114_p9 = pnand %p4112_p8, %p4614_p6  ;;  %p4121_p13 = por %p4120_p12, %p4119_p11 }
  0x58   : > { %3740 = dma.hbm_to_vmem [thread:$0]  (!%p4608_p5), %s5794_s6, 1024, %s488_s13, [#allocation14], %s5716_s0, %s5716_s0, %s5718_s14  }
  0x59   : > { %p4115_p10 = pneg %p4114_p9 }
  0x5b   : > { %p4122_p0 = pnand %p4121_p13, %p4115_p10 }
  0x5d   : > { %4125 = shalt.err (!%p4122_p0)
}
  0x5e   : > { %s5720_s22 = smov 128   ;;  %s5722_s11 = smov 8  }
  0x5f   : > { %s5795_s8 = sld [smem:[#allocation63_spill]]  ;;  %s4440_s2 = smov [#allocation12]  }
  0x60   : > { %s474_s15 = sshll.u32 %s4440_s2, 4  ;;  %s4441_s0 = smov [#allocation15]   ;;  %s475_s15 = int_to_ptr.vmem [resolvable:$true] %s474_s15 }
  0x61   : > { %s500_s14 = sshll.u32 %s4441_s0, 4  ;;  %s4137_s23 = scalar_lea.vmem %s475_s15, 1024  ;;  %s501_s14 = int_to_ptr.vmem [resolvable:$true] %s500_s14 }
  0x62   : > { %p4138_p2 = scmp.ne.s32.totalorder %s475_s15, %s4137_s23  ;;  %p4145_p8 = scmp.lt.s32.totalorder %s475_s15, %s475_s15 }
  0x63   : > { %p4146_p9 = scmp.lt.s32.totalorder %s4137_s23, %s4137_s23 }
  0x64   : > { %p4140_p4 = pnand %p4138_p2, %p4614_p6 }
  0x65   : > { %3746 = dma.hbm_to_vmem [thread:$0]  (!%p4608_p5), %s5795_s8, 2048, %s514_s21, [#allocation17], %s5720_s22, %s5720_s22, %s5722_s11  }
  0x66   : > { %p4141_p7 = pneg %p4140_p4  ;;  %p4147_p10 = por %p4146_p9, %p4145_p8 }
  0x68   : > { %p4148_p11 = pnand %p4147_p10, %p4141_p7 }
  0x6a   : > { %4151 = shalt.err (!%p4148_p11)
}
  0x6b   : > { %s5796_s13 = smov 4   ;;  %s5797_s21 = smov 64  }
  0x6c   : > { %s5798_s5 = sld [smem:[#allocation60_spill]]  ;;  %s4163_s0 = scalar_lea.vmem %s501_s14, 1024 }
  0x6d   : > { %p4164_p12 = scmp.ne.s32.totalorder %s501_s14, %s4163_s0  ;;  %p4171_p2 = scmp.lt.s32.totalorder %s501_s14, %s501_s14 }
  0x6e   : > { %p4172_p4 = scmp.lt.s32.totalorder %s4163_s0, %s4163_s0 }
  0x6f   : > { %p4166_p13 = pnand %p4164_p12, %p4614_p6 }
  0x70   : > { %p4173_p8 = por %p4172_p4, %p4171_p2 }
  0x71   : > { %p4167_p0 = pneg %p4166_p13 }
  0x72   : > { %3737 = dma.hbm_to_vmem [thread:$0]  (!%p4608_p5), %s5798_s5, 1024, %s475_s15, [#allocation11], %s5797_s21, %s5797_s21, %s5796_s13  }
  0x73   : > { %p4174_p7 = pnand %p4173_p8, %p4167_p0 }
  0x75   : > { %4177 = shalt.err (!%p4174_p7)
}
  0x76   : > { %s5799_s7 = sld [smem:[#allocation62_spill]]  ;;  %s4442_s15 = smov [#allocation18]  }
  0x77   : > { %s529_s30 = sshll.u32 %s4442_s15, 4  ;;  %s4443_s2 = smov [#allocation19]   ;;  %s530_s30 = int_to_ptr.vmem [resolvable:$true] %s529_s30 }
  0x78   : > { %s545_s11 = sshll.u32 %s4443_s2, 4  ;;  %s4189_s0 = scalar_lea.vmem %s530_s30, 2048  ;;  %s546_s11 = int_to_ptr.vmem [resolvable:$true] %s545_s11 }
  0x79   : > { %p4190_p9 = scmp.ne.s32.totalorder %s530_s30, %s4189_s0  ;;  %p4197_p12 = scmp.lt.s32.totalorder %s530_s30, %s530_s30 }
  0x7a   : > { %p4198_p13 = scmp.lt.s32.totalorder %s4189_s0, %s4189_s0 }
  0x7b   : > { %p4192_p10 = pnand %p4190_p9, %p4614_p6 }
  0x7c   : > { %3743 = dma.hbm_to_vmem [thread:$0]  (!%p4608_p5), %s5799_s7, 1024, %s501_s14, [#allocation14], %s5797_s21, %s5797_s21, %s5796_s13  }
  0x7d   : > { %p4193_p11 = pneg %p4192_p10  ;;  %p4199_p0 = por %p4198_p13, %p4197_p12 }
  0x7f   : > { %p4200_p2 = pnand %p4199_p0, %p4193_p11 }
  0x81   : > { %4203 = shalt.err (!%p4200_p2)
}
  0x82   : > { %s5800_s22 = smov 8   ;;  %s5801_s14 = smov 128  }
  0x83   : > { %s5802_s10 = sld [smem:[#allocation65_spill]]  ;;  %s4215_s2 = scalar_lea.vmem %s546_s11, 2048 }
  0x84   : > { %p4216_p4 = scmp.ne.s32.totalorder %s546_s11, %s4215_s2  ;;  %p4223_p9 = scmp.lt.s32.totalorder %s546_s11, %s546_s11 }
  0x85   : > { %p4224_p10 = scmp.lt.s32.totalorder %s4215_s2, %s4215_s2 }
  0x86   : > { %p4218_p8 = pnand %p4216_p4, %p4614_p6 }
  0x87   : > { %p4225_p12 = por %p4224_p10, %p4223_p9 }
  0x88   : > { %p4219_p7 = pneg %p4218_p8 }
  0x89   : > { %3749 = dma.hbm_to_vmem [thread:$0]  (!%p4608_p5), %s5802_s10, 2048, %s530_s30, [#allocation17], %s5801_s14, %s5801_s14, %s5800_s22  }
  0x8a   : > { %p4226_p11 = pnand %p4225_p12, %p4219_p7 }
  0x8c   : > { %4229 = shalt.err (!%p4226_p11)
}
  0x8d   : > { %s5803_s12 = sld [smem:[#allocation67_spill]]  ;;  %s49_s9 = sadd.s32 1, %s4422_s17 }
  0x8e   : > { %s80_s16 = sadd.s32 1, %s4410_s29  ;;  %p4700_p6 = scmp.ge.s32.totalorder %s49_s9, 2 }
  0x8f   : > { %p87_p13 = scmp.ne.s32.totalorder %s4410_s29, %s4406_s28  ;;  %p5724_p0 = scmp.eq.s32.totalorder %s4430_s19, 0 }
  0x90   : > { %p93_p2 = scmp.ne.s32.totalorder %s4406_s28, %s4402_s27  ;;  %s5895_s9 = smov (%p4700_p6, %s49_s9), 0 }
  0x91   : > { %5805 = sst [smem:[#allocation35_spill]] %s5895_s9  ;;  %p4715_p4 = por %p5724_p0, %p87_p13 }
  0x92   : > { %p3772_p8 = scmp.lt.s32.totalorder %s4430_s19, 4  ;;  %s568_s27 = sand.u32 1, %s4410_s29  }
  0x93   : > { %3752 = dma.hbm_to_vmem [thread:$0]  (!%p4608_p5), %s5803_s12, 2048, %s546_s11, [#allocation20], %s5797_s21, %s5797_s21, %s5796_s13  }
  0x94   : > { %p4721_p5 = por %p5725_p1, %p93_p2  ;;  %s4727_s13 = ssub.s32 %s4422_s17, %s5895_s9 }
  0x95   : > { %p78_p7 = scmp.eq.s32.totalorder %s4727_s13, 0  ;;  %s3251_s21 = sshll.u32 %s568_s27, 7 }
  0x96   : > { %s3369_s15 = sshll.u32 %s4422_s17, 11  ;;  %s5809_s1 = sld [smem:[#allocation56_spill]] }
  0x97   : > { %s4733_s23 = scalar_select %p78_p7, %s4410_s29, %s80_s16  }
  0x98   : > { %s572_s5 = scalar_lea.vmem [#allocation4], %s3251_s21  ;;  %p4743_p9 = pnand %p3772_p8, %p4715_p4 }
  0x99   : > { %5808 = sst [smem:[#allocation36_spill]] %s4733_s23  ;;  %s579_s6 = sshll.u32 %s572_s5, 4  ;;  %s580_s6 = int_to_ptr.vmem [resolvable:$true] %s579_s6 }
  0x9a   : > { %s569_s8 = scalar_lea.sflag [#allocation5], %s568_s27  ;;  %p4232_p10 = pneg %p4743_p9 }
  0x9b   : > { %s4243_s16 = scalar_lea.vmem %s580_s6, 2048  ;;  %s4444_s10 = smov [#allocation4]  }
  0x9c   : > { %s578_s4 = scalar_lea.hbm %s5809_s1, %s3369_s15  ;;  %p4244_p12 = scmp.ne.s32.totalorder %s580_s6, %s4243_s16 }
  0x9d   : > { %s4248_s2 = sshll.u32 %s4444_s10, 4  ;;  %s4249_s2 = int_to_ptr.vmem [resolvable:$false] %s4248_s2 }
  0x9e   : > { %p4246_p11 = pnand %p4244_p12, %p4232_p10  ;;  %s4250_s21 = scalar_lea.vmem %s4249_s2, 4096 }
  0x9f   : > { %p4251_p2 = scmp.lt.s32.totalorder %s580_s6, %s4249_s2  ;;  %p4252_p7 = scmp.lt.s32.totalorder %s4250_s21, %s4243_s16 }
  0xa0   : > { %p4247_p13 = pneg %p4246_p11 }
  0xa1   : > { %p4253_p0 = por %p4252_p7, %p4251_p2 }
  0xa3   : > { %p4254_p1 = pnand %p4253_p0, %p4247_p13 }
  0xa5   : > { %4257 = shalt.err (!%p4254_p1)
}
  0xa6   : > { %3756 = dma.hbm_to_vmem [thread:$0]  (!%p4743_p9), %s578_s4, 2048, %s580_s6, %s569_s8, %s5801_s14, %s5801_s14, %s5800_s22  }
  0xa7   : > { %s3240_s5 = sadd.s32 4294967294, %s4430_s19   ;;  %s52_s7 = sadd.s32 1, %s4426_s18 }
  0xa8   : > { %s5897_s7 = smov (!%p4700_p6, %s52_s7), %s4426_s18  ;;  %p115_p1 = scmp.ne.s32.totalorder %s4398_s26, %s4394_s25 }
  0xa9   : > { %p121_p0 = scmp.ne.s32.totalorder %s4394_s25, %s4390_s24  ;;  %p54_p4 = scmp.ge.s32.totalorder %s5897_s7, 2 }
  0xaa   : > { %p420_p10 = scmp.eq.s32.totalorder %s4595_s20, 3  ;;  %s108_s10 = sadd.s32 1, %s4398_s26 }
  0xab   : > { %p5811_p12 = scmp.eq.s32.totalorder %s4595_s20, 0  ;;  %s5899_s7 = smov (%p54_p4, %s5897_s7), 0 }
  0xac   : > { %5813 = sst [smem:[#allocation37_spill]] %s5899_s7  ;;  %p4773_p9 = por %p420_p10, %p115_p1 }
  0xad   : > { %p4767_p11 = por %p121_p0, %p5811_p12  ;;  %p426_p6 = scmp.eq.s32.totalorder %s3240_s5, 3 }
  0xae   : > { %s5814_s4 = scalar_select %p4773_p9, 1, 0 }
  0xaf   : > { %s103_s6 = ssub.s32 %s4426_s18, %s5899_s7  ;;  %p5815_p13 = scmp.eq.s32.totalorder %s4430_s19, 0 }
  0xb0   : > { %s105_s30 = sor.u32 %s103_s6, %s4727_s13  ;;  %p4786_p7 = por %p426_p6, %p121_p0 }
  0xb1   : > { %p4781_p2 = por %p115_p1, %p5815_p13  ;;  %p106_p4 = scmp.eq.s32.totalorder %s105_s30, 0 }
  0xb2   : > { %s5817_s27 = scalar_select %p4786_p7, 1, 0 }
  0xb3   : > { %s589_s15 = sand.u32 1, %s4430_s19   ;;  %s591_s0 = sand.u32 1, %s4398_s26  }
  0xb4   : > { %s3255_s16 = sshll.u32 %s4422_s17, 4  ;;  %s3254_s21 = sshll.u32 %s591_s0, 7 }
  0xb5   : > { %s4794_s2 = scalar_select %p106_p4, %s4398_s26, %s108_s10  }
  0xb6   : > { %s3256_s5 = sshll.u32 %s4426_s18, 5  ;;  %s593_s7 = scalar_lea.vmem [#allocation7], %s3254_s21 }
  0xb7   : > { %s599_s1 = sadd.s32 %s3256_s5, %s3255_s16  ;;  %s602_s9 = sshll.u32 %s593_s7, 4  ;;  %s603_s9 = int_to_ptr.vmem [resolvable:$true] %s602_s9 }
  0xb8   : > { %s3257_s12 = sshll.u32 %s599_s1, 7  ;;  %s5818_s24 = sld [smem:[#allocation57_spill]] }
  0xb9   : > { %p4804_p1 = pnand %p3772_p8, %p4781_p2  ;;  %s590_s10 = scalar_lea.sflag [#allocation8], %s589_s15 }
  0xba   : > { %s4271_s30 = scalar_lea.vmem %s603_s9, 2048  ;;  %s4445_s1 = smov [#allocation7]  }
  0xbb   : > { %p4260_p0 = pneg %p4804_p1  ;;  %p4272_p10 = scmp.ne.s32.totalorder %s603_s9, %s4271_s30 }
  0xbc   : > { %s4276_s7 = sshll.u32 %s4445_s1, 4  ;;  %s4277_s7 = int_to_ptr.vmem [resolvable:$false] %s4276_s7 }
  0xbd   : > { %p4274_p12 = pnand %p4272_p10, %p4260_p0  ;;  %s4278_s29 = scalar_lea.vmem %s4277_s7, 4096 }
  0xbe   : > { %s601_s13 = scalar_lea.hbm %s5818_s24, %s3257_s12  ;;  %p4279_p13 = scmp.lt.s32.totalorder %s603_s9, %s4277_s7 }
  0xbf   : > { %p4275_p6 = pneg %p4274_p12  ;;  %p4280_p4 = scmp.lt.s32.totalorder %s4278_s29, %s4271_s30 }
  0xc1   : > { %p4281_p7 = por %p4280_p4, %p4279_p13 }
  0xc3   : > { %p4282_p9 = pnand %p4281_p7, %p4275_p6 }
  0xc5   : > { %4285 = shalt.err (!%p4282_p9)
}
  0xc6   : > { %3759 = dma.hbm_to_vmem [thread:$0]  (!%p4804_p1), %s601_s13, 2048, %s603_s9, %s590_s10, %s5801_s14, %s5801_s14, %s5800_s22  }
  0xc7   : > { %614 = sbr.rel (%p4600_p3) target bundleno = 1559 (0x617), region = 84 }
  0xcc   : > { %s616_s24 = sand.u32 1, %s4406_s28  }
  0xcd   : > { %s3259_s23 = sshll.u32 %s616_s24, 7  ;;  %s617_s8 = scalar_lea.sflag [#allocation5], %s616_s24 }
  0xce   : > { %s4818_s15 = scalar_lea.vmem [#allocation4], %s3259_s23 }
  0xcf   : > { %4357 = dma.done.wait (%p4721_p5), %s617_s8, 2048  }
  0xd0   : > { %4359 = vsyncadd (%p4721_p5), %s617_s8, 4294965248  ;;  %s625_s22 = sand.u32 1, %s4595_s20   ;;  %s627_s14 = sand.u32 1, %s4394_s25  }
  0xd1   : > { %s3260_s9 = sshll.u32 %s627_s14, 7  ;;  %s626_s0 = scalar_lea.sflag [#allocation8], %s625_s22 }
  0xd2   : > { %s4828_s16 = scalar_lea.vmem [#allocation7], %s3260_s9 }
  0xd3   : > { %4361 = dma.done.wait (%p4767_p11), %s626_s0, 2048  }
  0xd4   : > { %4363 = vsyncadd (%p4767_p11), %s626_s0, 4294965248  ;;  %p5821_p3 = scmp.eq.s32.totalorder %s4595_s20, 0 }
  0xd6   : > { %4365 = dma.done.wait (%p5821_p3), [#allocation8], 1024   ;;  %p5822_p5 = pmov %p5821_p3 }
  0xd7   : > { %p5823_p8 = pmov %p5821_p3 }
  0xd8   : > { %4367 = vsyncadd (%p5822_p5), [#allocation8], 4294966272 }
  0xd9   : > { %4369 = dma.done.wait (%p5823_p8), [#allocation11], 2048   ;;  %p5824_p9 = pmov %p5821_p3 }
  0xda   : > { %p5825_p2 = pmov %p5821_p3 }
  0xdb   : > { %4371 = vsyncadd (%p5824_p9), [#allocation11], 4294965248 }
  0xdc   : > { %4373 = dma.done.wait (%p5825_p2), [#allocation14], 2048   ;;  %p5826_p7 = pmov %p5825_p2 }
  0xdd   : > { %p5827_p11 = pmov %p5825_p2 }
  0xde   : > { %4375 = vsyncadd (%p5826_p7), [#allocation14], 4294965248 }
  0xdf   : > { %4377 = dma.done.wait (%p5827_p11), [#allocation17], 4096   ;;  %p5828_p1 = pmov %p5825_p2 }
  0xe1   : > { %4379 = vsyncadd (%p5828_p1), [#allocation17], 4294963200  ;;  %p5829_p0 = pmov %p5828_p1 }
  0xe3   : > { %4381 = dma.done.wait (%p5829_p0), [#allocation20], 2048   ;;  %p5830_p10 = pmov %p5829_p0 }
  0xe4   : > { %s4854_s11 = scalar_lea.vmem [#allocation21], %s3260_s9  ;;  %s5831_s3 = sld [smem:[#allocation32_spill]] }
  0xe5   : > { %4383 = vsyncadd (%p5830_p10), [#allocation20], 4294965248 }
  0xea   : > { %p3270_p12 = scmp.ne.s32.totalorder %s5831_s3, 0 }
  0xec   : > { %722 = sbr.rel (%p3270_p12) target bundleno = 243 (0xf3), region = 128 }
  0xf1   : > { %v4446_v0 = vmov -inf  }
  0xf2   : > { %723 = vst [vmem:[#allocation2] sm:$0x1] %v4446_v0 }
  0xf3 PF: > { %v3886_v1 = vld [vmem:[#allocation10 + $0x38] sm:$0xff]   ;;  %v3888_v3 = vld [vmem:[#allocation10 + $0x30] sm:$0xff]   ;;  %v3890_v5 = vld [vmem:[#allocation10 + $0x28] sm:$0xff]   ;;  %vm1617_vm0 = vcmask 1040384   ;;  %vm1698_vm1 = vcmask 1041408   ;;  %vm1779_vm2 = vcmask 1043456  }
  0xf4   : > { %v3887_v2 = vld [vmem:[#allocation9 + $0x38] sm:$0xff]   ;;  %3514 = vmatprep.subr.bf16.mxu0 %v3886_v1  ;;  %v3889_v4 = vld [vmem:[#allocation9 + $0x30] sm:$0xff]   ;;  %v3891_v6 = vld [vmem:[#allocation9 + $0x28] sm:$0xff]   ;;  %s5853_s5 = sld [smem:[#allocation66_spill]]  ;;  %p5878_p13 = scmp.ne.s32.totalorder %s5814_s4, 0 }
  0xf5   : > { %3546 = vmatprep.subr.bf16.mxu1 %v3887_v2  ;;  %3515 = vmatpush3.bf16.msra.mxu0 %v3886_v1  ;;  %v3892_v7 = vld [vmem:[#allocation10 + $0x20] sm:$0xff]   ;;  %v3894_v9 = vld [vmem:[#allocation10 + $0x18] sm:$0xff]   ;;  %v3896_v11 = vld [vmem:[#allocation10 + $0x10] sm:$0xff]   ;;  %s5854_s10 = sld [smem:[#allocation64_spill]]  ;;  %s4448_s24 = smov [#allocation21]  }
  0xf6   : > { %3547 = vmatpush3.bf16.msra.mxu1 %v3887_v2  ;;  %3516 = vmatprep.subr.bf16.mxu0 %v3888_v3  ;;  %v3893_v8 = vld [vmem:[#allocation9 + $0x20] sm:$0xff]   ;;  %v3895_v10 = vld [vmem:[#allocation9 + $0x18] sm:$0xff]   ;;  %v749_v13 = vld [vmem:[%s4828_s16 + $0x8] sm:$0xff]  ;;  %s2727_s30 = sld [smem:[#allocation3]]  ;;  %s4290_s23 = sshll.u32 %s4448_s24, 4  ;;  %s4291_s23 = int_to_ptr.vmem [resolvable:$false] %s4290_s23 }
  0xf7   : > { %3548 = vmatprep.subr.bf16.mxu1 %v3889_v4  ;;  %v748_v12 = vld [vmem:[%s4828_s16] sm:$0xff]  ;;  %v3897_v15 = vld [vmem:[#allocation9 + $0x10] sm:$0xff]   ;;  %v725_v17 = vld [vmem:[%s4818_s15 + $0x8] sm:$0xff]  ;;  %s5855_s29 = sld [smem:[#allocation68_spill]] }
  0xf8   : > { %v724_v14 = vld [vmem:[%s4818_s15] sm:$0xff]  ;;  %v780_v16 = vpack.c.bf16 %v749_v13, %v748_v12  ;;  %v3898_v19 = vld [vmem:[#allocation10 + $0x8] sm:$0xff]   ;;  %v750_v23 = vld [vmem:[%s4828_s16 + $0x10] sm:$0xff]  ;;  %s5872_s8 = sld [smem:[#allocation69_spill]] }
  0xf9   : > { %3517 = vmatpush3.bf16.msra.mxu0 %v3888_v3  ;;  %v740_v18 = vpack.c.bf16 %v725_v17, %v724_v14  ;;  %v3899_v20 = vld [vmem:[#allocation9 + $0x8] sm:$0xff]   ;;  %v3900_v21 = vld [vmem:[#allocation10] sm:$0xff]   ;;  %v751_v24 = vld [vmem:[%s4828_s16 + $0x18] sm:$0xff]  ;;  %s5873_s9 = sld [smem:[#allocation70_spill]] }
  0xfa   : > { %3549 = vmatpush3.bf16.msra.mxu1 %v3889_v4  ;;  %3518 = vmatprep.subr.bf16.mxu0 %v3890_v5  ;;  %v3901_v22 = vld [vmem:[#allocation9] sm:$0xff]   ;;  %v726_v25 = vld [vmem:[%s4818_s15 + $0x10] sm:$0xff]  ;;  %v727_v26 = vld [vmem:[%s4818_s15 + $0x18] sm:$0xff]  ;;  %v781_v33 = vpack.c.bf16 %v751_v24, %v750_v23  ;;  %s5874_s0 = sld [smem:[#allocation32_spill]] }
  0xfb   : > { %3550 = vmatprep.subr.bf16.mxu1 %v3891_v6  ;;  %3530 = vmatprep.mubr.bf16.mxu0 %v780_v16  ;;  %v752_v27 = vld [vmem:[%s4828_s16 + $0x20] sm:$0xff]  ;;  %v753_v28 = vld [vmem:[%s4828_s16 + $0x28] sm:$0xff]  ;;  %v3902_v31 = vld [vmem:[#allocation13 + $0x38] sm:$0xff]   ;;  %v741_v34 = vpack.c.bf16 %v727_v26, %v726_v25 }
  0xfc   : > { %3562 = vmatprep.mubr.bf16.mxu1 %v740_v18  ;;  %v728_v29 = vld [vmem:[%s4818_s15 + $0x20] sm:$0xff]  ;;  %v729_v30 = vld [vmem:[%s4818_s15 + $0x28] sm:$0xff]  ;;  %v3903_v32 = vld [vmem:[#allocation15 + $0x38] sm:$0xff]   ;;  %v782_v35 = vpack.c.bf16 %v753_v28, %v752_v27  ;;  %s2745_s12 = ssub.f32 1.0, %s2727_s30 }
  0xfd   : > { %3519 = vmatpush3.bf16.msra.mxu0 %v3890_v5  ;;  %v742_v36 = vpack.c.bf16 %v729_v30, %v728_v29  ;;  %v754_v37 = vld [vmem:[%s4828_s16 + $0x30] sm:$0xff]  ;;  %v755_v38 = vld [vmem:[%s4828_s16 + $0x38] sm:$0xff]  ;;  %v756_v42 = vld [vmem:[%s4828_s16 + $0x40] sm:$0xff] }
  0xfe   : > { %3551 = vmatpush3.bf16.msra.mxu1 %v3891_v6  ;;  %3520 = vmatprep.subr.bf16.mxu0 %v3892_v7  ;;  %v3904_v39 = vld [vmem:[#allocation13 + $0x30] sm:$0xff]   ;;  %v731_v41 = vld [vmem:[%s4818_s15 + $0x38] sm:$0xff]  ;;  %v757_v43 = vld [vmem:[%s4828_s16 + $0x48] sm:$0xff]  ;;  %v783_v49 = vpack.c.bf16 %v755_v38, %v754_v37 }
  0xff   : > { %3552 = vmatprep.subr.bf16.mxu1 %v3893_v8  ;;  %v730_v40 = vld [vmem:[%s4818_s15 + $0x30] sm:$0xff]  ;;  %v732_v45 = vld [vmem:[%s4818_s15 + $0x40] sm:$0xff]  ;;  %v733_v46 = vld [vmem:[%s4818_s15 + $0x48] sm:$0xff]  ;;  %v784_v51 = vpack.c.bf16 %v757_v43, %v756_v42 }
 0x100   : > { %v3905_v44 = vld [vmem:[#allocation15 + $0x30] sm:$0xff]   ;;  %v3906_v47 = vld [vmem:[#allocation13 + $0x28] sm:$0xff]   ;;  %v743_v50 = vpack.c.bf16 %v731_v41, %v730_v40  ;;  %v3908_v52 = vld [vmem:[#allocation13 + $0x20] sm:$0xff]   ;;  %v744_v53 = vpack.c.bf16 %v733_v46, %v732_v45  ;;  %s3364_s3 = sshll.u32 %s5874_s0, 4 }
 0x101   : > { %3521 = vmatpush3.bf16.msra.mxu0 %v3892_v7  ;;  %v3907_v48 = vld [vmem:[#allocation15 + $0x28] sm:$0xff]   ;;  %v3909_v54 = vld [vmem:[#allocation15 + $0x20] sm:$0xff]   ;;  %v758_v55 = vld [vmem:[%s4828_s16 + $0x50] sm:$0xff] }
 0x102   : > { %3553 = vmatpush3.bf16.msra.mxu1 %v3893_v8  ;;  %3522 = vmatprep.subr.bf16.mxu0 %v3894_v9  ;;  %v759_v56 = vld [vmem:[%s4828_s16 + $0x58] sm:$0xff]  ;;  %v734_v57 = vld [vmem:[%s4818_s15 + $0x50] sm:$0xff]  ;;  %v760_v59 = vld [vmem:[%s4828_s16 + $0x60] sm:$0xff] }
 0x103   : > { %3554 = vmatprep.subr.bf16.mxu1 %v3895_v10  ;;  %v735_v58 = vld [vmem:[%s4818_s15 + $0x58] sm:$0xff]  ;;  %v761_v60 = vld [vmem:[%s4828_s16 + $0x68] sm:$0xff]  ;;  %v736_v61 = vld [vmem:[%s4818_s15 + $0x60] sm:$0xff]  ;;  %v785_v1 = vpack.c.bf16 %v759_v56, %v758_v55 }
 0x104   : > { %v737_v62 = vld [vmem:[%s4818_s15 + $0x68] sm:$0xff]  ;;  %v3910_v63 = vld [vmem:[#allocation13 + $0x18] sm:$0xff]   ;;  %v745_v2 = vpack.c.bf16 %v735_v58, %v734_v57  ;;  %v786_v3 = vpack.c.bf16 %v761_v60, %v760_v59  ;;  %v3912_v4 = vld [vmem:[#allocation13 + $0x10] sm:$0xff]  }
 0x105   : > { %3523 = vmatpush3.bf16.msra.mxu0 %v3894_v9  ;;  %v3911_v0 = vld [vmem:[#allocation15 + $0x18] sm:$0xff]   ;;  %v746_v5 = vpack.c.bf16 %v737_v62, %v736_v61  ;;  %v762_v6 = vld [vmem:[%s4828_s16 + $0x70] sm:$0xff]  ;;  %v3914_v13 = vld [vmem:[#allocation13 + $0x8] sm:$0xff]  }
 0x106   : > { %3555 = vmatpush3.bf16.msra.mxu1 %v3895_v10  ;;  %3524 = vmatprep.subr.bf16.mxu0 %v3896_v11  ;;  %v763_v7 = vld [vmem:[%s4828_s16 + $0x78] sm:$0xff]  ;;  %v738_v8 = vld [vmem:[%s4818_s15 + $0x70] sm:$0xff]  ;;  %v3915_v14 = vld [vmem:[#allocation15 + $0x8] sm:$0xff]   ;;  %s5875_s16 = sld [smem:[#allocation33_spill]] }
 0x107   : > { %3556 = vmatprep.subr.bf16.mxu1 %v3897_v15  ;;  %v739_v9 = vld [vmem:[%s4818_s15 + $0x78] sm:$0xff]  ;;  %v787_v10 = vpack.c.bf16 %v763_v7, %v762_v6  ;;  %v3913_v12 = vld [vmem:[#allocation15 + $0x10] sm:$0xff]   ;;  %v3917_v16 = vld [vmem:[#allocation15] sm:$0xff]  }
 0x108   : > { %v3918_v17 = vld [vmem:[#allocation12 + $0x38] sm:$0xff]   ;;  %v3920_v42 = vld [vmem:[#allocation12 + $0x28] sm:$0xff]  }
 0x109   : > { %3525 = vmatpush3.bf16.msra.mxu0 %v3896_v11  ;;  %v747_v11 = vpack.c.bf16 %v739_v9, %v738_v8  ;;  %v3922_v58 = vld [vmem:[#allocation12 + $0x18] sm:$0xff]  }
 0x10a   : > { %3557 = vmatpush3.bf16.msra.mxu1 %v3897_v15  ;;  %3526 = vmatprep.subr.bf16.mxu0 %v3898_v19  ;;  %v3916_v15 = vld [vmem:[#allocation13] sm:$0xff]  }
 0x10b   : > { %3558 = vmatprep.subr.bf16.mxu1 %v3899_v20 }
 0x10c   : > { %s3365_s20 = sshll.u32 %s5875_s16, 5 }
 0x10d   : > { %3527 = vmatpush3.bf16.msra.mxu0 %v3898_v19  ;;  %s3047_s21 = sadd.s32 %s3365_s20, %s3364_s3 }
 0x10e   : > { %3559 = vmatpush3.bf16.msra.mxu1 %v3899_v20  ;;  %3528 = vmatprep.subr.bf16.mxu0 %v3900_v21  ;;  %s3366_s13 = sshll.u32 %s3047_s21, 7 }
 0x10f   : > { %3560 = vmatprep.subr.bf16.mxu1 %v3901_v22 }
 0x111   : > { %3529 = vmatpush3.bf16.msra.mxu0 %v3900_v21 }
 0x112   : > { %3561 = vmatpush3.bf16.msra.mxu1 %v3901_v22  ;;  %3578 = vmatprep.subr.bf16.mxu0 %v3902_v31 }
 0x113   : > { %3610 = vmatprep.subr.bf16.mxu1 %v3903_v32 }
 0x114   : > { %3531 = vmatmul.mubr.bf16.vlgmr.msra.gmra.mxu0 %v781_v33 }
 0x115   : > { %3563 = vmatmul.mubr.bf16.vlgmr.msra.gmra.mxu1 %v741_v34  ;;  %3534 = vmatprep.mubr.bf16.mxu0 %v782_v35 }
 0x116   : > { %3566 = vmatprep.mubr.bf16.mxu1 %v742_v36  ;;  %3579 = vmatpush3.bf16.msra.mxu0 %v3902_v31  ;;  %v3919_v36 = vld [vmem:[#allocation12 + $0x30] sm:$0xff]  }
 0x117   : > { %3611 = vmatpush3.bf16.msra.mxu1 %v3903_v32  ;;  %3580 = vmatprep.subr.bf16.mxu0 %v3904_v39 }
 0x118   : > { %3612 = vmatprep.subr.bf16.mxu1 %v3905_v44 }
 0x11a   : > { %3581 = vmatpush3.bf16.msra.mxu0 %v3904_v39 }
 0x11b   : > { %3613 = vmatpush3.bf16.msra.mxu1 %v3905_v44  ;;  %3582 = vmatprep.subr.bf16.mxu0 %v3906_v47 }
 0x11c   : > { %3535 = vmatmul.mubr.bf16.gmra.mxu0 %v783_v49  ;;  %3614 = vmatprep.subr.bf16.mxu1 %v3907_v48 }
 0x11d   : > { %3567 = vmatmul.mubr.bf16.gmra.mxu1 %v743_v50  ;;  %3538 = vmatprep.mubr.bf16.mxu0 %v784_v51 }
 0x11e   : > { %3570 = vmatprep.mubr.bf16.mxu1 %v744_v53  ;;  %3583 = vmatpush3.bf16.msra.mxu0 %v3906_v47 }
 0x11f   : > { %3615 = vmatpush3.bf16.msra.mxu1 %v3907_v48  ;;  %3584 = vmatprep.subr.bf16.mxu0 %v3908_v52 }
 0x120   : > { %3616 = vmatprep.subr.bf16.mxu1 %v3909_v54 }
 0x122   : > { %3585 = vmatpush3.bf16.msra.mxu0 %v3908_v52  ;;  %v3921_v52 = vld [vmem:[#allocation12 + $0x20] sm:$0xff]  }
 0x123   : > { %3617 = vmatpush3.bf16.msra.mxu1 %v3909_v54  ;;  %3586 = vmatprep.subr.bf16.mxu0 %v3910_v63 }
 0x124   : > { %3539 = vmatmul.mubr.bf16.gmra.mxu0 %v785_v1  ;;  %3618 = vmatprep.subr.bf16.mxu1 %v3911_v0 }
 0x125   : > { %3571 = vmatmul.mubr.bf16.gmra.mxu1 %v745_v2  ;;  %3542 = vmatprep.mubr.bf16.mxu0 %v786_v3 }
 0x126   : > { %3574 = vmatprep.mubr.bf16.mxu1 %v746_v5  ;;  %3587 = vmatpush3.bf16.msra.mxu0 %v3910_v63 }
 0x127   : > { %3619 = vmatpush3.bf16.msra.mxu1 %v3911_v0  ;;  %3588 = vmatprep.subr.bf16.mxu0 %v3912_v4 }
 0x128   : > { %3620 = vmatprep.subr.bf16.mxu1 %v3913_v12 }
 0x12a   : > { %3589 = vmatpush3.bf16.msra.mxu0 %v3912_v4  ;;  %v3923_v4 = vld [vmem:[#allocation12 + $0x10] sm:$0xff]  }
 0x12b   : > { %3621 = vmatpush3.bf16.msra.mxu1 %v3913_v12  ;;  %3590 = vmatprep.subr.bf16.mxu0 %v3914_v13 }
 0x12c   : > { %3543 = vmatmul.mubr.bf16.gmra.mxu0 %v787_v10  ;;  %3622 = vmatprep.subr.bf16.mxu1 %v3915_v14  ;;  %v3924_v10 = vld [vmem:[#allocation12 + $0x8] sm:$0xff]  }
 0x12d   : > { %3575 = vmatmul.mubr.bf16.gmra.mxu1 %v747_v11 }
 0x12e   : > { %3591 = vmatpush3.bf16.msra.mxu0 %v3914_v13 }
 0x12f   : > { %3623 = vmatpush3.bf16.msra.mxu1 %v3915_v14  ;;  %3592 = vmatprep.subr.bf16.mxu0 %v3916_v15 }
 0x130   : > { %3624 = vmatprep.subr.bf16.mxu1 %v3917_v16 }
 0x132   : > { %3593 = vmatpush3.bf16.msra.mxu0 %v3916_v15 }
 0x133   : > { %3625 = vmatpush3.bf16.msra.mxu1 %v3917_v16  ;;  %3642 = vmatprep.subr.bf16.mxu0 %v3918_v17  ;;  %v3925_v16 = vld [vmem:[#allocation12] sm:$0xff]  }
 0x1d4   : > { %v3532_v18 = vpop.f32.mrf.mxu0 }
 0x1d5   : > { %v3564_v19 = vpop.f32.mrf.mxu1 }
 0x1d6   : > { %v886_v20 = vpop.f32.mrf.mxu0  ;;  %v4895_v30 = vadd.f32 %v3564_v19, %v3532_v18  ;;  %v3931_v18 = vld [vmem:[#allocation16 + $0x74] ss:$8 sps:$4 sm:$0xff]   ;;  %v3926_v19 = vld [vmem:[#allocation18 + $0x70] ss:$8 sps:$4 sm:$0xff]  }
 0x1d7   : > { %v1031_v21 = vpop.f32.mrf.mxu1  ;;  %2081 = vmatprep.subr.bf16.mxu1 %v3931_v18 }
 0x1d8   : > { %v3533_v22 = vpop.f32.mrf.mxu0  ;;  %v4891_v27 = vadd.f32 %v1031_v21, %v886_v20  ;;  %5835 = vst [vmem:[#allocation41_spill] sm:$0xff] %v4895_v30  ;;  %v3929_v20 = vld [vmem:[#allocation16 + $0x70] ss:$8 sps:$4 sm:$0xff]   ;;  %v3934_v21 = vld [vmem:[#allocation18 + $0x64] ss:$8 sps:$4 sm:$0xff]  }
 0x1d9   : > { %v3565_v23 = vpop.f32.mrf.mxu1 }
 0x1da   : > { %v889_v24 = vpop.f32.mrf.mxu0  ;;  %v4889_v25 = vadd.f32 %v3565_v23, %v3533_v22  ;;  %5833 = vst [vmem:[#allocation39_spill] sm:$0xff] %v4891_v27  ;;  %v3937_v22 = vld [vmem:[#allocation16 + $0x64] ss:$8 sps:$4 sm:$0xff]   ;;  %v3932_v23 = vld [vmem:[#allocation18 + $0x60] ss:$8 sps:$4 sm:$0xff]  }
 0x1db   : > { %v1034_v26 = vpop.f32.mrf.mxu1 }
 0x1dc   : > { %5832 = vst [vmem:[#allocation38_spill] sm:$0xff] %v4889_v25  ;;  %v4893_v28 = vadd.f32 %v1034_v26, %v889_v24  ;;  %v3536_v29 = vpop.f32.mrf.mxu0  ;;  %v4903_v34 = vpack.c.bf16 %v4889_v25, %v4895_v30  ;;  %v3935_v24 = vld [vmem:[#allocation16 + $0x60] ss:$8 sps:$4 sm:$0xff]   ;;  %v3940_v26 = vld [vmem:[#allocation18 + $0x54] ss:$8 sps:$4 sm:$0xff]  }
 0x1dd   : > { %v3568_v31 = vpop.f32.mrf.mxu1 }
 0x1de   : > { %5834 = vst [vmem:[#allocation40_spill] sm:$0xff] %v4893_v28  ;;  %v902_v32 = vpop.f32.mrf.mxu0  ;;  %v4899_v33 = vpack.c.bf16 %v4893_v28, %v4891_v27  ;;  %v4915_v46 = vadd.f32 %v3568_v31, %v3536_v29  ;;  %v3943_v29 = vld [vmem:[#allocation16 + $0x54] ss:$8 sps:$4 sm:$0xff]   ;;  %v3938_v31 = vld [vmem:[#allocation18 + $0x50] ss:$8 sps:$4 sm:$0xff]  }
 0x1df   : > { %v1047_v35 = vpop.f32.mrf.mxu1 }
 0x1e0   : > { %3594 = vmatprep.mubr.bf16.mxu0 %v4899_v33  ;;  %3626 = vmatprep.mubr.bf16.mxu1 %v4899_v33  ;;  %v3537_v37 = vpop.f32.mrf.mxu0  ;;  %v4911_v43 = vadd.f32 %v1047_v35, %v902_v32  ;;  %5839 = vst [vmem:[#allocation45_spill] sm:$0xff] %v4915_v46  ;;  %v3941_v32 = vld [vmem:[#allocation16 + $0x50] ss:$8 sps:$4 sm:$0xff]   ;;  %v3949_v35 = vld [vmem:[#allocation16 + $0x44] ss:$8 sps:$4 sm:$0xff]  }
 0x1e1   : > { %v3569_v38 = vpop.f32.mrf.mxu1  ;;  %3595 = vmatmul.mubr.bf16.vlgmr.msra.gmra.mxu0 %v4903_v34  ;;  %3627 = vmatmul.mubr.bf16.vlgmr.msra.gmra.mxu1 %v4903_v34 }
 0x1e2   : > { %3643 = vmatpush3.bf16.msra.mxu0 %v3918_v17  ;;  %v905_v39 = vpop.f32.mrf.mxu0  ;;  %v4909_v40 = vadd.f32 %v3569_v38, %v3537_v37  ;;  %5837 = vst [vmem:[#allocation43_spill] sm:$0xff] %v4911_v43  ;;  %v3928_v17 = vld [vmem:[#allocation18 + $0x74] ss:$8 sps:$4 sm:$0xff]   ;;  %2082 = vmatpush1.bf16.msra.mxu1 %v3929_v20 }
 0x1e3   : > { %v1050_v41 = vpop.f32.mrf.mxu1  ;;  %3644 = vmatprep.subr.bf16.mxu0 %v3919_v36  ;;  %2083 = vmatprep.subr.bf16.mxu1 %v3937_v22  ;;  %v3952_v37 = vld [vmem:[#allocation18 + $0x34] ss:$8 sps:$4 sm:$0xff]  }
 0x1e4   : > { %5836 = vst [vmem:[#allocation42_spill] sm:$0xff] %v4909_v40  ;;  %v4913_v44 = vadd.f32 %v1050_v41, %v905_v39  ;;  %v3540_v45 = vpop.f32.mrf.mxu0  ;;  %v1097_v51 = vpack.c.bf16 %v4909_v40, %v4915_v46  ;;  %v3955_v38 = vld [vmem:[#allocation16 + $0x34] ss:$8 sps:$4 sm:$0xff]   ;;  %v3950_v39 = vld [vmem:[#allocation18 + $0x30] ss:$8 sps:$4 sm:$0xff]  }
 0x1e5   : > { %v3572_v47 = vpop.f32.mrf.mxu1  ;;  %v3953_v41 = vld [vmem:[#allocation16 + $0x30] ss:$8 sps:$4 sm:$0xff]  }
 0x1e6   : > { %5838 = vst [vmem:[#allocation44_spill] sm:$0xff] %v4913_v44  ;;  %3645 = vmatpush3.bf16.msra.mxu0 %v3919_v36  ;;  %v918_v48 = vpop.f32.mrf.mxu0  ;;  %v1096_v49 = vpack.c.bf16 %v4913_v44, %v4911_v43  ;;  %v4927_v62 = vadd.f32 %v3572_v47, %v3540_v45  ;;  %2084 = vmatpush1.bf16.msra.mxu1 %v3935_v24  ;;  %v3947_v36 = vld [vmem:[#allocation16 + $0x40] ss:$8 sps:$4 sm:$0xff]   ;;  %v3961_v45 = vld [vmem:[#allocation16 + $0x24] ss:$8 sps:$4 sm:$0xff]  }
 0x1e7   : > { %v1063_v50 = vpop.f32.mrf.mxu1  ;;  %3646 = vmatprep.subr.bf16.mxu0 %v3920_v42  ;;  %2085 = vmatprep.subr.bf16.mxu1 %v3943_v29  ;;  %v3956_v47 = vld [vmem:[#allocation18 + $0x20] ss:$8 sps:$4 sm:$0xff]  }
 0x1e8   : > { %3598 = vmatprep.mubr.bf16.mxu0 %v1096_v49  ;;  %3630 = vmatprep.mubr.bf16.mxu1 %v1096_v49  ;;  %v3541_v53 = vpop.f32.mrf.mxu0  ;;  %v4923_v59 = vadd.f32 %v1063_v50, %v918_v48  ;;  %5843 = vst [vmem:[#allocation49_spill] sm:$0xff] %v4927_v62  ;;  %v3959_v48 = vld [vmem:[#allocation16 + $0x20] ss:$8 sps:$4 sm:$0xff]   ;;  %v3967_v50 = vld [vmem:[#allocation16 + $0x14] ss:$8 sps:$4 sm:$0xff]  }
 0x1e9   : > { %v3573_v54 = vpop.f32.mrf.mxu1  ;;  %3599 = vmatmul.mubr.bf16.gmra.mxu0 %v1097_v51  ;;  %3631 = vmatmul.mubr.bf16.gmra.mxu1 %v1097_v51 }
 0x1ea   : > { %3647 = vmatpush3.bf16.msra.mxu0 %v3920_v42  ;;  %v921_v55 = vpop.f32.mrf.mxu0  ;;  %v4921_v56 = vadd.f32 %v3573_v54, %v3541_v53  ;;  %5841 = vst [vmem:[#allocation47_spill] sm:$0xff] %v4923_v59  ;;  %2086 = vmatpush1.bf16.msra.mxu1 %v3941_v32  ;;  %v3958_v42 = vld [vmem:[#allocation18 + $0x24] ss:$8 sps:$4 sm:$0xff]  }
 0x1eb   : > { %v1066_v57 = vpop.f32.mrf.mxu1  ;;  %3648 = vmatprep.subr.bf16.mxu0 %v3921_v52  ;;  %2087 = vmatprep.subr.bf16.mxu1 %v3949_v35  ;;  %v3970_v53 = vld [vmem:[#allocation18 + $0x4] ss:$8 sps:$4 sm:$0xff]  }
 0x1ec   : > { %5840 = vst [vmem:[#allocation46_spill] sm:$0xff] %v4921_v56  ;;  %v4925_v60 = vadd.f32 %v1066_v57, %v921_v55  ;;  %v3544_v61 = vpop.f32.mrf.mxu0  ;;  %v1099_v3 = vpack.c.bf16 %v4921_v56, %v4927_v62  ;;  %v3973_v54 = vld [vmem:[#allocation16 + $0x4] ss:$8 sps:$4 sm:$0xff]   ;;  %v3968_v55 = vld [vmem:[#allocation18] ss:$8 sps:$4 sm:$0xff]  }
 0x1ed   : > { %v3576_v63 = vpop.f32.mrf.mxu1  ;;  %v3971_v57 = vld [vmem:[#allocation16] ss:$8 sps:$4 sm:$0xff]  }
 0x1ee   : > { %5842 = vst [vmem:[#allocation48_spill] sm:$0xff] %v4925_v60  ;;  %3649 = vmatpush3.bf16.msra.mxu0 %v3921_v52  ;;  %v934_v0 = vpop.f32.mrf.mxu0  ;;  %v1098_v1 = vpack.c.bf16 %v4925_v60, %v4923_v59  ;;  %v4939_v13 = vadd.f32 %v3576_v63, %v3544_v61  ;;  %2088 = vmatpush1.bf16.msra.mxu1 %v3947_v36  ;;  %v3965_v52 = vld [vmem:[#allocation16 + $0x10] ss:$8 sps:$4 sm:$0xff]  }
 0x1ef   : > { %v1079_v2 = vpop.f32.mrf.mxu1  ;;  %3650 = vmatprep.subr.bf16.mxu0 %v3922_v58  ;;  %2089 = vmatprep.subr.bf16.mxu1 %v3955_v38 }
 0x1f0   : > { %3602 = vmatprep.mubr.bf16.mxu0 %v1098_v1  ;;  %3634 = vmatprep.mubr.bf16.mxu1 %v1098_v1  ;;  %v3545_v5 = vpop.f32.mrf.mxu0  ;;  %v4935_v11 = vadd.f32 %v1079_v2, %v934_v0  ;;  %5847 = vst [vmem:[#allocation53_spill] sm:$0xff] %v4939_v13 }
 0x1f1   : > { %v3577_v6 = vpop.f32.mrf.mxu1  ;;  %3603 = vmatmul.mubr.bf16.gmra.mxu0 %v1099_v3  ;;  %3635 = vmatmul.mubr.bf16.gmra.mxu1 %v1099_v3 }
 0x1f2   : > { %3651 = vmatpush3.bf16.msra.mxu0 %v3922_v58  ;;  %v937_v7 = vpop.f32.mrf.mxu0  ;;  %v4933_v8 = vadd.f32 %v3577_v6, %v3545_v5  ;;  %5845 = vst [vmem:[#allocation51_spill] sm:$0xff] %v4935_v11  ;;  %2090 = vmatpush1.bf16.msra.mxu1 %v3953_v41  ;;  %v5731_v58 = vmov 0  }
 0x1f3   : > { %v1082_v9 = vpop.f32.mrf.mxu1  ;;  %3652 = vmatprep.subr.bf16.mxu0 %v3923_v4  ;;  %2091 = vmatprep.subr.bf16.mxu1 %v3961_v45 }
 0x1f4   : > { %5844 = vst [vmem:[#allocation50_spill] sm:$0xff] %v4933_v8  ;;  %v4937_v12 = vadd.f32 %v1082_v9, %v937_v7  ;;  %v1101_v15 = vpack.c.bf16 %v4933_v8, %v4939_v13 }
 0x1f6   : > { %5846 = vst [vmem:[#allocation52_spill] sm:$0xff] %v4937_v12  ;;  %3653 = vmatpush3.bf16.msra.mxu0 %v3923_v4  ;;  %v1100_v14 = vpack.c.bf16 %v4937_v12, %v4935_v11  ;;  %2092 = vmatpush1.bf16.msra.mxu1 %v3959_v48 }
 0x1f7   : > { %3654 = vmatprep.subr.bf16.mxu0 %v3924_v10  ;;  %2093 = vmatprep.subr.bf16.mxu1 %v3967_v50 }
 0x1f8   : > { %3606 = vmatprep.mubr.bf16.mxu0 %v1100_v14  ;;  %3638 = vmatprep.mubr.bf16.mxu1 %v1100_v14 }
 0x1f9   : > { %3607 = vmatmul.mubr.bf16.gmra.mxu0 %v1101_v15  ;;  %3639 = vmatmul.mubr.bf16.gmra.mxu1 %v1101_v15 }
 0x1fa   : > { %3655 = vmatpush3.bf16.msra.mxu0 %v3924_v10  ;;  %3658 = vmatprep.mubr.bf16.mxu0 %v4899_v33  ;;  %v3946_v33 = vld [vmem:[#allocation18 + $0x44] ss:$8 sps:$4 sm:$0xff]  }
 0x1fb   : > { %3656 = vmatprep.subr.bf16.mxu0 %v3925_v16  ;;  %2094 = vmatpush1.bf16.msra.mxu1 %v3965_v52 }
 0x1fc   : > { %2095 = vmatprep.subr.bf16.mxu1 %v3973_v54  ;;  %2113 = vmatprep.mubr.bf16.mxu1 %v5731_v58 }
 0x1fe   : > { %3657 = vmatpush3.bf16.msra.mxu0 %v3925_v16 }
 0x1ff   : > { %2302 = vmatprep.subr.bf16.mxu0 %v3928_v17  ;;  %2096 = vmatpush1.bf16.msra.mxu1 %v3971_v57 }
 0x201   : > { %3659 = vmatmul.mubr.bf16.vlgmr.msra.gmra.mxu0 %v4903_v34  ;;  %v3944_v34 = vld [vmem:[#allocation18 + $0x40] ss:$8 sps:$4 sm:$0xff]  }
 0x202   : > { %3662 = vmatprep.mubr.bf16.mxu0 %v1096_v49  ;;  %2303 = vmatpush1.bf16.msra.mxu0 %v3926_v19  ;;  %v3964_v49 = vld [vmem:[#allocation18 + $0x14] ss:$8 sps:$4 sm:$0xff]  }
 0x203   : > { %2304 = vmatprep.subr.bf16.mxu0 %v3934_v21 }
 0x206   : > { %2305 = vmatpush1.bf16.msra.mxu0 %v3932_v23 }
 0x207   : > { %2306 = vmatprep.subr.bf16.mxu0 %v3940_v26 }
 0x209   : > { %3663 = vmatmul.mubr.bf16.gmra.mxu0 %v1097_v51  ;;  %v3962_v51 = vld [vmem:[#allocation18 + $0x10] ss:$8 sps:$4 sm:$0xff]  }
 0x20a   : > { %3666 = vmatprep.mubr.bf16.mxu0 %v1098_v1  ;;  %2307 = vmatpush1.bf16.msra.mxu0 %v3938_v31 }
 0x20b   : > { %2308 = vmatprep.subr.bf16.mxu0 %v3946_v33 }
 0x20e   : > { %2309 = vmatpush1.bf16.msra.mxu0 %v3944_v34 }
 0x20f   : > { %2310 = vmatprep.subr.bf16.mxu0 %v3952_v37 }
 0x211   : > { %3667 = vmatmul.mubr.bf16.gmra.mxu0 %v1099_v3 }
 0x212   : > { %3670 = vmatprep.mubr.bf16.mxu0 %v1100_v14  ;;  %2311 = vmatpush1.bf16.msra.mxu0 %v3950_v39  ;;  %v3974_v14 = vld [vmem:[#allocation19 + $0x78] sm:$0xff]  }
 0x213   : > { %2312 = vmatprep.subr.bf16.mxu0 %v3958_v42  ;;  %3674 = vmatprep.subr.bf16.mxu1 %v3974_v14 }
 0x216   : > { %2313 = vmatpush1.bf16.msra.mxu0 %v3956_v47 }
 0x217   : > { %2314 = vmatprep.subr.bf16.mxu0 %v3964_v49 }
 0x219   : > { %3671 = vmatmul.mubr.bf16.gmra.mxu0 %v1101_v15 }
 0x21a   : > { %2315 = vmatpush1.bf16.msra.mxu0 %v3962_v51  ;;  %2334 = vmatprep.mubr.bf16.mxu0 %v5731_v58 }
 0x21b   : > { %2316 = vmatprep.subr.bf16.mxu0 %v3970_v53 }
 0x21e   : > { %2317 = vmatpush1.bf16.msra.mxu0 %v3968_v55 }
 0x21f   : > { %3450 = vmatprep.subr.bf16.mxu0 %v3974_v14 }
 0x2a1   : > { %v4949_v61 = vpop.f32.mrf.mxu0 }
 0x2a3   : > { %v4951_v63 = vpop.f32.mrf.mxu0 }
 0x2a5   : > { %v4953_v0 = vpop.f32.mrf.mxu0 }
 0x2a7   : > { %v4955_v1 = vpop.f32.mrf.mxu0 }
 0x2a9   : > { %v4957_v2 = vpop.f32.mrf.mxu0 }
 0x2ab   : > { %v4959_v3 = vpop.f32.mrf.mxu0 }
 0x2ad   : > { %v4961_v4 = vpop.f32.mrf.mxu0 }
 0x2af   : > { %v4963_v5 = vpop.f32.mrf.mxu0 }
 0x2b1   : > { %v4965_v6 = vpop.f32.mrf.mxu0 }
 0x2b3   : > { %v4967_v7 = vpop.f32.mrf.mxu0 }
 0x2b5   : > { %v4969_v9 = vpop.f32.mrf.mxu0 }
 0x2b7   : > { %v4971_v10 = vpop.f32.mrf.mxu0 }
 0x2b9   : > { %v4973_v15 = vpop.f32.mrf.mxu0 }
 0x2bb   : > { %v4975_v16 = vpop.f32.mrf.mxu0 }
 0x2bd   : > { %v4977_v17 = vpop.f32.mrf.mxu0 }
 0x2be   : > { %5848 = vst [vmem:[#allocation54_spill] sm:$0xff] %v4977_v17 }
 0x2bf   : > { %v4979_v18 = vpop.f32.mrf.mxu0 }
 0x2c1   : > { %v3660_v19 = vpop.f32.mrf.mxu0 }
 0x2c2   : > { %v1531_v20 = vadd.f32 %v3660_v19, %v4949_v61 }
 0x2c3   : > { %v1522_v21 = vpop.f32.mrf.mxu0 }
 0x2c4   : > { %v1523_v22 = vadd.f32 %v1522_v21, %v4951_v63  ;;  %v1587_v24 = vmul.f32 0.17677669, %v1531_v20 }
 0x2c5   : > { %v3661_v23 = vpop.f32.mrf.mxu0 }
 0x2c6   : > { %v1585_v26 = vmul.f32 0.17677669, %v1523_v22  ;;  %v1534_v29 = vadd.f32 %v3661_v23, %v4953_v0  ;;  %v1621_v36 = vrot.slane %v1587_v24, 7 }
 0x2c7   : > { %v1525_v31 = vpop.f32.mrf.mxu0 }
 0x2c8   : > { %v1618_v32 = vrot.slane %v1585_v26, 7  ;;  %v1588_v33 = vmul.f32 0.17677669, %v1534_v29  ;;  %v1526_v34 = vadd.f32 %v1525_v31, %v4955_v1 }
 0x2c9   : > { %v3664_v35 = vpop.f32.mrf.mxu0 }
 0x2ca   : > { %v1665_v37 = vsel %vm1617_vm0, -inf, %v1618_v32  ;;  %v1623_v38 = vrot.slane %v1588_v33, 7  ;;  %v1586_v39 = vmul.f32 0.17677669, %v1526_v34  ;;  %v1547_v48 = vadd.f32 %v3664_v35, %v4957_v2 }
 0x2cb   : > { %v1666_v41 = vmax.f32 %v1585_v26, %v1665_v37  ;;  %v1538_v42 = vpop.f32.mrf.mxu0 }
 0x2cc   : > { %v1624_v45 = vsel %vm1617_vm0, %v1621_v36, %v1623_v38  ;;  %v1619_v47 = vrot.slane %v1586_v39, 7  ;;  %v1539_v49 = vadd.f32 %v1538_v42, %v4959_v3  ;;  %v1591_v21 = vmul.f32 0.17677669, %v1547_v48 }
 0x2cd   : > { %v1699_v50 = vrot.slane %v1666_v41, 6  ;;  %v1669_v51 = vmax.f32 %v1588_v33, %v1624_v45  ;;  %v3665_v52 = vpop.f32.mrf.mxu0 }
 0x2ce   : > { %v1620_v53 = vsel %vm1617_vm0, %v1618_v32, %v1619_v47  ;;  %v1622_v54 = vsel %vm1617_vm0, %v1619_v47, %v1621_v36  ;;  %v1589_v55 = vmul.f32 0.17677669, %v1539_v49  ;;  %v1550_v23 = vadd.f32 %v3665_v52, %v4961_v4 }
 0x2cf   : > { %v1746_v57 = vsel %vm1698_vm1, -inf, %v1699_v50  ;;  %v1667_v14 = vmax.f32 %v1586_v39, %v1620_v53  ;;  %v1668_v19 = vmax.f32 %v1587_v24, %v1622_v54  ;;  %v1541_v20 = vpop.f32.mrf.mxu0  ;;  %v1704_v31 = vrot.slane %v1669_v51, 6 }
 0x2d0   : > { %v1625_v22 = vrot.slane %v1589_v55, 7  ;;  %v1542_v26 = vadd.f32 %v1541_v20, %v4963_v5  ;;  %v1747_v29 = vmax.f32 %v1666_v41, %v1746_v57  ;;  %v4995_v36 = vmul.f32 0.17677669, %v1550_v23 }
 0x2d1   : > { %v1700_v33 = vrot.slane %v1667_v14, 6  ;;  %v1702_v34 = vrot.slane %v1668_v19, 6  ;;  %v3668_v35 = vpop.f32.mrf.mxu0  ;;  %v1629_v41 = vrot.slane %v1591_v21, 7 }
 0x2d2   : > { %v1626_v32 = vsel %vm1617_vm0, %v1623_v38, %v1625_v22  ;;  %v1590_v37 = vmul.f32 0.17677669, %v1542_v26  ;;  %v1780_v53 = vrot.slane %v1747_v29, 4  ;;  %v1631_v57 = vrot.slane %v4995_v36, 7 }
 0x2d3   : > { %v1701_v39 = vsel %vm1698_vm1, %v1699_v50, %v1700_v33  ;;  %v1703_v24 = vsel %vm1698_vm1, %v1700_v33, %v1702_v34  ;;  %v1670_v42 = vmax.f32 %v1589_v55, %v1626_v32  ;;  %v1705_v45 = vsel %vm1698_vm1, %v1702_v34, %v1704_v31  ;;  %v1554_v47 = vpop.f32.mrf.mxu0 }
 0x2d4   : > { %v1748_v48 = vmax.f32 %v1667_v14, %v1701_v39  ;;  %v1749_v49 = vmax.f32 %v1668_v19, %v1703_v24  ;;  %v1750_v52 = vmax.f32 %v1669_v51, %v1705_v45  ;;  %v1627_v38 = vrot.slane %v1590_v37, 7 }
 0x2d5   : > { %v1706_v54 = vrot.slane %v1670_v42, 6  ;;  %v3669_v20 = vpop.f32.mrf.mxu0  ;;  %v1632_v33 = vsel %vm1617_vm0, %v1629_v41, %v1631_v57  ;;  %v1827_v51 = vsel %vm1779_vm2, -inf, %v1780_v53 }
 0x2d6   : > { %v1781_v23 = vrot.slane %v1748_v48, 4  ;;  %v1783_v26 = vrot.slane %v1749_v49, 4  ;;  %v1785_v50 = vrot.slane %v1750_v52, 4  ;;  %v1628_v55 = vsel %vm1617_vm0, %v1625_v22, %v1627_v38 }
 0x2d7   : > { %v1630_v34 = vsel %vm1617_vm0, %v1627_v38, %v1629_v41  ;;  %v1557_v14 = vpop.f32.mrf.mxu0  ;;  %v1707_v19 = vsel %vm1698_vm1, %v1704_v31, %v1706_v54  ;;  %v5008_v39 = vmax.f32 %v4995_v36, %v1632_v33  ;;  %v1671_v58 = vmax.f32 %v1590_v37, %v1628_v55 }
 0x2d8   : > { %v1782_v32 = vsel %vm1779_vm2, %v1780_v53, %v1781_v23  ;;  %v1784_v24 = vsel %vm1779_vm2, %v1781_v23, %v1783_v26  ;;  %v1786_v45 = vsel %vm1779_vm2, %v1783_v26, %v1785_v50  ;;  %v1672_v8 = vmax.f32 %v1591_v21, %v1630_v34 }
 0x2d9   : > { %v1751_v13 = vmax.f32 %v1670_v42, %v1707_v19  ;;  %v1563_v22 = vadd.f32 %v3668_v35, %v4965_v6  ;;  %v3672_v41 = vpop.f32.mrf.mxu0  ;;  %v5013_v38 = vmax.f32 %v1747_v29, %v1827_v51  ;;  %v1712_v31 = vrot.slane %v5008_v39, 6 }
 0x2da   : > { %v1708_v12 = vrot.slane %v1671_v58, 6  ;;  %v1710_v11 = vrot.slane %v1672_v8, 6  ;;  %v1829_v53 = vmax.f32 %v1748_v48, %v1782_v32  ;;  %v1830_v56 = vmax.f32 %v1749_v49, %v1784_v24 }
 0x2db   : > { %v5016_v36 = vmax.f32 %v1750_v52, %v1786_v45  ;;  %v1555_v23 = vadd.f32 %v1554_v47, %v4967_v7  ;;  %v1566_v35 = vadd.f32 %v3669_v20, %v4969_v9  ;;  %v1787_v29 = vrot.slane %v1751_v13, 4  ;;  %v1570_v34 = vpop.f32.mrf.mxu0 }
 0x2dc   : > { %v1709_v26 = vsel %vm1698_vm1, %v1706_v54, %v1708_v12  ;;  %v1711_v21 = vsel %vm1698_vm1, %v1708_v12, %v1710_v11  ;;  %v1713_v37 = vsel %vm1698_vm1, %v1710_v11, %v1712_v31  ;;  %v1595_v55 = vmul.f32 0.17677669, %v1563_v22 }
 0x2dd   : > { %v1752_v42 = vmax.f32 %v1671_v58, %v1709_v26  ;;  %v1753_v33 = vmax.f32 %v1672_v8, %v1711_v21  ;;  %v5024_v48 = vmax.f32 %v5008_v39, %v1713_v37  ;;  %v1593_v49 = vmul.f32 0.17677669, %v1555_v23  ;;  %v3673_v24 = vpop.f32.mrf.mxu0  ;;  %v5040_v23 = vpop.f32.mrf.mxu1  ;;  %v5042_v26 = vld [vmem:[#allocation2] ss:$0 sm:$0xff] }
 0x2de   : > { %v1596_v52 = vmul.f32 0.17677669, %v1566_v35  ;;  %v1558_v47 = vadd.f32 %v1557_v14, %v4971_v10  ;;  %v5028_v54 = vmax.f32 %v1829_v53, %v5013_v38  ;;  %v5030_v12 = vmax.f32 %v1830_v56, %v1829_v53 }
 0x2df   : > { %v1789_v11 = vrot.slane %v1752_v42, 4  ;;  %v1791_v19 = vrot.slane %v1753_v33, 4  ;;  %v1633_v20 = vrot.slane %v1593_v49, 7  ;;  %v5033_v8 = vmax.f32 %v5016_v36, %v1830_v56  ;;  %v1377_v44 = vpop.f32.mrf.mxu1 }
 0x2e0   : > { %v1639_v51 = vrot.slane %v1596_v52, 7  ;;  %v1594_v58 = vmul.f32 0.17677669, %v1558_v47  ;;  %v1637_v32 = vrot.slane %v1595_v55, 7  ;;  %v1571_v39 = vadd.f32 %v1570_v34, %v4975_v16 }
 0x2e1   : > { %v1788_v45 = vsel %vm1779_vm2, %v1785_v50, %v1787_v29  ;;  %v1634_v22 = vsel %vm1617_vm0, %v1631_v57, %v1633_v20  ;;  %v1579_v53 = vadd.f32 %v3672_v41, %v4973_v15  ;;  %v1790_v21 = vsel %vm1779_vm2, %v1787_v29, %v1789_v11 }
 0x2e2   : > { %v1674_v56 = vmax.f32 %v1593_v49, %v1634_v22  ;;  %v1640_v37 = vsel %vm1617_vm0, %v1637_v32, %v1639_v51  ;;  %v1635_v35 = vrot.slane %v1594_v58, 7  ;;  %v5048_v34 = vmax.f32 %v5030_v12, %v5013_v38  ;;  %v1573_v22 = vpop.f32.mrf.mxu0 }
 0x2e3   : > { %v5052_v50 = vmax.f32 %v5028_v54, %v5042_v26  ;;  %v1792_v57 = vsel %vm1779_vm2, %v1789_v11, %v1791_v19  ;;  %v1677_v41 = vmax.f32 %v1596_v52, %v1640_v37  ;;  %v1597_v49 = vmul.f32 0.17677669, %v1571_v39 }
 0x2e4   : > { %v1714_v47 = vrot.slane %v1674_v56, 6  ;;  %v1636_v14 = vsel %vm1617_vm0, %v1633_v20, %v1635_v35  ;;  %v1638_v29 = vsel %vm1617_vm0, %v1635_v35, %v1637_v32  ;;  %v1832_v62 = vmax.f32 %v1751_v13, %v1788_v45 }
 0x2e5   : > { %v5849_v60 = vrot.slane %v5024_v48, 4  ;;  %v1833_v40 = vmax.f32 %v1752_v42, %v1790_v21  ;;  %v1599_v46 = vmul.f32 0.17677669, %v1579_v53  ;;  %v1675_v25 = vmax.f32 %v1594_v58, %v1636_v14 }
 0x2e6   : > { %v1715_v43 = vsel %vm1698_vm1, %v1712_v31, %v1714_v47  ;;  %v1676_v11 = vmax.f32 %v1595_v55, %v1638_v29  ;;  %v1641_v52 = vrot.slane %v1597_v49, 7  ;;  %v1834_v37 = vmax.f32 %v1753_v33, %v1792_v57  ;;  %v5065_v31 = vpop.f32.mrf.mxu1 }
 0x2e7   : > { %v1794_v59 = vsel %vm1779_vm2, %v1791_v19, %v5849_v60  ;;  %v1755_v30 = vmax.f32 %v1674_v56, %v1715_v43  ;;  %v1582_v20 = vadd.f32 %v3673_v24, %v4977_v17  ;;  %v1574_v32 = vadd.f32 %v1573_v22, %v4979_v18 }
 0x2e8   : > { %v1720_v39 = vrot.slane %v1677_v41, 6  ;;  %v1716_v13 = vrot.slane %v1675_v25, 6  ;;  %v1718_v45 = vrot.slane %v1676_v11, 6  ;;  %v1642_v35 = vsel %vm1617_vm0, %v1639_v51, %v1641_v52 }
 0x2e9   : > { %v1835_v60 = vmax.f32 %v5024_v48, %v1794_v59  ;;  %v1678_v42 = vmax.f32 %v1597_v49, %v1642_v35  ;;  %v1600_v19 = vmul.f32 0.17677669, %v1582_v20  ;;  %v1598_v53 = vmul.f32 0.17677669, %v1574_v32  ;;  %v1380_v32 = vpop.f32.mrf.mxu1 }
 0x2ea   : > { %v1717_v55 = vsel %vm1698_vm1, %v1714_v47, %v1716_v13  ;;  %v1719_v43 = vsel %vm1698_vm1, %v1716_v13, %v1718_v45  ;;  %v1721_v33 = vsel %vm1698_vm1, %v1718_v45, %v1720_v39  ;;  %v1900_v58 = vmax.f32 %v5013_v38, %v5042_v26 }
 0x2eb   : > { %v1795_v24 = vrot.slane %v1755_v30, 4  ;;  %v1756_v14 = vmax.f32 %v1675_v25, %v1717_v55  ;;  %v1757_v21 = vmax.f32 %v1676_v11, %v1719_v43  ;;  %v1758_v51 = vmax.f32 %v1677_v41, %v1721_v33 }
 0x2ec   : > { %v1645_v56 = vrot.slane %v1599_v46, 7  ;;  %v1722_v59 = vrot.slane %v1678_v42, 6  ;;  %v1647_v57 = vrot.slane %v1600_v19, 7  ;;  %v1643_v29 = vrot.slane %v1598_v53, 7 }
 0x2ed   : > { %v1847_v49 = vmax.f32 %v1832_v62, %v5016_v36  ;;  %v1797_v22 = vrot.slane %v1756_v14, 4  ;;  %v1799_v20 = vrot.slane %v1757_v21, 4  ;;  %v1801_v47 = vrot.slane %v1758_v51, 4 }
 0x2ee   : > { %v1723_v13 = vsel %vm1698_vm1, %v1720_v39, %v1722_v59  ;;  %v1648_v45 = vsel %vm1617_vm0, %v1645_v56, %v1647_v57  ;;  %v1644_v35 = vsel %vm1617_vm0, %v1641_v52, %v1643_v29  ;;  %v1917_v28 = vadd.f32 %v1900_v58, %v1377_v44 }
 0x2ef   : > { %v1848_v25 = vmax.f32 %v1833_v40, %v1832_v62  ;;  %v5850_v41 = vrot.slane %v5024_v48, 4  ;;  %v1798_v55 = vsel %vm1779_vm2, %v1795_v24, %v1797_v22  ;;  %v1759_v43 = vmax.f32 %v1678_v42, %v1723_v13  ;;  %v5088_v48 = vpop.f32.mrf.mxu1 }
 0x2f0   : > { %v5080_v36 = vmax.f32 %v1834_v37, %v1833_v40  ;;  %v5082_v33 = vmax.f32 %v1835_v60, %v1834_v37  ;;  %v1800_v27 = vsel %vm1779_vm2, %v1797_v22, %v1799_v20  ;;  %v1918_v39 = vadd.f32 %v5052_v50, %v1380_v32 }
 0x2f1   : > { %v1796_v11 = vsel %vm1779_vm2, %v5850_v41, %v1795_v24  ;;  %v1802_v57 = vsel %vm1779_vm2, %v1799_v20, %v1801_v47  ;;  %v1681_v52 = vmax.f32 %v1600_v19, %v1648_v45  ;;  %v1646_v44 = vsel %vm1617_vm0, %v1643_v29, %v1645_v56  ;;  %v1393_v29 = vpop.f32.mrf.mxu1 }
 0x2f2   : > { %v1679_v62 = vmax.f32 %v1598_v53, %v1644_v35  ;;  %v1836_v41 = vmax.f32 %v1755_v30, %v1796_v11  ;;  %v5090_v17 = vmax.f32 %v1756_v14, %v1798_v55  ;;  %v1803_v42 = vrot.slane %v1759_v43, 4 }
 0x2f3   : > { %v1933_v40 = vmul.f32 %v1917_v28, %v1900_v58  ;;  %v5093_v37 = vmax.f32 %v1847_v49, %v5030_v12  ;;  %v5096_v24 = vmax.f32 %v1848_v25, %v5033_v8  ;;  %v1680_v22 = vmax.f32 %v1599_v46, %v1646_v44  ;;  %v5130_v55 = vpop.f32.mrf.mxu1 }
 0x2f4   : > { %v1724_v32 = vrot.slane %v1679_v62, 6  ;;  %v5099_v19 = vmax.f32 %v5080_v36, %v1847_v49  ;;  %v5102_v53 = vmax.f32 %v5082_v33, %v1848_v25  ;;  %v5104_v56 = vmax.f32 %v1757_v21, %v1800_v27 }
 0x2f5   : > { %v5106_v30 = vmax.f32 %v1758_v51, %v1802_v57  ;;  %v1728_v14 = vrot.slane %v1681_v52, 6  ;;  %v1726_v12 = vrot.slane %v1680_v22, 6  ;;  %v1934_v58 = vmul.f32 %v1918_v39, %v5052_v50 }
 0x2f6   : > { %v1725_v28 = vsel %vm1698_vm1, %v1722_v59, %v1724_v32  ;;  %v5110_v20 = vmax.f32 %v1836_v41, %v1835_v60  ;;  %v1852_v46 = vmax.f32 %v5090_v17, %v1836_v41  ;;  %v1804_v49 = vsel %vm1779_vm2, %v1801_v47, %v1803_v42 }
 0x2f7   : > { %v1949_v13 = vadd.f32 %v1933_v40, %v4951_v63  ;;  %v1727_v27 = vsel %vm1698_vm1, %v1724_v32, %v1726_v12  ;;  %v1729_v21 = vsel %vm1698_vm1, %v1726_v12, %v1728_v14  ;;  %v1760_v51 = vmax.f32 %v1679_v62, %v1725_v28  ;;  %v3975_v62 = vld [vmem:[#allocation19 + $0x38] sm:$0xff]  }
 0x2f8   : > { %v1950_v45 = vadd.f32 %v1934_v58, %v4955_v1  ;;  %v5120_v59 = vmax.f32 %v5106_v30, %v5104_v56  ;;  %v1761_v50 = vmax.f32 %v1680_v22, %v1727_v27  ;;  %v1762_v60 = vmax.f32 %v1681_v52, %v1729_v21  ;;  %v1396_v58 = vpop.f32.mrf.mxu1 }
 0x2f9   : > { %v5124_v35 = vmax.f32 %v5033_v8, %v5028_v54  ;;  %v5126_v47 = vmax.f32 %v1759_v43, %v1804_v49  ;;  %v1805_v63 = vrot.slane %v1760_v51, 4  ;;  %v1902_v11 = vmax.f32 %v5048_v34, %v5042_v26 }
 0x2fa   : > { %v1965_v25 = vpack.c.bf16 %v1950_v45, %v1949_v13  ;;  %v1807_v1 = vrot.slane %v1761_v50, 4  ;;  %v1809_v39 = vrot.slane %v1762_v60, 4  ;;  %v5136_v52 = vmax.f32 %v5093_v37, %v5013_v38 }
 0x2fb   : > { %v1903_v57 = vmax.f32 %v5124_v35, %v5042_v26  ;;  %v1806_v8 = vsel %vm1779_vm2, %v1803_v42, %v1805_v63  ;;  %v1919_v43 = vadd.f32 %v5040_v23, %v1902_v11  ;;  %v5142_v44 = vmax.f32 %v5096_v24, %v5028_v54  ;;  %v3976_v42 = vld [vmem:[#allocation19 + $0x70] sm:$0xff]  }
 0x2fc   : > { %2114 = vmatmul.mubr.bf16.vlgmr.msra.gmra.mxu1 %v1965_v25  ;;  %2335 = vmatmul.mubr.bf16.vlgmr.msra.gmra.mxu0 %v1965_v25  ;;  %v1808_v41 = vsel %vm1779_vm2, %v1805_v63, %v1807_v1  ;;  %v1810_v40 = vsel %vm1779_vm2, %v1807_v1, %v1809_v39  ;;  %v5146_v22 = vmax.f32 %v1760_v51, %v1806_v8  ;;  %v5851_v32 = vmov 0  }
 0x2fd   : > { %2123 = vmatprep.mubr.bf16.mxu1 %v5851_v32  ;;  %2344 = vmatprep.mubr.bf16.mxu0 %v5851_v32  ;;  %v5150_v14 = vmax.f32 %v1761_v50, %v1808_v41  ;;  %v1843_v28 = vmax.f32 %v1762_v60, %v1810_v40  ;;  %v1920_v23 = vadd.f32 %v5065_v31, %v1903_v57  ;;  %v3977_v60 = vld [vmem:[#allocation19 + $0x30] sm:$0xff]  }
 0x2fe   : > { %v1935_v12 = vmul.f32 %v1919_v43, %v1902_v11  ;;  %3682 = vmatpush3.bf16.msra.mxu1 %v3975_v62  ;;  %v5155_v49 = vmax.f32 %v5146_v22, %v5126_v47  ;;  %v1904_v13 = vmax.f32 %v5136_v52, %v5042_v26  ;;  %v1905_v27 = vmax.f32 %v5142_v44, %v5042_v26  ;;  %v3978_v11 = vld [vmem:[#allocation19 + $0x68] sm:$0xff]  }
 0x2ff   : > { %v5163_v21 = vmax.f32 %v5099_v19, %v5048_v34  ;;  %3675 = vmatprep.subr.bf16.mxu1 %v3976_v42  ;;  %v5166_v31 = vmax.f32 %v1852_v46, %v5082_v33  ;;  %v1858_v51 = vmax.f32 %v1843_v28, %v5150_v14  ;;  %v1936_v45 = vmul.f32 %v1920_v23, %v1903_v57  ;;  %v5178_v57 = vpop.f32.mrf.mxu1  ;;  %v3980_v23 = vld [vmem:[#allocation19 + $0x60] sm:$0xff]  }
 0x300   : > { %v1951_v50 = vadd.f32 %v4949_v61, %v1935_v12  ;;  %3451 = vmatpush3.bf16.msra.mxu0 %v3975_v62  ;;  %v1922_v63 = vadd.f32 %v1905_v27, %v1396_v58  ;;  %v1876_v25 = vmax.f32 %v5102_v53, %v5124_v35  ;;  %v5174_v1 = vmax.f32 %v5110_v20, %v5080_v36 }
 0x301   : > { %3452 = vmatprep.subr.bf16.mxu0 %v3976_v42  ;;  %v1872_v33 = vmax.f32 %v1858_v51, %v5155_v49  ;;  %v1952_v39 = vadd.f32 %v4953_v0, %v1936_v45  ;;  %v1921_v8 = vadd.f32 %v1904_v13, %v1393_v29  ;;  %v5182_v61 = vmax.f32 %v5104_v56, %v5090_v17  ;;  %v1409_v42 = vpop.f32.mrf.mxu1  ;;  %v3981_v51 = vld [vmem:[#allocation19 + $0x20] sm:$0xff]  }
 0x302   : > { %3683 = vmatpush3.bf16.msra.mxu1 %v3977_v60  ;;  %v1868_v43 = vmax.f32 %v5120_v59, %v1852_v46  ;;  %v1906_v62 = vmax.f32 %v5163_v21, %v5042_v26  ;;  %v1878_v36 = vmax.f32 %v5166_v31, %v5096_v24  ;;  %v1938_v40 = vmul.f32 %v1922_v63, %v1905_v27  ;;  %v3979_v46 = vld [vmem:[#allocation19 + $0x28] sm:$0xff]  }
 0x303   : > { %3676 = vmatprep.subr.bf16.mxu1 %v3978_v11  ;;  %v1966_v41 = vpack.c.bf16 %v1952_v39, %v1951_v50  ;;  %v1907_v0 = vmax.f32 %v1876_v25, %v5042_v26  ;;  %v1877_v17 = vmax.f32 %v5174_v1, %v5093_v37  ;;  %v1937_v56 = vmul.f32 %v1921_v8, %v1904_v13  ;;  %v3637_v45 = vpop.f32.mrf.mxu1 }
 0x304   : > { %3453 = vmatpush3.bf16.msra.mxu0 %v3977_v60  ;;  %v1884_v29 = vmax.f32 %v1872_v33, %v1868_v43  ;;  %v5194_v28 = vmax.f32 %v5182_v61, %v5110_v20  ;;  %v1923_v24 = vadd.f32 %v5088_v48, %v1906_v62  ;;  %v1954_v12 = vadd.f32 %v1938_v40, %v4963_v5  ;;  %v3982_v5 = vld [vmem:[#allocation19 + $0x58] sm:$0xff]  }
 0x305   : > { %3454 = vmatprep.subr.bf16.mxu0 %v3978_v11  ;;  %2124 = vmatmul.mubr.bf16.gmra.mxu1 %v1966_v41  ;;  %v1924_v37 = vadd.f32 %v5130_v55, %v1907_v0  ;;  %v1886_v58 = vmax.f32 %v1878_v36, %v5028_v54  ;;  %v1953_v27 = vadd.f32 %v1937_v56, %v4959_v3 }
 0x306   : > { %2345 = vmatmul.mubr.bf16.gmra.mxu0 %v1966_v41  ;;  %2133 = vmatprep.mubr.bf16.mxu1 %v5851_v32  ;;  %v1892_v13 = vmax.f32 %v1884_v29, %v1876_v25  ;;  %v1885_v20 = vmax.f32 %v1877_v17, %v5013_v38  ;;  %v1879_v48 = vmax.f32 %v5194_v28, %v5099_v19  ;;  %v1412_v25 = vpop.f32.mrf.mxu1 }
 0x307   : > { %2354 = vmatprep.mubr.bf16.mxu0 %v5851_v32  ;;  %3684 = vmatpush3.bf16.msra.mxu1 %v3979_v46  ;;  %v1939_v50 = vmul.f32 %v1923_v24, %v1906_v62  ;;  %v1880_v55 = vmax.f32 %v1868_v43, %v5102_v53  ;;  %v1967_v60 = vpack.c.bf16 %v1954_v12, %v1953_v27 }
 0x308   : > { %3677 = vmatprep.subr.bf16.mxu1 %v3980_v23  ;;  %3455 = vmatpush3.bf16.msra.mxu0 %v3979_v46  ;;  %v1940_v54 = vmul.f32 %v1924_v37, %v1907_v0  ;;  %v1909_v63 = vmax.f32 %v1886_v58, %v5042_v26  ;;  %v5209_v3 = vmax.f32 %v1892_v13, %v5042_v26 }
 0x309   : > { %3456 = vmatprep.subr.bf16.mxu0 %v3980_v23  ;;  %v1855_v38 = vmax.f32 %v5126_v47, %v5106_v30  ;;  %v1908_v19 = vmax.f32 %v1885_v20, %v5042_v26  ;;  %v1870_v53 = vmax.f32 %v5155_v49, %v5120_v59  ;;  %v1955_v11 = vadd.f32 %v4957_v2, %v1939_v50  ;;  %v3640_v49 = vpop.f32.mrf.mxu1  ;;  %v5852_v50 = vld [vmem:[#allocation54_spill] sm:$0xff] }
 0x30a   : > { %1916 = vst [vmem:[#allocation2 - $0x7] sm:$0x80] %v5209_v3  ;;  %v1956_v33 = vadd.f32 %v4961_v4, %v1940_v54  ;;  %v1926_v39 = vadd.f32 %v1909_v63, %v1412_v25  ;;  %v1887_v30 = vmax.f32 %v1879_v48, %v5048_v34  ;;  %v1888_v47 = vmax.f32 %v1880_v55, %v5124_v35  ;;  %v3983_v55 = vld [vmem:[#allocation19 + $0x18] sm:$0xff]   ;;  %v3986_v54 = vld [vmem:[#allocation19 + $0x48] sm:$0xff]  }
 0x30b   : > { %3685 = vmatpush3.bf16.msra.mxu1 %v3981_v51  ;;  %v1869_v8 = vmax.f32 %v1855_v38, %v5182_v61  ;;  %v1925_v59 = vadd.f32 %v1908_v19, %v1409_v42  ;;  %v1857_v43 = vmax.f32 %v5150_v14, %v5146_v22  ;;  %v1882_v2 = vmax.f32 %v1870_v53, %v5166_v31  ;;  %v1425_v40 = vpop.f32.mrf.mxu1  ;;  %v2210_v53 = vld [vmem:[%s5853_s5] sm:$0x3]  ;;  %s3050_s5 = sshll.u32 %s4854_s11, 4  ;;  %s5626_s5 = int_to_ptr.vmem [resolvable:$true] %s3050_s5 }
 0x30c   : > { %3678 = vmatprep.subr.bf16.mxu1 %v3982_v5  ;;  %3457 = vmatpush3.bf16.msra.mxu0 %v3981_v51  ;;  %v1968_v62 = vpack.c.bf16 %v1956_v33, %v1955_v11  ;;  %v1942_v36 = vmul.f32 %v1926_v39, %v1909_v63  ;;  %v1910_v4 = vmax.f32 %v1887_v30, %v5042_v26  ;;  %v3987_v63 = vld [vmem:[#allocation19 + $0x8] sm:$0xff]   ;;  %p4293_p5 = scmp.lt.s32.totalorder %s5626_s5, %s4291_s23 }
 0x30d   : > { %2134 = vmatmul.mubr.bf16.gmra.mxu1 %v1967_v60  ;;  %3458 = vmatprep.subr.bf16.mxu0 %v3982_v5  ;;  %v1911_v41 = vmax.f32 %v1888_v47, %v5042_v26  ;;  %v1881_v34 = vmax.f32 %v1869_v8, %v5174_v1  ;;  %v1941_v35 = vmul.f32 %v1925_v59, %v1908_v19  ;;  %v3641_v17 = vpop.f32.mrf.mxu1  ;;  %v1989_v59 = vld [vmem:[%s5854_s10] sm:$0x3] }
 0x30e   : > { %2355 = vmatmul.mubr.bf16.gmra.mxu0 %v1967_v60  ;;  %2143 = vmatprep.mubr.bf16.mxu1 %v5851_v32  ;;  %v1871_v61 = vmax.f32 %v1857_v43, %v1855_v38  ;;  %v1958_v22 = vadd.f32 %v1942_v36, %v4971_v10  ;;  %v1927_v14 = vadd.f32 %v5178_v57, %v1910_v4  ;;  %v3985_v60 = vld [vmem:[#allocation19 + $0x10] sm:$0xff]  }
 0x30f   : > { %2364 = vmatprep.mubr.bf16.mxu0 %v5851_v32  ;;  %v1928_v31 = vadd.f32 %v3637_v45, %v1911_v41  ;;  %v1890_v0 = vmax.f32 %v1882_v2, %v5142_v44  ;;  %v1957_v29 = vadd.f32 %v1941_v35, %v4967_v7  ;;  %v1889_v1 = vmax.f32 %v1881_v34, %v5136_v52  ;;  %v1428_v57 = vpop.f32.mrf.mxu1 }
 0x310   : > { %v1883_v56 = vmax.f32 %v1871_v61, %v5194_v28  ;;  %v1943_v42 = vmul.f32 %v1927_v14, %v1910_v4  ;;  %3686 = vmatpush3.bf16.msra.mxu1 %v3983_v55  ;;  %3459 = vmatpush3.bf16.msra.mxu0 %v3983_v55 }
 0x311   : > { %v1969_v46 = vpack.c.bf16 %v1958_v22, %v1957_v29  ;;  %v1944_v24 = vmul.f32 %v1928_v31, %v1911_v41  ;;  %v1913_v23 = vmax.f32 %v1890_v0, %v5042_v26  ;;  %v1912_v10 = vmax.f32 %v1889_v1, %v5042_v26 }
 0x312   : > { %v1959_v7 = vadd.f32 %v4965_v6, %v1943_v42  ;;  %v1891_v28 = vmax.f32 %v1883_v56, %v5163_v21 }
 0x313   : > { %v1960_v52 = vadd.f32 %v4969_v9, %v1944_v24  ;;  %v1930_v44 = vadd.f32 %v1913_v23, %v1428_v57  ;;  %v1929_v12 = vadd.f32 %v1912_v10, %v1425_v40  ;;  %v1932_v9 = vadd.f32 %v3641_v17, %v5209_v3 }
 0x314   : > { %v1914_v13 = vmax.f32 %v1891_v28, %v5042_v26 }
 0x315   : > { %2144 = vmatmul.mubr.bf16.gmra.mxu1 %v1968_v62  ;;  %v1970_v37 = vpack.c.bf16 %v1960_v52, %v1959_v7  ;;  %v1946_v58 = vmul.f32 %v1930_v44, %v1913_v23  ;;  %v1945_v27 = vmul.f32 %v1929_v12, %v1912_v10  ;;  %v1948_v48 = vmul.f32 %v1932_v9, %v5209_v3 }
 0x316   : > { %2365 = vmatmul.mubr.bf16.gmra.mxu0 %v1968_v62  ;;  %2153 = vmatprep.mubr.bf16.mxu1 %v5851_v32  ;;  %v1931_v6 = vadd.f32 %v3640_v49, %v1914_v13  ;;  %v1991_v3 = vlaneseq }
 0x317   : > { %2374 = vmatprep.mubr.bf16.mxu0 %v5851_v32  ;;  %v1962_v20 = vadd.f32 %v1946_v58, %v4979_v18  ;;  %v1961_v51 = vadd.f32 %v1945_v27, %v4975_v16  ;;  %v1964_v5 = vadd.f32 %v5852_v50, %v1948_v48  ;;  %v3984_v16 = vld [vmem:[#allocation19 + $0x50] sm:$0xff]  }
 0x318   : > { %v1947_v45 = vmul.f32 %v1931_v6, %v1914_v13  ;;  %3460 = vmatprep.subr.bf16.mxu0 %v3984_v16  ;;  %3679 = vmatprep.subr.bf16.mxu1 %v3984_v16  ;;  %v1992_v38 = vshrl.u32 %v1991_v3, 7 }
 0x319   : > { %v1971_v21 = vpack.c.bf16 %v1962_v20, %v1961_v51  ;;  %3461 = vmatpush3.bf16.msra.mxu0 %v3985_v60  ;;  %3687 = vmatpush3.bf16.msra.mxu1 %v3985_v60 }
 0x31a   : > { %v1963_v26 = vadd.f32 %v4973_v15, %v1947_v45  ;;  %3462 = vmatprep.subr.bf16.mxu0 %v3986_v54  ;;  %3680 = vmatprep.subr.bf16.mxu1 %v3986_v54  ;;  %v3988_v15 = vld [vmem:[#allocation19 + $0x40] sm:$0xff]   ;;  %v1997_v19 = vsub.s32 1, %v1992_v38  ;;  %v1993_v25 = vsub.s32 0, %v1992_v38 }
 0x31c   : > { %v1972_v18 = vpack.c.bf16 %v1964_v5, %v1963_v26  ;;  %v5259_v11 = vrot.slane %v2210_v53, %v1997_v19  ;;  %v5261_v39 = vrot.slane %v2210_v53, %v1993_v25  ;;  %v5268_v36 = vrot.slane %v1989_v59, %v1997_v19 }
 0x31d   : > { %2154 = vmatmul.mubr.bf16.gmra.mxu1 %v1969_v46  ;;  %3463 = vmatpush3.bf16.msra.mxu0 %v3987_v63  ;;  %v5271_v41 = vrot.slane %v1989_v59, %v1993_v25 }
 0x31e   : > { %2375 = vmatmul.mubr.bf16.gmra.mxu0 %v1969_v46  ;;  %2163 = vmatprep.mubr.bf16.mxu1 %v5851_v32 }
 0x31f   : > { %2384 = vmatprep.mubr.bf16.mxu0 %v5851_v32  ;;  %3688 = vmatpush3.bf16.msra.mxu1 %v3987_v63 }
 0x320   : > { %3464 = vmatprep.subr.bf16.mxu0 %v3988_v15  ;;  %3681 = vmatprep.subr.bf16.mxu1 %v3988_v15 }
 0x325   : > { %2164 = vmatmul.mubr.bf16.gmra.mxu1 %v1970_v37 }
 0x326   : > { %2385 = vmatmul.mubr.bf16.gmra.mxu0 %v1970_v37  ;;  %2173 = vmatprep.mubr.bf16.mxu1 %v5851_v32 }
 0x327   : > { %2394 = vmatprep.mubr.bf16.mxu0 %v5851_v32 }
 0x32d   : > { %2174 = vmatmul.mubr.bf16.gmra.mxu1 %v1971_v21 }
 0x32e   : > { %2395 = vmatmul.mubr.bf16.gmra.mxu0 %v1971_v21  ;;  %2183 = vmatprep.mubr.bf16.mxu1 %v5851_v32 }
 0x32f   : > { %2404 = vmatprep.mubr.bf16.mxu0 %v5851_v32  ;;  %v3989_v32 = vld [vmem:[#allocation19] sm:$0xff]  }
 0x330   : > { %3465 = vmatpush3.bf16.msra.mxu0 %v3989_v32  ;;  %3689 = vmatpush3.bf16.msra.mxu1 %v3989_v32 }
 0x335   : > { %2184 = vmatmul.mubr.bf16.gmra.mxu1 %v1972_v18 }
 0x336   : > { %2405 = vmatmul.mubr.bf16.gmra.mxu0 %v1972_v18 }
 0x3bc   : > { %v2115_v33 = vpop.f32.mrf.mxu1  ;;  %v2336_v30 = vpop.f32.mrf.mxu0 }
 0x3bd   : > { %v2337_v43 = vadd.f32 %v2336_v30, %v5261_v39  ;;  %v2116_v17 = vadd.f32 %v2115_v33, %v5271_v41 }
 0x3be   : > { %v2117_v47 = vpop.f32.mrf.mxu1  ;;  %v2338_v8 = vpop.f32.mrf.mxu0 }
 0x3bf   : > { %v2339_v49 = vadd.f32 %v2338_v8, %v5259_v11  ;;  %v2415_v14 = vmax.f32 %v2337_v43, 0.0  ;;  %v2118_v0 = vadd.f32 %v2117_v47, %v5268_v36 }
 0x3c0   : > { %v2119_v2 = vpop.f32.mrf.mxu1  ;;  %v2340_v62 = vpop.f32.mrf.mxu0 }
 0x3c1   : > { %v2341_v4 = vadd.f32 %v2340_v62, %v5261_v39  ;;  %v2416_v40 = vmax.f32 %v2339_v49, 0.0  ;;  %v2120_v31 = vadd.f32 %v2119_v2, %v5271_v41  ;;  %v2447_v10 = vmul.f32 %v2415_v14, %v2116_v17 }
 0x3c2   : > { %v2121_v34 = vpop.f32.mrf.mxu1  ;;  %v2342_v35 = vpop.f32.mrf.mxu0 }
 0x3c3   : > { %v2417_v61 = vmax.f32 %v2341_v4, 0.0  ;;  %v2343_v22 = vadd.f32 %v2342_v35, %v5259_v11  ;;  %v2122_v29 = vadd.f32 %v2121_v34, %v5268_v36  ;;  %v2448_v24 = vmul.f32 %v2416_v40, %v2118_v0 }
 0x3c5   : > { %v2418_v1 = vmax.f32 %v2343_v22, 0.0  ;;  %v2449_v56 = vmul.f32 %v2417_v61, %v2120_v31  ;;  %v2125_v46 = vpop.f32.mrf.mxu1 }
 0x3c6   : > { %v2346_v42 = vpop.f32.mrf.mxu0  ;;  %v2126_v60 = vadd.f32 %v2125_v46, %v5271_v41 }
 0x3c7   : > { %v2450_v23 = vmul.f32 %v2418_v1, %v2122_v29  ;;  %v2127_v57 = vpop.f32.mrf.mxu1  ;;  %v2479_v44 = vpack.c.bf16 %v2449_v56, %v2447_v10  ;;  %v2347_v58 = vadd.f32 %v2346_v42, %v5261_v39 }
 0x3c8   : > { %v2348_v7 = vpop.f32.mrf.mxu0  ;;  %v2128_v18 = vadd.f32 %v2127_v57, %v5268_v36 }
 0x3c9   : > { %v2480_v52 = vpack.c.bf16 %v2450_v23, %v2448_v24  ;;  %v2349_v28 = vadd.f32 %v2348_v7, %v5259_v11  ;;  %v2129_v12 = vpop.f32.mrf.mxu1  ;;  %v2419_v48 = vmax.f32 %v2347_v58, 0.0 }
 0x3ca   : > { %v2350_v37 = vpop.f32.mrf.mxu0  ;;  %v2130_v26 = vadd.f32 %v2129_v12, %v5271_v41 }
 0x3cb   : > { %v2351_v13 = vadd.f32 %v2350_v37, %v5261_v39  ;;  %2662 = vmatprep.mubr.bf16.mxu0 %v2480_v52  ;;  %v2131_v27 = vpop.f32.mrf.mxu1  ;;  %v2420_v51 = vmax.f32 %v2349_v28, 0.0  ;;  %v2451_v25 = vmul.f32 %v2419_v48, %v2126_v60 }
 0x3cc   : > { %v2352_v20 = vpop.f32.mrf.mxu0  ;;  %2663 = vmatmul.mubr.bf16.vlgmr.msra.gmra.mxu0 %v2479_v44  ;;  %v2132_v50 = vadd.f32 %v2131_v27, %v5268_v36 }
 0x3cd   : > { %v2421_v6 = vmax.f32 %v2351_v13, 0.0  ;;  %v2353_v9 = vadd.f32 %v2352_v20, %v5259_v11  ;;  %v2135_v21 = vpop.f32.mrf.mxu1  ;;  %v2452_v32 = vmul.f32 %v2420_v51, %v2128_v18 }
 0x3ce   : > { %v2356_v45 = vpop.f32.mrf.mxu0  ;;  %v2136_v22 = vadd.f32 %v2135_v21, %v5271_v41 }
 0x3cf   : > { %v2422_v5 = vmax.f32 %v2353_v9, 0.0  ;;  %v2137_v55 = vpop.f32.mrf.mxu1  ;;  %v2453_v54 = vmul.f32 %v2421_v6, %v2130_v26  ;;  %v2357_v3 = vadd.f32 %v2356_v45, %v5261_v39 }
 0x3d0   : > { %v2358_v16 = vpop.f32.mrf.mxu0  ;;  %v2138_v35 = vadd.f32 %v2137_v55, %v5268_v36 }
 0x3d1   : > { %v2454_v63 = vmul.f32 %v2422_v5, %v2132_v50  ;;  %v2359_v15 = vadd.f32 %v2358_v16, %v5259_v11  ;;  %v2139_v38 = vpop.f32.mrf.mxu1  ;;  %v2481_v43 = vpack.c.bf16 %v2453_v54, %v2451_v25  ;;  %v2423_v2 = vmax.f32 %v2357_v3, 0.0 }
 0x3d2   : > { %v2360_v19 = vpop.f32.mrf.mxu0  ;;  %v2140_v62 = vadd.f32 %v2139_v38, %v5271_v41 }
 0x3d3   : > { %v2361_v53 = vadd.f32 %v2360_v19, %v5261_v39  ;;  %v2141_v33 = vpop.f32.mrf.mxu1  ;;  %v2482_v47 = vpack.c.bf16 %v2454_v63, %v2452_v32  ;;  %v2424_v8 = vmax.f32 %v2359_v15, 0.0  ;;  %v2455_v17 = vmul.f32 %v2423_v2, %v2136_v22 }
 0x3d4   : > { %v2362_v30 = vpop.f32.mrf.mxu0  ;;  %v2142_v40 = vadd.f32 %v2141_v33, %v5268_v36 }
 0x3d5   : > { %v2425_v59 = vmax.f32 %v2361_v53, 0.0  ;;  %v2363_v49 = vadd.f32 %v2362_v30, %v5259_v11  ;;  %2670 = vmatprep.mubr.bf16.mxu0 %v2482_v47  ;;  %v2145_v4 = vpop.f32.mrf.mxu1  ;;  %v2456_v29 = vmul.f32 %v2424_v8, %v2138_v35 }
 0x3d6   : > { %v2366_v34 = vpop.f32.mrf.mxu0  ;;  %2671 = vmatmul.mubr.bf16.gmra.mxu0 %v2481_v43  ;;  %v2146_v45 = vadd.f32 %v2145_v4, %v5271_v41 }
 0x3d7   : > { %v2426_v61 = vmax.f32 %v2363_v49, 0.0  ;;  %v2457_v14 = vmul.f32 %v2425_v59, %v2140_v62  ;;  %v2147_v31 = vpop.f32.mrf.mxu1  ;;  %v2367_v24 = vadd.f32 %v2366_v34, %v5261_v39 }
 0x3d8   : > { %v2368_v0 = vpop.f32.mrf.mxu0  ;;  %v2148_v9 = vadd.f32 %v2147_v31, %v5268_v36 }
 0x3d9   : > { %v2458_v1 = vmul.f32 %v2426_v61, %v2142_v40  ;;  %v2369_v56 = vadd.f32 %v2368_v0, %v5259_v11  ;;  %v2149_v46 = vpop.f32.mrf.mxu1  ;;  %v2483_v57 = vpack.c.bf16 %v2457_v14, %v2455_v17  ;;  %v2427_v13 = vmax.f32 %v2367_v24, 0.0 }
 0x3da   : > { %v2370_v42 = vpop.f32.mrf.mxu0  ;;  %v2150_v27 = vadd.f32 %v2149_v46, %v5271_v41 }
 0x3db   : > { %v2371_v23 = vadd.f32 %v2370_v42, %v5261_v39  ;;  %v2484_v10 = vpack.c.bf16 %v2458_v1, %v2456_v29  ;;  %v2151_v7 = vpop.f32.mrf.mxu1  ;;  %v2428_v12 = vmax.f32 %v2369_v56, 0.0  ;;  %v2459_v16 = vmul.f32 %v2427_v13, %v2146_v45 }
 0x3dc   : > { %v2372_v52 = vpop.f32.mrf.mxu0  ;;  %v2152_v20 = vadd.f32 %v2151_v7, %v5268_v36 }
 0x3dd   : > { %v2429_v44 = vmax.f32 %v2371_v23, 0.0  ;;  %v2373_v28 = vadd.f32 %v2372_v52, %v5259_v11  ;;  %2678 = vmatprep.mubr.bf16.mxu1 %v2484_v10  ;;  %v2155_v37 = vpop.f32.mrf.mxu1  ;;  %v2460_v50 = vmul.f32 %v2428_v12, %v2148_v9 }
 0x3de   : > { %v2376_v58 = vpop.f32.mrf.mxu0  ;;  %2679 = vmatmul.mubr.bf16.vlgmr.msra.gmra.mxu1 %v2483_v57  ;;  %v2156_v62 = vadd.f32 %v2155_v37, %v5271_v41 }
 0x3df   : > { %v2430_v6 = vmax.f32 %v2373_v28, 0.0  ;;  %v2157_v51 = vpop.f32.mrf.mxu1  ;;  %v2461_v48 = vmul.f32 %v2429_v44, %v2150_v27  ;;  %v2377_v60 = vadd.f32 %v2376_v58, %v5261_v39 }
 0x3e0   : > { %v2378_v21 = vpop.f32.mrf.mxu0  ;;  %v2158_v49 = vadd.f32 %v2157_v51, %v5268_v36 }
 0x3e1   : > { %v2462_v26 = vmul.f32 %v2430_v6, %v2152_v20  ;;  %v2379_v5 = vadd.f32 %v2378_v21, %v5259_v11  ;;  %v2159_v18 = vpop.f32.mrf.mxu1  ;;  %v2485_v19 = vpack.c.bf16 %v2461_v48, %v2459_v16  ;;  %v2431_v30 = vmax.f32 %v2377_v60, 0.0 }
 0x3e2   : > { %v2380_v55 = vpop.f32.mrf.mxu0  ;;  %v2160_v47 = vadd.f32 %v2159_v18, %v5271_v41 }
 0x3e3   : > { %v2381_v54 = vadd.f32 %v2380_v55, %v5261_v39  ;;  %v2161_v63 = vpop.f32.mrf.mxu1  ;;  %v2486_v32 = vpack.c.bf16 %v2462_v26, %v2460_v50  ;;  %v2432_v25 = vmax.f32 %v2379_v5, 0.0  ;;  %v2463_v14 = vmul.f32 %v2431_v30, %v2156_v62 }
 0x3e4   : > { %v2382_v15 = vpop.f32.mrf.mxu0  ;;  %v2162_v8 = vadd.f32 %v2161_v63, %v5268_v36 }
 0x3e5   : > { %v2433_v3 = vmax.f32 %v2381_v54, 0.0  ;;  %v2383_v38 = vadd.f32 %v2382_v15, %v5259_v11  ;;  %2686 = vmatprep.mubr.bf16.mxu1 %v2486_v32  ;;  %v2165_v53 = vpop.f32.mrf.mxu1  ;;  %v2464_v35 = vmul.f32 %v2432_v25, %v2158_v49 }
 0x3e6   : > { %v2386_v33 = vpop.f32.mrf.mxu0  ;;  %2687 = vmatmul.mubr.bf16.gmra.mxu1 %v2485_v19  ;;  %v2166_v58 = vadd.f32 %v2165_v53, %v5271_v41 }
 0x3e7   : > { %v2434_v59 = vmax.f32 %v2383_v38, 0.0  ;;  %v2167_v43 = vpop.f32.mrf.mxu1  ;;  %v2465_v4 = vmul.f32 %v2433_v3, %v2160_v47  ;;  %v2387_v31 = vadd.f32 %v2386_v33, %v5261_v39 }
 0x3e8   : > { %v2388_v2 = vpop.f32.mrf.mxu0  ;;  %v2168_v28 = vadd.f32 %v2167_v43, %v5268_v36 }
 0x3e9   : > { %v2466_v34 = vmul.f32 %v2434_v59, %v2162_v8  ;;  %v2389_v40 = vadd.f32 %v2388_v2, %v5259_v11  ;;  %v2169_v61 = vpop.f32.mrf.mxu1  ;;  %v2487_v42 = vpack.c.bf16 %v2465_v4, %v2463_v14  ;;  %v2435_v57 = vmax.f32 %v2387_v31, 0.0 }
 0x3ea   : > { %v2390_v22 = vpop.f32.mrf.mxu0  ;;  %v2170_v7 = vadd.f32 %v2169_v61, %v5271_v41 }
 0x3eb   : > { %v2391_v0 = vadd.f32 %v2390_v22, %v5261_v39  ;;  %v2171_v29 = vpop.f32.mrf.mxu1  ;;  %v2488_v17 = vpack.c.bf16 %v2466_v34, %v2464_v35  ;;  %v2436_v24 = vmax.f32 %v2389_v40, 0.0  ;;  %v2467_v21 = vmul.f32 %v2435_v57, %v2166_v58 }
 0x3ec   : > { %v2392_v1 = vpop.f32.mrf.mxu0  ;;  %v2172_v52 = vadd.f32 %v2171_v29, %v5268_v36 }
 0x3ed   : > { %v2437_v56 = vmax.f32 %v2391_v0, 0.0  ;;  %v2393_v46 = vadd.f32 %v2392_v1, %v5259_v11  ;;  %2694 = vmatprep.mubr.bf16.mxu1 %v2488_v17  ;;  %v2175_v23 = vpop.f32.mrf.mxu1  ;;  %v2468_v20 = vmul.f32 %v2436_v24, %v2168_v28 }
 0x3ee   : > { %v2396_v10 = vpop.f32.mrf.mxu0  ;;  %2695 = vmatmul.mubr.bf16.gmra.mxu1 %v2487_v42  ;;  %v2176_v33 = vadd.f32 %v2175_v23, %v5271_v41 }
 0x3ef   : > { %v2438_v44 = vmax.f32 %v2393_v46, 0.0  ;;  %v2177_v12 = vpop.f32.mrf.mxu1  ;;  %v2469_v13 = vmul.f32 %v2437_v56, %v2170_v7  ;;  %v2397_v45 = vadd.f32 %v2396_v10, %v5261_v39  ;;  %v5337_v7 = vld [vmem:[%s5855_s29] ss:$0 sm:$0xff]  ;;  %s5637_s29 = scalar_lea.sflag [#allocation6], %s627_s14 }
 0x3f0   : > { %v2398_v37 = vpop.f32.mrf.mxu0  ;;  %v2178_v19 = vadd.f32 %v2177_v12, %v5268_v36 }
 0x3f1   : > { %v2470_v27 = vmul.f32 %v2438_v44, %v2172_v52  ;;  %v2399_v6 = vadd.f32 %v2398_v37, %v5259_v11  ;;  %v2179_v9 = vpop.f32.mrf.mxu1  ;;  %v2489_v16 = vpack.c.bf16 %v2469_v13, %v2467_v21  ;;  %v2439_v15 = vmax.f32 %v2397_v45, 0.0  ;;  %v5857_v45 = vld [vmem:[#allocation40_spill] sm:$0xff] }
 0x3f2   : > { %v2400_v51 = vpop.f32.mrf.mxu0  ;;  %v2180_v32 = vadd.f32 %v2179_v9, %v5271_v41  ;;  %v5342_v37 = vstv %s2745_s12  ;;  %s4286_s12 = scalar_lea.vmem %s5626_s5, 2048 }
 0x3f3   : > { %v2401_v48 = vadd.f32 %v2400_v51, %v5261_v39  ;;  %v2181_v26 = vpop.f32.mrf.mxu1  ;;  %v2490_v5 = vpack.c.bf16 %v2470_v27, %v2468_v20  ;;  %v2440_v60 = vmax.f32 %v2399_v6, 0.0  ;;  %v2471_v62 = vmul.f32 %v2439_v15, %v2176_v33  ;;  %v5856_v27 = vld [vmem:[#allocation39_spill] sm:$0xff]  ;;  %v5858_v15 = vld [vmem:[#allocation41_spill] sm:$0xff]  ;;  %p4287_p6 = scmp.ne.s32.totalorder %s5626_s5, %s4286_s12 }
 0x3f4   : > { %v2402_v50 = vpop.f32.mrf.mxu0  ;;  %v2182_v3 = vadd.f32 %v2181_v26, %v5268_v36  ;;  %v2747_v20 = vmul.f32 %v5342_v37, %v5856_v27 }
 0x3f5   : > { %v2441_v18 = vmax.f32 %v2401_v48, 0.0  ;;  %v2403_v55 = vadd.f32 %v2402_v50, %v5259_v11  ;;  %2702 = vmatprep.mubr.bf16.mxu1 %v2490_v5  ;;  %v2185_v54 = vpop.f32.mrf.mxu1  ;;  %v2472_v59 = vmul.f32 %v2440_v60, %v2178_v19  ;;  %v2748_v48 = vmul.f32 %v5342_v37, %v5857_v45  ;;  %p4288_p4 = pnand %p4287_p6, %p5878_p13 }
 0x3f6   : > { %v2406_v63 = vpop.f32.mrf.mxu0  ;;  %2703 = vmatmul.mubr.bf16.gmra.mxu1 %v2489_v16 }
 0x3f7   : > { %v2442_v38 = vmax.f32 %v2403_v55, 0.0  ;;  %v2187_v25 = vpop.f32.mrf.mxu1  ;;  %v2473_v30 = vmul.f32 %v2441_v18, %v2180_v32  ;;  %v2407_v49 = vadd.f32 %v2406_v63, %v5261_v39  ;;  %v2749_v32 = vmul.f32 %v5342_v37, %v5858_v15  ;;  %p4289_p3 = pneg %p4288_p4 }
 0x3f8   : > { %v2408_v53 = vpop.f32.mrf.mxu0  ;;  %v2188_v29 = vadd.f32 %v2187_v25, %v5268_v36 }
 0x3f9   : > { %v2474_v47 = vmul.f32 %v2442_v38, %v2182_v3  ;;  %v2409_v8 = vadd.f32 %v2408_v53, %v5259_v11  ;;  %v2189_v43 = vpop.f32.mrf.mxu1  ;;  %v2491_v31 = vpack.c.bf16 %v2473_v30, %v2471_v62  ;;  %v2443_v0 = vmax.f32 %v2407_v49, 0.0  ;;  %v5859_v30 = vld [vmem:[#allocation38_spill] sm:$0xff]  ;;  %v5860_v62 = vld [vmem:[#allocation43_spill] sm:$0xff] }
 0x3fa   : > { %v2410_v2 = vpop.f32.mrf.mxu0  ;;  %v2190_v1 = vadd.f32 %v2189_v43, %v5271_v41 }
 0x3fb   : > { %v2411_v4 = vadd.f32 %v2410_v2, %v5261_v39  ;;  %v2191_v34 = vpop.f32.mrf.mxu1  ;;  %v2492_v40 = vpack.c.bf16 %v2474_v47, %v2472_v59  ;;  %v2444_v61 = vmax.f32 %v2409_v8, 0.0  ;;  %v2186_v39 = vadd.f32 %v2185_v54, %v5271_v41 }
 0x3fc   : > { %v2412_v35 = vpop.f32.mrf.mxu0  ;;  %v2192_v17 = vadd.f32 %v2191_v34, %v5268_v36  ;;  %v5339_v41 = vstv %s2727_s30  ;;  %v2750_v47 = vmul.f32 %v5342_v37, %v5859_v30  ;;  %s5876_s30 = sld [smem:[#allocation71_spill]] }
 0x3fd   : > { %v2445_v22 = vmax.f32 %v2411_v4, 0.0  ;;  %v2413_v14 = vadd.f32 %v2412_v35, %v5259_v11  ;;  %2710 = vmatprep.mubr.bf16.mxu1 %v2492_v40  ;;  %v2476_v46 = vmul.f32 %v2444_v61, %v2188_v29  ;;  %v2475_v23 = vmul.f32 %v2443_v0, %v2186_v39 }
 0x3fe   : > { %2711 = vmatmul.mubr.bf16.gmra.mxu1 %v2491_v31  ;;  %v2751_v4 = vmul.f32 %v5342_v37, %v5860_v62 }
 0x3ff   : > { %v2446_v56 = vmax.f32 %v2413_v14, 0.0  ;;  %v2477_v42 = vmul.f32 %v2445_v22, %v2190_v1  ;;  %v5861_v14 = vld [vmem:[#allocation44_spill] sm:$0xff] }
 0x400   : > { %v2752_v31 = vmul.f32 %v5342_v37, %v5861_v14 }
 0x401   : > { %v2478_v24 = vmul.f32 %v2446_v56, %v2192_v17  ;;  %v2493_v11 = vpack.c.bf16 %v2477_v42, %v2475_v23  ;;  %v5862_v42 = vld [vmem:[#allocation45_spill] sm:$0xff] }
 0x402   : > { %s5877_s1 = smov %s5876_s30  ;;  %s5632_s7 = scalar_lea.hbm %s5876_s30, %s3366_s13 }
 0x403   : > { %v2494_v10 = vpack.c.bf16 %v2478_v24, %v2476_v46  ;;  %v2753_v24 = vmul.f32 %v5342_v37, %v5862_v42 }
 0x405   : > { %2718 = vmatprep.mubr.bf16.mxu1 %v2494_v10 }
 0x406   : > { %2719 = vmatmul.mubr.bf16.gmra.mxu1 %v2493_v11 }
 0x48c   : > { %v3466_v57 = vpop.f32.mrf.mxu0 }
 0x48e   : > { %v3467_v36 = vpop.f32.mrf.mxu0 }
 0x48f   : > { %v3468_v52 = vadd.f32 %v3467_v36, %v3466_v57 }
 0x490   : > { %v3469_v44 = vpop.f32.mrf.mxu0 }
 0x491   : > { %v2665_v28 = vadd.f32 %v3468_v52, %v5337_v7 }
 0x492   : > { %v3470_v12 = vpop.f32.mrf.mxu0 }
 0x493   : > { %v3471_v58 = vadd.f32 %v3470_v12, %v3469_v44  ;;  %v2729_v13 = vmul.f32 %v5339_v41, %v2665_v28  ;;  %v5863_v44 = vld [vmem:[#allocation42_spill] sm:$0xff] }
 0x494   : > { %v2754_v28 = vmul.f32 %v5342_v37, %v5863_v44 }
 0x495   : > { %v2668_v6 = vadd.f32 %v3471_v58, %v5337_v7  ;;  %v5348_v9 = vadd.f32 %v2747_v20, %v2729_v13 }
 0x496   : > { %v3472_v51 = vpop.f32.mrf.mxu0 }
 0x497   : > { %2779 = vadd.xlane.f32.xlu0 %v5348_v9  ;;  %v2730_v21 = vmul.f32 %v5339_v41, %v2668_v6 }
 0x498   : > { %v3473_v26 = vpop.f32.mrf.mxu0 }
 0x499   : > { %v5354_v50 = vadd.f32 %v2748_v48, %v2730_v21  ;;  %v3474_v5 = vadd.f32 %v3473_v26, %v3472_v51  ;;  %v5864_v21 = vld [vmem:[#allocation47_spill] sm:$0xff] }
 0x49a   : > { %v3475_v18 = vpop.f32.mrf.mxu0  ;;  %v2755_v48 = vmul.f32 %v5342_v37, %v5864_v21 }
 0x49b   : > { %2781 = vadd.xlane.f32.xlu0 %v5354_v50  ;;  %v2673_v55 = vadd.f32 %v3474_v5, %v5337_v7 }
 0x49c   : > { %v3476_v16 = vpop.f32.mrf.mxu0 }
 0x49d   : > { %v3477_v60 = vadd.f32 %v3476_v16, %v3475_v18  ;;  %v2731_v63 = vmul.f32 %v5339_v41, %v2673_v55 }
 0x49e   : > { %v3478_v54 = vpop.f32.mrf.mxu1 }
 0x49f   : > { %v2676_v3 = vadd.f32 %v3477_v60, %v5337_v7  ;;  %v5362_v19 = vadd.f32 %v2749_v32, %v2731_v63 }
 0x4a0   : > { %v3479_v38 = vpop.f32.mrf.mxu1 }
 0x4a1   : > { %v3480_v25 = vadd.f32 %v3479_v38, %v3478_v54  ;;  %2783 = vadd.xlane.f32.xlu1 %v5362_v19  ;;  %v2732_v33 = vmul.f32 %v5339_v41, %v2676_v3  ;;  %v5865_v54 = vld [vmem:[#allocation48_spill] sm:$0xff] }
 0x4a2   : > { %v3481_v53 = vpop.f32.mrf.mxu1  ;;  %v2756_v63 = vmul.f32 %v5342_v37, %v5865_v54 }
 0x4a3   : > { %v2681_v8 = vadd.f32 %v3480_v25, %v5337_v7  ;;  %v5369_v49 = vadd.f32 %v2750_v47, %v2732_v33  ;;  %v5866_v47 = vld [vmem:[#allocation49_spill] sm:$0xff] }
 0x4a4   : > { %v3482_v59 = vpop.f32.mrf.mxu1 }
 0x4a5   : > { %v3483_v43 = vadd.f32 %v3482_v59, %v3481_v53  ;;  %v2733_v2 = vmul.f32 %v5339_v41, %v2681_v8  ;;  %2785 = vadd.xlane.f32.xlu1 %v5369_v49  ;;  %v2757_v8 = vmul.f32 %v5342_v37, %v5866_v47 }
 0x4a6   : > { %v3484_v35 = vpop.f32.mrf.mxu1 }
 0x4a7   : > { %v2684_v34 = vadd.f32 %v3483_v43, %v5337_v7  ;;  %v5376_v40 = vadd.f32 %v2751_v4, %v2733_v2 }
 0x4a8   : > { %v3485_v61 = vpop.f32.mrf.mxu1 }
 0x4a9   : > { %2787 = vadd.xlane.f32.xlu0 %v5376_v40  ;;  %v2734_v22 = vmul.f32 %v5339_v41, %v2684_v34  ;;  %v3486_v0 = vadd.f32 %v3485_v61, %v3484_v35  ;;  %v5867_v61 = vld [vmem:[#allocation46_spill] sm:$0xff] }
 0x4aa   : > { %v3487_v29 = vpop.f32.mrf.mxu1 }
 0x4ab   : > { %v5382_v1 = vadd.f32 %v2752_v31, %v2734_v22  ;;  %v2689_v17 = vadd.f32 %v3486_v0, %v5337_v7  ;;  %v2758_v22 = vmul.f32 %v5342_v37, %v5867_v61 }
 0x4ac   : > { %v3488_v56 = vpop.f32.mrf.mxu1 }
 0x4ad   : > { %2789 = vadd.xlane.f32.xlu1 %v5382_v1  ;;  %v3489_v39 = vadd.f32 %v3488_v56, %v3487_v29  ;;  %v2735_v46 = vmul.f32 %v5339_v41, %v2689_v17 }
 0x4ae   : > { %v3490_v23 = vpop.f32.mrf.mxu1 }
 0x4af   : > { %v2692_v10 = vadd.f32 %v3489_v39, %v5337_v7  ;;  %v5390_v11 = vadd.f32 %v2753_v24, %v2735_v46  ;;  %v5868_v46 = vld [vmem:[#allocation51_spill] sm:$0xff] }
 0x4b0   : > { %v3491_v57 = vpop.f32.mrf.mxu1  ;;  %v2759_v24 = vmul.f32 %v5342_v37, %v5868_v46 }
 0x4b1   : > { %v3492_v36 = vadd.f32 %v3491_v57, %v3490_v23  ;;  %2791 = vadd.xlane.f32.xlu0 %v5390_v11  ;;  %v2736_v52 = vmul.f32 %v5339_v41, %v2692_v10 }
 0x4b2   : > { %v3493_v12 = vpop.f32.mrf.mxu1 }
 0x4b3   : > { %v2697_v58 = vadd.f32 %v3492_v36, %v5337_v7  ;;  %v5397_v13 = vadd.f32 %v2754_v28, %v2736_v52 }
 0x4b4   : > { %v3494_v20 = vpop.f32.mrf.mxu1 }
 0x4b5   : > { %v3495_v6 = vadd.f32 %v3494_v20, %v3493_v12  ;;  %2793 = vadd.xlane.f32.xlu1 %v5397_v13  ;;  %v2737_v51 = vmul.f32 %v5339_v41, %v2697_v58  ;;  %v5869_v12 = vld [vmem:[#allocation52_spill] sm:$0xff] }
 0x4b6   : > { %v3496_v26 = vpop.f32.mrf.mxu1  ;;  %v2760_v58 = vmul.f32 %v5342_v37, %v5869_v12 }
 0x4b7   : > { %v2700_v5 = vadd.f32 %v3495_v6, %v5337_v7  ;;  %v5404_v18 = vadd.f32 %v2755_v48, %v2737_v51 }
 0x4b8   : > { %v3497_v55 = vpop.f32.mrf.mxu1 }
 0x4b9   : > { %v3498_v16 = vadd.f32 %v3497_v55, %v3496_v26  ;;  %2795 = vadd.xlane.f32.xlu0 %v5404_v18  ;;  %v2738_v60 = vmul.f32 %v5339_v41, %v2700_v5  ;;  %v5870_v55 = vld [vmem:[#allocation53_spill] sm:$0xff] }
 0x4ba   : > { %v3499_v32 = vpop.f32.mrf.mxu1 }
 0x4bb   : > { %v2705_v3 = vadd.f32 %v3498_v16, %v5337_v7  ;;  %v5411_v38 = vadd.f32 %v2756_v63, %v2738_v60  ;;  %v2761_v16 = vmul.f32 %v5342_v37, %v5870_v55 }
 0x4bc   : > { %v3500_v25 = vpop.f32.mrf.mxu1 }
 0x4bd   : > { %v3501_v53 = vadd.f32 %v3500_v25, %v3499_v32  ;;  %2797 = vadd.xlane.f32.xlu1 %v5411_v38  ;;  %v2739_v33 = vmul.f32 %v5339_v41, %v2705_v3  ;;  %v5871_v3 = vld [vmem:[#allocation50_spill] sm:$0xff] }
 0x4be   : > { %v3502_v59 = vpop.f32.mrf.mxu1  ;;  %v2762_v25 = vmul.f32 %v5342_v37, %v5871_v3 }
 0x4bf   : > { %v2708_v43 = vadd.f32 %v3501_v53, %v5337_v7  ;;  %v5418_v2 = vadd.f32 %v2757_v8, %v2739_v33 }
 0x4c0   : > { %v3503_v4 = vpop.f32.mrf.mxu1 }
 0x4c1   : > { %v3504_v34 = vadd.f32 %v3503_v4, %v3502_v59  ;;  %2799 = vadd.xlane.f32.xlu0 %v5418_v2  ;;  %v2740_v35 = vmul.f32 %v5339_v41, %v2708_v43 }
 0x4c2   : > { %v3505_v31 = vpop.f32.mrf.mxu1 }
 0x4c3   : > { %v2713_v0 = vadd.f32 %v3504_v34, %v5337_v7  ;;  %v5425_v29 = vadd.f32 %v2758_v22, %v2740_v35 }
 0x4c4   : > { %v3506_v17 = vpop.f32.mrf.mxu1 }
 0x4c5   : > { %v3507_v56 = vadd.f32 %v3506_v17, %v3505_v31  ;;  %2801 = vadd.xlane.f32.xlu1 %v5425_v29  ;;  %v2741_v39 = vmul.f32 %v5339_v41, %v2713_v0 }
 0x4c6   : > { %v3508_v23 = vpop.f32.mrf.mxu1 }
 0x4c7   : > { %v2716_v10 = vadd.f32 %v3507_v56, %v5337_v7  ;;  %v5432_v57 = vadd.f32 %v2759_v24, %v2741_v39 }
 0x4c8   : > { %v3509_v36 = vpop.f32.mrf.mxu1 }
 0x4c9   : > { %v3510_v52 = vadd.f32 %v3509_v36, %v3508_v23  ;;  %2803 = vadd.xlane.f32.xlu0 %v5432_v57  ;;  %v2742_v28 = vmul.f32 %v5339_v41, %v2716_v10 }
 0x4ca   : > { %v3511_v20 = vpop.f32.mrf.mxu1 }
 0x4cb   : > { %v2721_v6 = vadd.f32 %v3510_v52, %v5337_v7  ;;  %v5439_v51 = vadd.f32 %v2760_v58, %v2742_v28 }
 0x4cc   : > { %v3512_v48 = vpop.f32.mrf.mxu1 }
 0x4cd   : > { %v3513_v26 = vadd.f32 %v3512_v48, %v3511_v20  ;;  %2805 = vadd.xlane.f32.xlu1 %v5439_v51  ;;  %v2743_v5 = vmul.f32 %v5339_v41, %v2721_v6 }
 0x4cf   : > { %v2724_v60 = vadd.f32 %v3513_v26, %v5337_v7  ;;  %v5446_v63 = vadd.f32 %v2761_v16, %v2743_v5 }
 0x4d1   : > { %2807 = vadd.xlane.f32.xlu0 %v5446_v63  ;;  %v2744_v32 = vmul.f32 %v5339_v41, %v2724_v60 }
 0x4d3   : > { %v5452_v53 = vadd.f32 %v2762_v25, %v2744_v32 }
 0x4d5   : > { %2809 = vadd.xlane.f32.xlu1 %v5452_v53 }
 0x520   : > { %v2780_v33 = vpop.xlane.xlu0 %2779 }
 0x521   : > { %v2812_v8 = vmul.f32 0.0078125, %v2780_v33 }
 0x523   : > { %v5456_v59 = vsub.f32 %v5348_v9, %v2812_v8 }
 0x524   : > { %v2782_v43 = vpop.xlane.xlu0 %2781 }
 0x525   : > { %v2813_v7 = vmul.f32 0.0078125, %v2782_v43  ;;  %v2844_v4 = vmul.f32 %v5456_v59, %v5456_v59 }
 0x527   : > { %v5461_v34 = vsub.f32 %v5354_v50, %v2813_v7  ;;  %2860 = vadd.xlane.f32.xlu0 %v2844_v4 }
 0x529   : > { %v2845_v41 = vmul.f32 %v5461_v34, %v5461_v34 }
 0x52a   : > { %v2784_v37 = vpop.xlane.xlu1 %2783 }
 0x52b   : > { %2862 = vadd.xlane.f32.xlu1 %v2845_v41  ;;  %v2814_v35 = vmul.f32 0.0078125, %v2784_v37 }
 0x52d   : > { %v5466_v22 = vsub.f32 %v5362_v19, %v2814_v35 }
 0x52e   : > { %v2786_v9 = vpop.xlane.xlu1 %2785 }
 0x52f   : > { %v2815_v31 = vmul.f32 0.0078125, %v2786_v9  ;;  %v2846_v0 = vmul.f32 %v5466_v22, %v5466_v22 }
 0x531   : > { %v5471_v17 = vsub.f32 %v5369_v49, %v2815_v31  ;;  %2864 = vadd.xlane.f32.xlu0 %v2846_v0 }
 0x532   : > { %v2788_v50 = vpop.xlane.xlu0 %2787 }
 0x533   : > { %v2816_v56 = vmul.f32 0.0078125, %v2788_v50  ;;  %v2847_v39 = vmul.f32 %v5471_v17, %v5471_v17 }
 0x535   : > { %v5476_v24 = vsub.f32 %v5376_v40, %v2816_v56  ;;  %2866 = vadd.xlane.f32.xlu1 %v2847_v39 }
 0x536   : > { %v2790_v19 = vpop.xlane.xlu1 %2789 }
 0x537   : > { %v2817_v23 = vmul.f32 0.0078125, %v2790_v19  ;;  %v2848_v10 = vmul.f32 %v5476_v24, %v5476_v24 }
 0x539   : > { %v5481_v36 = vsub.f32 %v5382_v1, %v2817_v23  ;;  %2868 = vadd.xlane.f32.xlu0 %v2848_v10 }
 0x53a   : > { %v2792_v49 = vpop.xlane.xlu0 %2791 }
 0x53b   : > { %v2849_v52 = vmul.f32 %v5481_v36, %v5481_v36  ;;  %v2818_v28 = vmul.f32 0.0078125, %v2792_v49 }
 0x53d   : > { %2870 = vadd.xlane.f32.xlu1 %v2849_v52  ;;  %v5486_v58 = vsub.f32 %v5390_v11, %v2818_v28 }
 0x53e   : > { %v2794_v40 = vpop.xlane.xlu1 %2793 }
 0x53f   : > { %v2819_v20 = vmul.f32 0.0078125, %v2794_v40  ;;  %v2850_v6 = vmul.f32 %v5486_v58, %v5486_v58 }
 0x541   : > { %v5491_v48 = vsub.f32 %v5397_v13, %v2819_v20  ;;  %2872 = vadd.xlane.f32.xlu0 %v2850_v6 }
 0x542   : > { %v2796_v1 = vpop.xlane.xlu0 %2795 }
 0x543   : > { %v2820_v26 = vmul.f32 0.0078125, %v2796_v1  ;;  %v2851_v5 = vmul.f32 %v5491_v48, %v5491_v48 }
 0x545   : > { %v5496_v16 = vsub.f32 %v5404_v18, %v2820_v26  ;;  %2874 = vadd.xlane.f32.xlu1 %v2851_v5 }
 0x546   : > { %v2798_v11 = vpop.xlane.xlu1 %2797 }
 0x547   : > { %v2821_v60 = vmul.f32 0.0078125, %v2798_v11  ;;  %v2852_v32 = vmul.f32 %v5496_v16, %v5496_v16 }
 0x549   : > { %v5501_v25 = vsub.f32 %v5411_v38, %v2821_v60  ;;  %2876 = vadd.xlane.f32.xlu0 %v2852_v32  ;;  %v5538_v32 = vld [vmem:[%s5872_s8] ss:$0 sm:$0xff]  ;;  %s4292_s8 = scalar_lea.vmem %s4291_s23, 4096 }
 0x54a   : > { %v2800_v13 = vpop.xlane.xlu0 %2799  ;;  %p4294_p8 = scmp.lt.s32.totalorder %s4292_s8, %s4286_s12 }
 0x54b   : > { %v2822_v33 = vmul.f32 0.0078125, %v2800_v13  ;;  %v2853_v8 = vmul.f32 %v5501_v25, %v5501_v25 }
 0x54c   : > { %p4295_p9 = por %p4294_p8, %p4293_p5 }
 0x54d   : > { %v5506_v43 = vsub.f32 %v5418_v2, %v2822_v33  ;;  %2878 = vadd.xlane.f32.xlu1 %v2853_v8 }
 0x54e   : > { %v2802_v18 = vpop.xlane.xlu1 %2801  ;;  %p4296_p2 = pnand %p4295_p9, %p4289_p3 }
 0x54f   : > { %v2823_v7 = vmul.f32 0.0078125, %v2802_v18  ;;  %v2854_v4 = vmul.f32 %v5506_v43, %v5506_v43 }
 0x551   : > { %v5511_v41 = vsub.f32 %v5425_v29, %v2823_v7  ;;  %2880 = vadd.xlane.f32.xlu0 %v2854_v4  ;;  %v5544_v7 = vld [vmem:[%s5873_s9] ss:$0 sm:$0xff] }
 0x552   : > { %v2804_v38 = vpop.xlane.xlu0 %2803 }
 0x553   : > { %v2824_v37 = vmul.f32 0.0078125, %v2804_v38  ;;  %v2855_v35 = vmul.f32 %v5511_v41, %v5511_v41 }
 0x555   : > { %v5516_v9 = vsub.f32 %v5432_v57, %v2824_v37  ;;  %2882 = vadd.xlane.f32.xlu1 %v2855_v35 }
 0x556   : > { %v2806_v2 = vpop.xlane.xlu1 %2805 }
 0x557   : > { %v2825_v31 = vmul.f32 0.0078125, %v2806_v2  ;;  %v2856_v0 = vmul.f32 %v5516_v9, %v5516_v9 }
 0x559   : > { %v5521_v50 = vsub.f32 %v5439_v51, %v2825_v31  ;;  %2884 = vadd.xlane.f32.xlu0 %v2856_v0 }
 0x55a   : > { %v2808_v29 = vpop.xlane.xlu0 %2807 }
 0x55b   : > { %v2826_v56 = vmul.f32 0.0078125, %v2808_v29  ;;  %v2857_v39 = vmul.f32 %v5521_v50, %v5521_v50 }
 0x55d   : > { %v5526_v19 = vsub.f32 %v5446_v63, %v2826_v56  ;;  %2886 = vadd.xlane.f32.xlu1 %v2857_v39 }
 0x55e   : > { %v2810_v57 = vpop.xlane.xlu1 %2809 }
 0x55f   : > { %v2827_v23 = vmul.f32 0.0078125, %v2810_v57  ;;  %v2858_v10 = vmul.f32 %v5526_v19, %v5526_v19 }
 0x561   : > { %v5531_v49 = vsub.f32 %v5452_v53, %v2827_v23  ;;  %2888 = vadd.xlane.f32.xlu0 %v2858_v10 }
 0x563   : > { %v2859_v51 = vmul.f32 %v5531_v49, %v5531_v49 }
 0x565   : > { %2890 = vadd.xlane.f32.xlu1 %v2859_v51 }
 0x5b0   : > { %v2861_v52 = vpop.xlane.xlu0 %2860 }
 0x5b1   : > { %v2892_v28 = vmul.f32 0.0078125, %v2861_v52 }
 0x5b3   : > { %v2908_v40 = vadd.f32 1e-05, %v2892_v28 }
 0x5b4   : > { %v2863_v20 = vpop.xlane.xlu1 %2862 }
 0x5b5   : > { %3990 = vrsqrt.f32 %v2908_v40  ;;  %v2893_v63 = vmul.f32 0.0078125, %v2863_v20 }
 0x5b7   : > { %v2909_v6 = vadd.f32 1e-05, %v2893_v63 }
 0x5b9   : > { %3992 = vrsqrt.f32 %v2909_v6 }
 0x5ba   : > { %v2865_v1 = vpop.xlane.xlu0 %2864 }
 0x5bb   : > { %v2894_v26 = vmul.f32 0.0078125, %v2865_v1 }
 0x5bd   : > { %v2910_v5 = vadd.f32 1e-05, %v2894_v26 }
 0x5be   : > { %v2867_v11 = vpop.xlane.xlu1 %2866 }
 0x5bf   : > { %3994 = vrsqrt.f32 %v2910_v5  ;;  %v2895_v53 = vmul.f32 0.0078125, %v2867_v11 }
 0x5c1   : > { %v2911_v13 = vadd.f32 1e-05, %v2895_v53 }
 0x5c2   : > { %v3991_v60 = vpop.eup %3990  ;;  %v2869_v33 = vpop.xlane.xlu0 %2868 }
 0x5c3   : > { %v2940_v8 = vmul.f32 %v3991_v60, %v5456_v59  ;;  %v2896_v18 = vmul.f32 0.0078125, %v2869_v33  ;;  %3996 = vrsqrt.f32 %v2911_v13 }
 0x5c5   : > { %v2963_v4 = vmul.f32 %v5538_v32, %v2940_v8  ;;  %v2912_v38 = vadd.f32 1e-05, %v2896_v18 }
 0x5c6   : > { %v3993_v37 = vpop.eup %3992  ;;  %v2871_v35 = vpop.xlane.xlu1 %2870 }
 0x5c7   : > { %v2986_v2 = vadd.f32 %v5544_v7, %v2963_v4  ;;  %v2941_v31 = vmul.f32 %v3993_v37, %v5461_v34  ;;  %3998 = vrsqrt.f32 %v2912_v38  ;;  %v2897_v0 = vmul.f32 0.0078125, %v2871_v35 }
 0x5c9   : > { %v3002_v59 = vadd.f32 %v2986_v2, %v5856_v27  ;;  %v2964_v29 = vmul.f32 %v5538_v32, %v2941_v31  ;;  %v2913_v56 = vadd.f32 1e-05, %v2897_v0 }
 0x5ca   : > { %v2873_v57 = vpop.xlane.xlu0 %2872 }
 0x5cb   : > { %3018 = vst [vmem:[%s4854_s11] sm:$0xff] %v3002_v59  ;;  %v2987_v39 = vadd.f32 %v5544_v7, %v2964_v29  ;;  %4000 = vrsqrt.f32 %v2913_v56  ;;  %v2898_v23 = vmul.f32 0.0078125, %v2873_v57 }
 0x5cc   : > { %v3995_v10 = vpop.eup %3994 }
 0x5cd   : > { %v3003_v51 = vadd.f32 %v2987_v39, %v5857_v45  ;;  %v2942_v52 = vmul.f32 %v3995_v10, %v5466_v22  ;;  %v2914_v28 = vadd.f32 1e-05, %v2898_v23 }
 0x5ce   : > { %v2875_v34 = vpop.xlane.xlu1 %2874 }
 0x5cf   : > { %3019 = vst [vmem:[%s4854_s11 + $0x8] sm:$0xff] %v3003_v51  ;;  %v2965_v27 = vmul.f32 %v5538_v32, %v2942_v52  ;;  %4002 = vrsqrt.f32 %v2914_v28  ;;  %v2899_v40 = vmul.f32 0.0078125, %v2875_v34 }
 0x5d0   : > { %v3997_v20 = vpop.eup %3996 }
 0x5d1   : > { %v2988_v63 = vadd.f32 %v5544_v7, %v2965_v27  ;;  %v2943_v6 = vmul.f32 %v3997_v20, %v5471_v17  ;;  %v2915_v1 = vadd.f32 1e-05, %v2899_v40 }
 0x5d2   : > { %v2877_v26 = vpop.xlane.xlu0 %2876 }
 0x5d3   : > { %v3004_v45 = vadd.f32 %v2988_v63, %v5858_v15  ;;  %v2966_v22 = vmul.f32 %v5538_v32, %v2943_v6  ;;  %4004 = vrsqrt.f32 %v2915_v1  ;;  %v2900_v11 = vmul.f32 0.0078125, %v2877_v26 }
 0x5d4   : > { %v3999_v5 = vpop.eup %3998 }
 0x5d5   : > { %v2944_v53 = vmul.f32 %v3999_v5, %v5476_v24  ;;  %3020 = vst [vmem:[%s4854_s11 + $0x10] sm:$0xff] %v3004_v45  ;;  %v2989_v60 = vadd.f32 %v5544_v7, %v2966_v22  ;;  %v2916_v13 = vadd.f32 1e-05, %v2900_v11 }
 0x5d6   : > { %v2879_v17 = vpop.xlane.xlu1 %2878 }
 0x5d7   : > { %v2967_v33 = vmul.f32 %v5538_v32, %v2944_v53  ;;  %v3005_v18 = vadd.f32 %v2989_v60, %v5859_v30  ;;  %4006 = vrsqrt.f32 %v2916_v13  ;;  %v2901_v15 = vmul.f32 0.0078125, %v2879_v17 }
 0x5d8   : > { %v4001_v8 = vpop.eup %4000 }
 0x5d9   : > { %v2990_v4 = vadd.f32 %v5544_v7, %v2967_v33  ;;  %v2945_v38 = vmul.f32 %v4001_v8, %v5481_v36  ;;  %3021 = vst [vmem:[%s4854_s11 + $0x18] sm:$0xff] %v3005_v18  ;;  %v2917_v37 = vadd.f32 1e-05, %v2901_v15 }
 0x5da   : > { %v2881_v2 = vpop.xlane.xlu0 %2880 }
 0x5db   : > { %v3006_v24 = vadd.f32 %v2990_v4, %v5860_v62  ;;  %v2968_v35 = vmul.f32 %v5538_v32, %v2945_v38  ;;  %4008 = vrsqrt.f32 %v2917_v37  ;;  %v2902_v31 = vmul.f32 0.0078125, %v2881_v2 }
 0x5dc   : > { %v4003_v0 = vpop.eup %4002 }
 0x5dd   : > { %3022 = vst [vmem:[%s4854_s11 + $0x20] sm:$0xff] %v3006_v24  ;;  %v2991_v30 = vadd.f32 %v5544_v7, %v2968_v35  ;;  %v2946_v59 = vmul.f32 %v4003_v0, %v5486_v58  ;;  %v2918_v29 = vadd.f32 1e-05, %v2902_v31 }
 0x5de   : > { %v2883_v36 = vpop.xlane.xlu1 %2882 }
 0x5df   : > { %v3007_v56 = vadd.f32 %v2991_v30, %v5861_v14  ;;  %v2969_v39 = vmul.f32 %v5538_v32, %v2946_v59  ;;  %4010 = vrsqrt.f32 %v2918_v29  ;;  %v2903_v62 = vmul.f32 0.0078125, %v2883_v36 }
 0x5e0   : > { %v4005_v57 = vpop.eup %4004 }
 0x5e1   : > { %3023 = vst [vmem:[%s4854_s11 + $0x28] sm:$0xff] %v3007_v56  ;;  %v2992_v23 = vadd.f32 %v5544_v7, %v2969_v39  ;;  %v2947_v10 = vmul.f32 %v4005_v57, %v5491_v48  ;;  %v2919_v51 = vadd.f32 1e-05, %v2903_v62 }
 0x5e2   : > { %v2885_v52 = vpop.xlane.xlu0 %2884 }
 0x5e3   : > { %v3008_v58 = vadd.f32 %v2992_v23, %v5862_v42  ;;  %v2970_v28 = vmul.f32 %v5538_v32, %v2947_v10  ;;  %4012 = vrsqrt.f32 %v2919_v51  ;;  %v2904_v14 = vmul.f32 0.0078125, %v2885_v52 }
 0x5e4   : > { %v4007_v34 = vpop.eup %4006 }
 0x5e5   : > { %3024 = vst [vmem:[%s4854_s11 + $0x30] sm:$0xff] %v3008_v58  ;;  %v2993_v27 = vadd.f32 %v5544_v7, %v2970_v28  ;;  %v2948_v40 = vmul.f32 %v4007_v34, %v5496_v16  ;;  %v2920_v20 = vadd.f32 1e-05, %v2904_v14 }
 0x5e6   : > { %v2887_v63 = vpop.xlane.xlu1 %2886 }
 0x5e7   : > { %v3009_v48 = vadd.f32 %v2993_v27, %v5863_v44  ;;  %v2971_v6 = vmul.f32 %v5538_v32, %v2948_v40  ;;  %4014 = vrsqrt.f32 %v2920_v20  ;;  %v2905_v1 = vmul.f32 0.0078125, %v2887_v63 }
 0x5e8   : > { %v4009_v42 = vpop.eup %4008 }
 0x5e9   : > { %3025 = vst [vmem:[%s4854_s11 + $0x38] sm:$0xff] %v3009_v48  ;;  %v2994_v26 = vadd.f32 %v5544_v7, %v2971_v6  ;;  %v2949_v5 = vmul.f32 %v4009_v42, %v5501_v25  ;;  %v2921_v45 = vadd.f32 1e-05, %v2905_v1 }
 0x5ea   : > { %v2889_v22 = vpop.xlane.xlu0 %2888 }
 0x5eb   : > { %v3010_v16 = vadd.f32 %v2994_v26, %v5864_v21  ;;  %v2972_v11 = vmul.f32 %v5538_v32, %v2949_v5  ;;  %4016 = vrsqrt.f32 %v2921_v45  ;;  %v2906_v53 = vmul.f32 0.0078125, %v2889_v22 }
 0x5ec   : > { %v4011_v44 = vpop.eup %4010 }
 0x5ed   : > { %3026 = vst [vmem:[%s4854_s11 + $0x40] sm:$0xff] %v3010_v16  ;;  %v2995_v60 = vadd.f32 %v5544_v7, %v2972_v11  ;;  %v2950_v13 = vmul.f32 %v4011_v44, %v5506_v43  ;;  %v2922_v33 = vadd.f32 1e-05, %v2906_v53 }
 0x5ee   : > { %v2891_v17 = vpop.xlane.xlu1 %2890 }
 0x5ef   : > { %v3011_v25 = vadd.f32 %v2995_v60, %v5865_v54  ;;  %v2973_v8 = vmul.f32 %v5538_v32, %v2950_v13  ;;  %4018 = vrsqrt.f32 %v2922_v33  ;;  %v2907_v18 = vmul.f32 0.0078125, %v2891_v17 }
 0x5f0   : > { %v4013_v21 = vpop.eup %4012 }
 0x5f1   : > { %3027 = vst [vmem:[%s4854_s11 + $0x48] sm:$0xff] %v3011_v25  ;;  %v2996_v15 = vadd.f32 %v5544_v7, %v2973_v8  ;;  %v2951_v4 = vmul.f32 %v4013_v21, %v5511_v41  ;;  %v2923_v38 = vadd.f32 1e-05, %v2907_v18 }
 0x5f3   : > { %v3012_v37 = vadd.f32 %v2996_v15, %v5866_v47  ;;  %v2974_v43 = vmul.f32 %v5538_v32, %v2951_v4  ;;  %4020 = vrsqrt.f32 %v2923_v38 }
 0x5f4   : > { %v4015_v24 = vpop.eup %4014 }
 0x5f5   : > { %3028 = vst [vmem:[%s4854_s11 + $0x50] sm:$0xff] %v3012_v37  ;;  %v2997_v54 = vadd.f32 %v5544_v7, %v2974_v43  ;;  %v2952_v35 = vmul.f32 %v4015_v24, %v5516_v9 }
 0x5f7   : > { %v3013_v2 = vadd.f32 %v2997_v54, %v5867_v61  ;;  %v2975_v31 = vmul.f32 %v5538_v32, %v2952_v35 }
 0x5f8   : > { %v4017_v41 = vpop.eup %4016 }
 0x5f9   : > { %3029 = vst [vmem:[%s4854_s11 + $0x58] sm:$0xff] %v3013_v2  ;;  %v2998_v47 = vadd.f32 %v5544_v7, %v2975_v31  ;;  %v2953_v0 = vmul.f32 %v4017_v41, %v5521_v50 }
 0x5fb   : > { %v3014_v30 = vadd.f32 %v2998_v47, %v5868_v46  ;;  %v2976_v59 = vmul.f32 %v5538_v32, %v2953_v0 }
 0x5fc   : > { %v4019_v29 = vpop.eup %4018 }
 0x5fd   : > { %3030 = vst [vmem:[%s4854_s11 + $0x60] sm:$0xff] %v3014_v30  ;;  %v2999_v9 = vadd.f32 %v5544_v7, %v2976_v59  ;;  %v2954_v61 = vmul.f32 %v4019_v29, %v5526_v19 }
 0x5ff   : > { %v3015_v56 = vadd.f32 %v2999_v9, %v5869_v12  ;;  %v2977_v36 = vmul.f32 %v5538_v32, %v2954_v61 }
 0x600   : > { %v4021_v50 = vpop.eup %4020 }
 0x601   : > { %3031 = vst [vmem:[%s4854_s11 + $0x68] sm:$0xff] %v3015_v56  ;;  %v3000_v46 = vadd.f32 %v5544_v7, %v2977_v36  ;;  %v2955_v39 = vmul.f32 %v4021_v50, %v5531_v49 }
 0x603   : > { %v3016_v62 = vadd.f32 %v3000_v46, %v5870_v55  ;;  %v2978_v19 = vmul.f32 %v5538_v32, %v2955_v39 }
 0x605   : > { %3032 = vst [vmem:[%s4854_s11 + $0x70] sm:$0xff] %v3016_v62  ;;  %v3001_v12 = vadd.f32 %v5544_v7, %v2978_v19 }
 0x607   : > { %v3017_v57 = vadd.f32 %v3001_v12, %v5871_v3 }
 0x609   : > { %3033 = vst [vmem:[%s4854_s11 + $0x78] sm:$0xff] %v3017_v57 }
 0x60a   : > { %4299 = shalt.err (!%p4296_p2)
}
 0x60b   : > { %s4300_s14 = scalar_lea.hbm %s5632_s7, 2048  ;;  %s4304_s22 = scalar_lea.hbm %s5877_s1, 8192 }
 0x60c   : > { %p4301_p7 = scmp.ne.s32.totalorder %s5632_s7, %s4300_s14  ;;  %p4305_p0 = scmp.lt.s32.totalorder %s5632_s7, %s5877_s1 }
 0x60d   : > { %p4306_p10 = scmp.lt.s32.totalorder %s4304_s22, %s4300_s14 }
 0x60e   : > { %p4302_p11 = pnand %p4301_p7, %p5878_p13 }
 0x60f   : > { %p4307_p12 = por %p4306_p10, %p4305_p0 }
 0x610   : > { %p4303_p1 = pneg %p4302_p11 }
 0x612   : > { %p4308_p6 = pnand %p4307_p12, %p4303_p1 }
 0x614   : > { %4311 = shalt.err (!%p4308_p6)
}
 0x615   : > { %s4449_s16 = smov 128   ;;  %s4450_s3 = smov 8  }
 0x616   : > { %3726 = dma.vmem_to_hbm [thread:$0]  (%p5878_p13), %s5626_s5, 2048, %s5632_s7, %s5637_s29, %s4449_s16, %s4449_s16, %s4450_s3  }
 0x617 PF: > { %s5879_s20 = sld [smem:[#allocation30_spill]]  ;;  %p3781_p4 = scmp.ge.s32.totalorder %s4430_s19, 2 }
 0x618   : > { %p5880_p3 = scmp.ne.s32.totalorder %s5817_s27, 0 }
 0x61a   : > { %p3761_p5 = pnand %p3781_p4, %p5880_p3 }
 0x61c   : > { %p3762_p8 = pneg %p3761_p5 }
 0x61d   : > { %s3065_s21 = sand.u32 1, %s5879_s20  }
 0x61e   : > { %s3066_s13 = scalar_lea.sflag [#allocation6], %s3065_s21 }
 0x61f   : > { %4385 = dma.done.wait (%p3762_p8), %s3066_s13, 2048  }
 0x620   : > { %4387 = vsyncadd (%p3762_p8), %s3066_s13, 4294965248  ;;  %s40_s19 = sadd.s32 1, %s4430_s19   ;;  %s5881_s4 = sld [smem:[#allocation31_spill]] }
 0x621   : > { %p37_p9 = scmp.ge.s32.totalorder %s40_s19, 6   ;;  %s5882_s29 = sld [smem:[#allocation36_spill]] }
 0x622   : > { %s5883_s5 = sld [smem:[#allocation35_spill]]  ;;  %s5885_s24 = smov %s4394_s25 }
 0x623   : > { %s5884_s6 = sld [smem:[#allocation37_spill]]  ;;  %s5886_s25 = smov %s4398_s26 }
 0x624   : > { %s5887_s26 = smov %s4794_s2  ;;  %s5888_s27 = smov %s4406_s28 }
 0x625   : > { %s5890_s30 = smov %s4422_s17  ;;  %s5891_s0 = smov %s4426_s18 }
 0x626   : > { %s5889_s28 = smov %s5881_s4  ;;  %39 = sbr.rel (!%p37_p9) target bundleno = 40 (0x28), region = 178 }
 0x628   : > { %s5892_s17 = smov %s5883_s5 }
 0x629   : > { %s5893_s18 = smov %s5884_s6 }
 0x62b   :  { %3071 = vsyncpa [#allocation5], 1 }
 0x62c   :  { %3073 = vsyncpa [#allocation5 + $0x1], 1 }
 0x62d   :  { %3074 = vsyncpa [#allocation8], 1 }
 0x62e   :  { %3076 = vsyncpa [#allocation8 + $0x1], 1 }
 0x62f   :  { %3077 = vsyncpa [#allocation11], 1 }
 0x630   :  { %3078 = vsyncpa [#allocation14], 1 }
 0x631   :  { %3079 = vsyncpa [#allocation17], 1 }
 0x632   :  { %3080 = vsyncpa [#allocation20], 1 }
 0x633   :  { %3081 = vsyncpa [#allocation6], 1 }
 0x634   :  { %3083 = vsyncpa [#allocation6 + $0x1], 1 }

</bundles_post_ra>
